<compile_context>
chip_gen: v5e
topology: v5e:2x2
jax: 0.10.0
libtpu: 0.0.40
codegen_flags: <defaults>
</compile_context>

<pallas_src>
import functools

import jax
import jax.numpy as jnp
from jax import lax
from jax.experimental import pallas as pl
from jax.experimental.pallas import tpu as pltpu

_TRANS_B = (((1,), (1,)), ((), ()))   # dot_general dims for q @ k^T without explicit .T


def _layernorm(x, w, b, eps=1e-5):
    # One-pass statistics: mean and mean-of-squares are independent reductions.
    mu = jnp.mean(x, axis=-1, keepdims=True)
    ms = jnp.mean(x * x, axis=-1, keepdims=True)
    var = ms - mu * mu
    return (x - mu) * lax.rsqrt(var + eps) * w + b


# ----------------------------------------------------------------------------
# Fused kernel: one invocation processes the whole (B*S) token slab.
# ----------------------------------------------------------------------------
def _fused_trace_encoder_kernel(
        x_ref, wproj_ref, pe_ref,
        wqkv_ref, bqkv_ref, wo_ref, vecd_ref,
        w1_ref, b1_ref, w2_ref,
        o_ref, *, num_layers, nhead, head_dim, batch, seq):
    D = nhead * head_dim
    N = batch * seq
    bf16 = jnp.bfloat16

    # input projection (Conv1d k=1 == per-token linear); conv bias is pre-folded
    # into the positional-encoding slab (pe_ref is already tiled per token).
    h = (jnp.dot(x_ref[...].astype(bf16), wproj_ref[...],
                 preferred_element_type=jnp.float32) + pe_ref[...])       # (N, D) f32

    for l in range(num_layers):
        # ---- multi-head self-attention (scale pre-folded into Q weights) ----
        hb = h.astype(bf16)
        attn = jnp.zeros((N, D), jnp.float32)
        for hd in range(nhead):
            base = (l * 3 + 0) * nhead + hd
            # Per-head Q/K/V come straight out of per-head weight slabs, so all
            # slices below are lane-offset-0 (no lane extraction / XLU shuffles).
            qh = (jnp.dot(hb, wqkv_ref[base], preferred_element_type=jnp.float32)
                  + bqkv_ref[base])                              # (N, dh), pre-scaled
            kh = (jnp.dot(hb, wqkv_ref[base + nhead], preferred_element_type=jnp.float32)
                  + bqkv_ref[base + nhead])
            vh = (jnp.dot(hb, wqkv_ref[base + 2 * nhead], preferred_element_type=jnp.float32)
                  + bqkv_ref[base + 2 * nhead])
            parts = []
            for b in range(batch):                               # per-batch attention block
                lo = b * seq
                qb = qh[lo:lo + seq]                             # (S, dh) sublane slice
                kb = kh[lo:lo + seq]
                vb = vh[lo:lo + seq]
                s = lax.dot_general(qb, kb, _TRANS_B,
                                    preferred_element_type=jnp.float32)      # (S, S)
                s = s - jnp.max(s, axis=-1, keepdims=True)
                p = jnp.exp(s)
                p = p * pl.reciprocal(jnp.sum(p, axis=-1, keepdims=True), approx=True)
                parts.append(jnp.dot(p, vb, preferred_element_type=jnp.float32))
            oh = jnp.concatenate(parts, axis=0)                  # (N, dh)
            # fold this head straight through its (dh, D) slab of the out-projection.
            attn = attn + jnp.dot(oh.astype(bf16), wo_ref[l * nhead + hd],
                                  preferred_element_type=jnp.float32)        # (N, D)
        v0 = l * 6
        attn = attn + vecd_ref[v0 + 0]                           # out-proj bias
        h = _layernorm(h + attn, vecd_ref[v0 + 1], vecd_ref[v0 + 2])

        # ---- feed-forward ----
        h1 = jnp.maximum(
            jnp.dot(h.astype(bf16), w1_ref[l], preferred_element_type=jnp.float32)
            + b1_ref[l], 0.0)                                    # (N, F)
        ff = (jnp.dot(h1.astype(bf16), w2_ref[l], preferred_element_type=jnp.float32)
              + vecd_ref[v0 + 5])                                # (N, D)
        h = _layernorm(h + ff, vecd_ref[v0 + 3], vecd_ref[v0 + 4])

    o_ref[...] = h


def trace_encoder_forward(x, kp, *, nhead):
    """x: (B, S, input_dim) f32; kp: kernel-layout params from prepare_params()."""
    B, S, In = x.shape
    D = kp["wproj"].shape[1]
    L = kp["w1"].shape[0]
    head_dim = D // nhead
    N = B * S

    # Flatten tokens; tile the (conv-bias + positional-encoding) table per token.
    x2 = x.reshape(N, In)
    pe_b = jnp.broadcast_to(kp["pe_bias"][:S][None], (B, S, D)).reshape(N, D)

    kern = functools.partial(_fused_trace_encoder_kernel,
                             num_layers=L, nhead=nhead, head_dim=head_dim,
                             batch=B, seq=S)
    vmem = lambda: pl.BlockSpec(memory_space=pltpu.MemorySpace.VMEM)

    out = pl.pallas_call(
        kern,
        out_shape=jax.ShapeDtypeStruct((N, D), jnp.float32),
        in_specs=[vmem() for _ in range(10)],        # whole arrays resident in VMEM
        out_specs=vmem(),
    )(x2, kp["wproj"], pe_b,
      kp["wqkv"], kp["bqkv"], kp["wo"], kp["vecd"],
      kp["w1"], kp["b1"], kp["w2"])
    return out.reshape(B, S, D)


# ----------------------------------------------------------------------------
# Parameter construction (PyTorch layout) + one-time kernel-layout prep.
# ----------------------------------------------------------------------------
def make_positional_encoding(d_model, max_len):
    position = jnp.arange(max_len, dtype=jnp.float32)[:, None]
    div_term = jnp.exp(jnp.arange(0, d_model, 2, dtype=jnp.float32)
                       * (-jnp.log(jnp.float32(10000.0)) / d_model))
    ang = position * div_term                                    # (max_len, d_model/2)
    pe = jnp.stack([jnp.sin(ang), jnp.cos(ang)], axis=-1).reshape(max_len, d_model)
    return pe                                                    # (max_len, d_model)


def init_params(key, input_dim, conv_dim, num_layers, dim_feedforward, max_len):
    """Parameters in PyTorch layout (weight shape = (out, in))."""
    ks = jax.random.split(key, 2 + 8 * num_layers)
    it = iter(ks)
    nrm = lambda k, shape: (0.02 * jax.random.normal(k, shape)).astype(jnp.float32)
    params = {
        "w_proj": nrm(next(it), (conv_dim, input_dim)),
        "b_proj": nrm(next(it), (1, conv_dim)),
        "pe": make_positional_encoding(conv_dim, max_len),
        "layers": [],
    }
    for _ in range(num_layers):
        params["layers"].append({
            "wqkv": nrm(next(it), (3 * conv_dim, conv_dim)),
            "bqkv": nrm(next(it), (1, 3 * conv_dim)),
            "wo": nrm(next(it), (conv_dim, conv_dim)),
            "bo": nrm(next(it), (1, conv_dim)),
            "ln1w": jnp.ones((1, conv_dim), jnp.float32),
            "ln1b": jnp.zeros((1, conv_dim), jnp.float32),
            "ln2w": jnp.ones((1, conv_dim), jnp.float32),
            "ln2b": jnp.zeros((1, conv_dim), jnp.float32),
            "w1": nrm(next(it), (dim_feedforward, conv_dim)),
            "b1": nrm(next(it), (1, dim_feedforward)),
            "w2": nrm(next(it), (conv_dim, dim_feedforward)),
            "b2": nrm(next(it), (1, conv_dim)),
        })
    return params


def prepare_params(tp, *, nhead):
    """One-time host-side prep: per-head split, transposes, scale fold, bf16 weights."""
    D = tp["w_proj"].shape[0]
    head_dim = D // nhead
    scale = 1.0 / float(head_dim) ** 0.5
    bf16 = jnp.bfloat16

    wqkv_slabs, bqkv_slabs, wo_slabs = [], [], []
    vecd_rows, w1_l, b1_l, w2_l = [], [], [], []
    for layer in tp["layers"]:
        wqkv_t = layer["wqkv"].T                    # (D, 3D), cols = [Q | K | V]
        bqkv = layer["bqkv"][0]                     # (3D,)
        for j in range(3):                          # 0=Q (scaled), 1=K, 2=V
            w_j = wqkv_t[:, j * D:(j + 1) * D]      # (D, D)
            b_j = bqkv[j * D:(j + 1) * D]           # (D,)
            if j == 0:
                w_j = w_j * scale
                b_j = b_j * scale
            for hd in range(nhead):
                wqkv_slabs.append(w_j[:, hd * head_dim:(hd + 1) * head_dim])
                bqkv_slabs.append(b_j[hd * head_dim:(hd + 1) * head_dim])
        wo_t = layer["wo"].T                        # (D, D)
        for hd in range(nhead):
            wo_slabs.append(wo_t[hd * head_dim:(hd + 1) * head_dim, :])
        vecd_rows += [layer["bo"][0], layer["ln1w"][0], layer["ln1b"][0],
                      layer["ln2w"][0], layer["ln2b"][0], layer["b2"][0]]
        w1_l.append(layer["w1"].T)                  # (D, F)
        b1_l.append(layer["b1"][0])                 # (F,)
        w2_l.append(layer["w2"].T)                  # (F, D)

    return {
        "wproj": tp["w_proj"].T.astype(bf16),       # (In, D) bf16
        "pe_bias": tp["pe"] + tp["b_proj"],         # (max_len, D) f32, conv bias folded
        "wqkv": jnp.stack(wqkv_slabs).astype(bf16), # (L*3*nhead, D, dh) bf16, Q pre-scaled
        "bqkv": jnp.stack(bqkv_slabs),              # (L*3*nhead, dh) f32
        "wo": jnp.stack(wo_slabs).astype(bf16),     # (L*nhead, dh, D) bf16
        "vecd": jnp.stack(vecd_rows),               # (L*6, D) f32: bo,ln1w,ln1b,ln2w,ln2b,b2
        "w1": jnp.stack(w1_l).astype(bf16),         # (L, D, F) bf16
        "b1": jnp.stack(b1_l),                      # (L, F) f32
        "w2": jnp.stack(w2_l).astype(bf16),         # (L, F, D) bf16
    }


if __name__ == "__main__":
    B, S = 2, 8
    input_dim, conv_dim = 18, 128
    num_layers, nhead, dim_feedforward, max_len = 2, 4, 256, 256

    key = jax.random.PRNGKey(0)
    kx, kp = jax.random.split(key)
    x = jax.random.normal(kx, (B, S, input_dim), dtype=jnp.float32)
    torch_layout = init_params(kp, input_dim, conv_dim, num_layers,
                               dim_feedforward, max_len)
    kparams = prepare_params(torch_layout, nhead=nhead)

    out = trace_encoder_forward(x, kparams, nhead=nhead)
    out = jax.block_until_ready(out)
    assert out.shape == (B, S, conv_dim), out.shape
    print("KERNEL_OK")
</pallas_src>

<mosaic_0001>
module attributes {stable_mosaic.version = 11 : i64} {
  func.func @_fused_trace_encoder_kernel(%arg0: memref<16x18xf32, #tpu.memory_space<vmem>>, %arg1: memref<18x128xbf16, #tpu.memory_space<vmem>>, %arg2: memref<16x128xf32, #tpu.memory_space<vmem>>, %arg3: memref<24x128x32xbf16, #tpu.memory_space<vmem>>, %arg4: memref<24x32xf32, #tpu.memory_space<vmem>>, %arg5: memref<8x32x128xbf16, #tpu.memory_space<vmem>>, %arg6: memref<12x128xf32, #tpu.memory_space<vmem>>, %arg7: memref<2x128x256xbf16, #tpu.memory_space<vmem>>, %arg8: memref<2x256xf32, #tpu.memory_space<vmem>>, %arg9: memref<2x256x128xbf16, #tpu.memory_space<vmem>>, %arg10: memref<16x128xf32, #tpu.memory_space<vmem>>) attributes {dimension_semantics = [], scalar_prefetch = 0 : i64, scratch_operands = 0 : i64, tpu.core_type = #tpu.core_type<tc>} {
    %c0 = arith.constant 0 : index
    %c0_0 = arith.constant 0 : index
    %0 = vector.load %arg0[%c0, %c0_0] : memref<16x18xf32, #tpu.memory_space<vmem>>, vector<16x18xf32>
    %1 = arith.truncf %0 : vector<16x18xf32> to vector<16x18xbf16>
    %c0_1 = arith.constant 0 : index
    %c0_2 = arith.constant 0 : index
    %2 = vector.load %arg1[%c0_1, %c0_2] : memref<18x128xbf16, #tpu.memory_space<vmem>>, vector<18x128xbf16>
    %cst = arith.constant dense<0.000000e+00> : vector<16x128xf32>
    %3 = tpu.matmul %1, %2, %cst {dimension_numbers = #tpu.dot_dimension_numbers<[1], [0], [0], [1], [0, 0, 1, 1], [], []>} : vector<16x18xbf16>, vector<18x128xbf16>, vector<16x128xf32> -> vector<16x128xf32>
    %c0_3 = arith.constant 0 : index
    %c0_4 = arith.constant 0 : index
    %4 = vector.load %arg2[%c0_3, %c0_4] : memref<16x128xf32, #tpu.memory_space<vmem>>, vector<16x128xf32>
    %5 = arith.addf %3, %4 : vector<16x128xf32>
    %6 = arith.truncf %5 : vector<16x128xf32> to vector<16x128xbf16>
    %cst_5 = arith.constant 0.000000e+00 : f32
    %7 = vector.broadcast %cst_5 : f32 to vector<16x128xf32>
    %c0_6 = arith.constant 0 : index
    %c0_7 = arith.constant 0 : index
    %c0_8 = arith.constant 0 : index
    %8 = vector.load %arg3[%c0_6, %c0_7, %c0_8] : memref<24x128x32xbf16, #tpu.memory_space<vmem>>, vector<1x128x32xbf16>
    %9 = vector.shape_cast %8 : vector<1x128x32xbf16> to vector<128x32xbf16>
    %cst_9 = arith.constant dense<0.000000e+00> : vector<16x32xf32>
    %10 = tpu.matmul %6, %9, %cst_9 {dimension_numbers = #tpu.dot_dimension_numbers<[1], [0], [0], [1], [0, 0, 1, 1], [], []>} : vector<16x128xbf16>, vector<128x32xbf16>, vector<16x32xf32> -> vector<16x32xf32>
    %c0_10 = arith.constant 0 : index
    %c0_11 = arith.constant 0 : index
    %11 = vector.load %arg4[%c0_10, %c0_11] : memref<24x32xf32, #tpu.memory_space<vmem>>, vector<1x32xf32>
    %12 = vector.shape_cast %11 : vector<1x32xf32> to vector<32xf32>
    %13 = vector.shape_cast %12 : vector<32xf32> to vector<1x32xf32>
    %14 = vector.broadcast %13 : vector<1x32xf32> to vector<16x32xf32>
    %15 = arith.addf %10, %14 : vector<16x32xf32>
    %c4 = arith.constant 4 : index
    %c0_12 = arith.constant 0 : index
    %c0_13 = arith.constant 0 : index
    %16 = vector.load %arg3[%c4, %c0_12, %c0_13] : memref<24x128x32xbf16, #tpu.memory_space<vmem>>, vector<1x128x32xbf16>
    %17 = vector.shape_cast %16 : vector<1x128x32xbf16> to vector<128x32xbf16>
    %cst_14 = arith.constant dense<0.000000e+00> : vector<16x32xf32>
    %18 = tpu.matmul %6, %17, %cst_14 {dimension_numbers = #tpu.dot_dimension_numbers<[1], [0], [0], [1], [0, 0, 1, 1], [], []>} : vector<16x128xbf16>, vector<128x32xbf16>, vector<16x32xf32> -> vector<16x32xf32>
    %c4_15 = arith.constant 4 : index
    %c0_16 = arith.constant 0 : index
    %19 = vector.load %arg4[%c4_15, %c0_16] : memref<24x32xf32, #tpu.memory_space<vmem>>, vector<1x32xf32>
    %20 = vector.shape_cast %19 : vector<1x32xf32> to vector<32xf32>
    %21 = vector.shape_cast %20 : vector<32xf32> to vector<1x32xf32>
    %22 = vector.broadcast %21 : vector<1x32xf32> to vector<16x32xf32>
    %23 = arith.addf %18, %22 : vector<16x32xf32>
    %c8 = arith.constant 8 : index
    %c0_17 = arith.constant 0 : index
    %c0_18 = arith.constant 0 : index
    %24 = vector.load %arg3[%c8, %c0_17, %c0_18] : memref<24x128x32xbf16, #tpu.memory_space<vmem>>, vector<1x128x32xbf16>
    %25 = vector.shape_cast %24 : vector<1x128x32xbf16> to vector<128x32xbf16>
    %cst_19 = arith.constant dense<0.000000e+00> : vector<16x32xf32>
    %26 = tpu.matmul %6, %25, %cst_19 {dimension_numbers = #tpu.dot_dimension_numbers<[1], [0], [0], [1], [0, 0, 1, 1], [], []>} : vector<16x128xbf16>, vector<128x32xbf16>, vector<16x32xf32> -> vector<16x32xf32>
    %c8_20 = arith.constant 8 : index
    %c0_21 = arith.constant 0 : index
    %27 = vector.load %arg4[%c8_20, %c0_21] : memref<24x32xf32, #tpu.memory_space<vmem>>, vector<1x32xf32>
    %28 = vector.shape_cast %27 : vector<1x32xf32> to vector<32xf32>
    %29 = vector.shape_cast %28 : vector<32xf32> to vector<1x32xf32>
    %30 = vector.broadcast %29 : vector<1x32xf32> to vector<16x32xf32>
    %31 = arith.addf %26, %30 : vector<16x32xf32>
    %32 = vector.extract_strided_slice %15 {offsets = [0, 0], sizes = [8, 32], strides = [1, 1]} : vector<16x32xf32> to vector<8x32xf32>
    %33 = vector.extract_strided_slice %23 {offsets = [0, 0], sizes = [8, 32], strides = [1, 1]} : vector<16x32xf32> to vector<8x32xf32>
    %34 = vector.extract_strided_slice %31 {offsets = [0, 0], sizes = [8, 32], strides = [1, 1]} : vector<16x32xf32> to vector<8x32xf32>
    %cst_22 = arith.constant dense<0.000000e+00> : vector<8x8xf32>
    %35 = tpu.matmul %32, %33, %cst_22 {dimension_numbers = #tpu.dot_dimension_numbers<[1], [1], [0], [0], [0, 0, 1, 0], [], []>} : vector<8x32xf32>, vector<8x32xf32>, vector<8x8xf32> -> vector<8x8xf32>
    %cst_23 = arith.constant dense<0xFF800000> : vector<8xf32>
    %36 = vector.multi_reduction <maximumf>, %35, %cst_23 [1] : vector<8x8xf32> to vector<8xf32>
    %37 = vector.shape_cast %36 : vector<8xf32> to vector<8x1xf32>
    %38 = vector.broadcast %37 : vector<8x1xf32> to vector<8x8xf32>
    %39 = arith.subf %35, %38 : vector<8x8xf32>
    %40 = math.exp %39 : vector<8x8xf32>
    %cst_24 = arith.constant dense<0.000000e+00> : vector<8xf32>
    %41 = vector.multi_reduction <add>, %40, %cst_24 [1] : vector<8x8xf32> to vector<8xf32>
    %42 = vector.shape_cast %41 : vector<8xf32> to vector<8x1xf32>
    %43 = tpu.reciprocal %42 {approx = true} : vector<8x1xf32> -> vector<8x1xf32>
    %44 = vector.broadcast %43 : vector<8x1xf32> to vector<8x8xf32>
    %45 = arith.mulf %40, %44 : vector<8x8xf32>
    %cst_25 = arith.constant dense<0.000000e+00> : vector<8x32xf32>
    %46 = tpu.matmul %45, %34, %cst_25 {dimension_numbers = #tpu.dot_dimension_numbers<[1], [0], [0], [1], [0, 0, 1, 1], [], []>} : vector<8x8xf32>, vector<8x32xf32>, vector<8x32xf32> -> vector<8x32xf32>
    %47 = vector.extract_strided_slice %15 {offsets = [8, 0], sizes = [8, 32], strides = [1, 1]} : vector<16x32xf32> to vector<8x32xf32>
    %48 = vector.extract_strided_slice %23 {offsets = [8, 0], sizes = [8, 32], strides = [1, 1]} : vector<16x32xf32> to vector<8x32xf32>
    %49 = vector.extract_strided_slice %31 {offsets = [8, 0], sizes = [8, 32], strides = [1, 1]} : vector<16x32xf32> to vector<8x32xf32>
    %cst_26 = arith.constant dense<0.000000e+00> : vector<8x8xf32>
    %50 = tpu.matmul %47, %48, %cst_26 {dimension_numbers = #tpu.dot_dimension_numbers<[1], [1], [0], [0], [0, 0, 1, 0], [], []>} : vector<8x32xf32>, vector<8x32xf32>, vector<8x8xf32> -> vector<8x8xf32>
    %cst_27 = arith.constant dense<0xFF800000> : vector<8xf32>
    %51 = vector.multi_reduction <maximumf>, %50, %cst_27 [1] : vector<8x8xf32> to vector<8xf32>
    %52 = vector.shape_cast %51 : vector<8xf32> to vector<8x1xf32>
    %53 = vector.broadcast %52 : vector<8x1xf32> to vector<8x8xf32>
    %54 = arith.subf %50, %53 : vector<8x8xf32>
    %55 = math.exp %54 : vector<8x8xf32>
    %cst_28 = arith.constant dense<0.000000e+00> : vector<8xf32>
    %56 = vector.multi_reduction <add>, %55, %cst_28 [1] : vector<8x8xf32> to vector<8xf32>
    %57 = vector.shape_cast %56 : vector<8xf32> to vector<8x1xf32>
    %58 = tpu.reciprocal %57 {approx = true} : vector<8x1xf32> -> vector<8x1xf32>
    %59 = vector.broadcast %58 : vector<8x1xf32> to vector<8x8xf32>
    %60 = arith.mulf %55, %59 : vector<8x8xf32>
    %cst_29 = arith.constant dense<0.000000e+00> : vector<8x32xf32>
    %61 = tpu.matmul %60, %49, %cst_29 {dimension_numbers = #tpu.dot_dimension_numbers<[1], [0], [0], [1], [0, 0, 1, 1], [], []>} : vector<8x8xf32>, vector<8x32xf32>, vector<8x32xf32> -> vector<8x32xf32>
    %62 = tpu.concatenate %46, %61 in 0 : vector<8x32xf32>, vector<8x32xf32> -> vector<16x32xf32>
    %63 = arith.truncf %62 : vector<16x32xf32> to vector<16x32xbf16>
    %c0_30 = arith.constant 0 : index
    %c0_31 = arith.constant 0 : index
    %c0_32 = arith.constant 0 : index
    %64 = vector.load %arg5[%c0_30, %c0_31, %c0_32] : memref<8x32x128xbf16, #tpu.memory_space<vmem>>, vector<1x32x128xbf16>
    %65 = vector.shape_cast %64 : vector<1x32x128xbf16> to vector<32x128xbf16>
    %cst_33 = arith.constant dense<0.000000e+00> : vector<16x128xf32>
    %66 = tpu.matmul %63, %65, %cst_33 {dimension_numbers = #tpu.dot_dimension_numbers<[1], [0], [0], [1], [0, 0, 1, 1], [], []>} : vector<16x32xbf16>, vector<32x128xbf16>, vector<16x128xf32> -> vector<16x128xf32>
    %67 = arith.addf %7, %66 : vector<16x128xf32>
    %c1 = arith.constant 1 : index
    %c0_34 = arith.constant 0 : index
    %c0_35 = arith.constant 0 : index
    %68 = vector.load %arg3[%c1, %c0_34, %c0_35] : memref<24x128x32xbf16, #tpu.memory_space<vmem>>, vector<1x128x32xbf16>
    %69 = vector.shape_cast %68 : vector<1x128x32xbf16> to vector<128x32xbf16>
    %cst_36 = arith.constant dense<0.000000e+00> : vector<16x32xf32>
    %70 = tpu.matmul %6, %69, %cst_36 {dimension_numbers = #tpu.dot_dimension_numbers<[1], [0], [0], [1], [0, 0, 1, 1], [], []>} : vector<16x128xbf16>, vector<128x32xbf16>, vector<16x32xf32> -> vector<16x32xf32>
    %c1_37 = arith.constant 1 : index
    %c0_38 = arith.constant 0 : index
    %71 = vector.load %arg4[%c1_37, %c0_38] : memref<24x32xf32, #tpu.memory_space<vmem>>, vector<1x32xf32>
    %72 = vector.shape_cast %71 : vector<1x32xf32> to vector<32xf32>
    %73 = vector.shape_cast %72 : vector<32xf32> to vector<1x32xf32>
    %74 = vector.broadcast %73 : vector<1x32xf32> to vector<16x32xf32>
    %75 = arith.addf %70, %74 : vector<16x32xf32>
    %c5 = arith.constant 5 : index
    %c0_39 = arith.constant 0 : index
    %c0_40 = arith.constant 0 : index
    %76 = vector.load %arg3[%c5, %c0_39, %c0_40] : memref<24x128x32xbf16, #tpu.memory_space<vmem>>, vector<1x128x32xbf16>
    %77 = vector.shape_cast %76 : vector<1x128x32xbf16> to vector<128x32xbf16>
    %cst_41 = arith.constant dense<0.000000e+00> : vector<16x32xf32>
    %78 = tpu.matmul %6, %77, %cst_41 {dimension_numbers = #tpu.dot_dimension_numbers<[1], [0], [0], [1], [0, 0, 1, 1], [], []>} : vector<16x128xbf16>, vector<128x32xbf16>, vector<16x32xf32> -> vector<16x32xf32>
    %c5_42 = arith.constant 5 : index
    %c0_43 = arith.constant 0 : index
    %79 = vector.load %arg4[%c5_42, %c0_43] : memref<24x32xf32, #tpu.memory_space<vmem>>, vector<1x32xf32>
    %80 = vector.shape_cast %79 : vector<1x32xf32> to vector<32xf32>
    %81 = vector.shape_cast %80 : vector<32xf32> to vector<1x32xf32>
    %82 = vector.broadcast %81 : vector<1x32xf32> to vector<16x32xf32>
    %83 = arith.addf %78, %82 : vector<16x32xf32>
    %c9 = arith.constant 9 : index
    %c0_44 = arith.constant 0 : index
    %c0_45 = arith.constant 0 : index
    %84 = vector.load %arg3[%c9, %c0_44, %c0_45] : memref<24x128x32xbf16, #tpu.memory_space<vmem>>, vector<1x128x32xbf16>
    %85 = vector.shape_cast %84 : vector<1x128x32xbf16> to vector<128x32xbf16>
    %cst_46 = arith.constant dense<0.000000e+00> : vector<16x32xf32>
    %86 = tpu.matmul %6, %85, %cst_46 {dimension_numbers = #tpu.dot_dimension_numbers<[1], [0], [0], [1], [0, 0, 1, 1], [], []>} : vector<16x128xbf16>, vector<128x32xbf16>, vector<16x32xf32> -> vector<16x32xf32>
    %c9_47 = arith.constant 9 : index
    %c0_48 = arith.constant 0 : index
    %87 = vector.load %arg4[%c9_47, %c0_48] : memref<24x32xf32, #tpu.memory_space<vmem>>, vector<1x32xf32>
    %88 = vector.shape_cast %87 : vector<1x32xf32> to vector<32xf32>
    %89 = vector.shape_cast %88 : vector<32xf32> to vector<1x32xf32>
    %90 = vector.broadcast %89 : vector<1x32xf32> to vector<16x32xf32>
    %91 = arith.addf %86, %90 : vector<16x32xf32>
    %92 = vector.extract_strided_slice %75 {offsets = [0, 0], sizes = [8, 32], strides = [1, 1]} : vector<16x32xf32> to vector<8x32xf32>
    %93 = vector.extract_strided_slice %83 {offsets = [0, 0], sizes = [8, 32], strides = [1, 1]} : vector<16x32xf32> to vector<8x32xf32>
    %94 = vector.extract_strided_slice %91 {offsets = [0, 0], sizes = [8, 32], strides = [1, 1]} : vector<16x32xf32> to vector<8x32xf32>
    %cst_49 = arith.constant dense<0.000000e+00> : vector<8x8xf32>
    %95 = tpu.matmul %92, %93, %cst_49 {dimension_numbers = #tpu.dot_dimension_numbers<[1], [1], [0], [0], [0, 0, 1, 0], [], []>} : vector<8x32xf32>, vector<8x32xf32>, vector<8x8xf32> -> vector<8x8xf32>
    %cst_50 = arith.constant dense<0xFF800000> : vector<8xf32>
    %96 = vector.multi_reduction <maximumf>, %95, %cst_50 [1] : vector<8x8xf32> to vector<8xf32>
    %97 = vector.shape_cast %96 : vector<8xf32> to vector<8x1xf32>
    %98 = vector.broadcast %97 : vector<8x1xf32> to vector<8x8xf32>
    %99 = arith.subf %95, %98 : vector<8x8xf32>
    %100 = math.exp %99 : vector<8x8xf32>
    %cst_51 = arith.constant dense<0.000000e+00> : vector<8xf32>
    %101 = vector.multi_reduction <add>, %100, %cst_51 [1] : vector<8x8xf32> to vector<8xf32>
    %102 = vector.shape_cast %101 : vector<8xf32> to vector<8x1xf32>
    %103 = tpu.reciprocal %102 {approx = true} : vector<8x1xf32> -> vector<8x1xf32>
    %104 = vector.broadcast %103 : vector<8x1xf32> to vector<8x8xf32>
    %105 = arith.mulf %100, %104 : vector<8x8xf32>
    %cst_52 = arith.constant dense<0.000000e+00> : vector<8x32xf32>
    %106 = tpu.matmul %105, %94, %cst_52 {dimension_numbers = #tpu.dot_dimension_numbers<[1], [0], [0], [1], [0, 0, 1, 1], [], []>} : vector<8x8xf32>, vector<8x32xf32>, vector<8x32xf32> -> vector<8x32xf32>
    %107 = vector.extract_strided_slice %75 {offsets = [8, 0], sizes = [8, 32], strides = [1, 1]} : vector<16x32xf32> to vector<8x32xf32>
    %108 = vector.extract_strided_slice %83 {offsets = [8, 0], sizes = [8, 32], strides = [1, 1]} : vector<16x32xf32> to vector<8x32xf32>
    %109 = vector.extract_strided_slice %91 {offsets = [8, 0], sizes = [8, 32], strides = [1, 1]} : vector<16x32xf32> to vector<8x32xf32>
    %cst_53 = arith.constant dense<0.000000e+00> : vector<8x8xf32>
    %110 = tpu.matmul %107, %108, %cst_53 {dimension_numbers = #tpu.dot_dimension_numbers<[1], [1], [0], [0], [0, 0, 1, 0], [], []>} : vector<8x32xf32>, vector<8x32xf32>, vector<8x8xf32> -> vector<8x8xf32>
    %cst_54 = arith.constant dense<0xFF800000> : vector<8xf32>
    %111 = vector.multi_reduction <maximumf>, %110, %cst_54 [1] : vector<8x8xf32> to vector<8xf32>
    %112 = vector.shape_cast %111 : vector<8xf32> to vector<8x1xf32>
    %113 = vector.broadcast %112 : vector<8x1xf32> to vector<8x8xf32>
    %114 = arith.subf %110, %113 : vector<8x8xf32>
    %115 = math.exp %114 : vector<8x8xf32>
    %cst_55 = arith.constant dense<0.000000e+00> : vector<8xf32>
    %116 = vector.multi_reduction <add>, %115, %cst_55 [1] : vector<8x8xf32> to vector<8xf32>
    %117 = vector.shape_cast %116 : vector<8xf32> to vector<8x1xf32>
    %118 = tpu.reciprocal %117 {approx = true} : vector<8x1xf32> -> vector<8x1xf32>
    %119 = vector.broadcast %118 : vector<8x1xf32> to vector<8x8xf32>
    %120 = arith.mulf %115, %119 : vector<8x8xf32>
    %cst_56 = arith.constant dense<0.000000e+00> : vector<8x32xf32>
    %121 = tpu.matmul %120, %109, %cst_56 {dimension_numbers = #tpu.dot_dimension_numbers<[1], [0], [0], [1], [0, 0, 1, 1], [], []>} : vector<8x8xf32>, vector<8x32xf32>, vector<8x32xf32> -> vector<8x32xf32>
    %122 = tpu.concatenate %106, %121 in 0 : vector<8x32xf32>, vector<8x32xf32> -> vector<16x32xf32>
    %123 = arith.truncf %122 : vector<16x32xf32> to vector<16x32xbf16>
    %c1_57 = arith.constant 1 : index
    %c0_58 = arith.constant 0 : index
    %c0_59 = arith.constant 0 : index
    %124 = vector.load %arg5[%c1_57, %c0_58, %c0_59] : memref<8x32x128xbf16, #tpu.memory_space<vmem>>, vector<1x32x128xbf16>
    %125 = vector.shape_cast %124 : vector<1x32x128xbf16> to vector<32x128xbf16>
    %cst_60 = arith.constant dense<0.000000e+00> : vector<16x128xf32>
    %126 = tpu.matmul %123, %125, %cst_60 {dimension_numbers = #tpu.dot_dimension_numbers<[1], [0], [0], [1], [0, 0, 1, 1], [], []>} : vector<16x32xbf16>, vector<32x128xbf16>, vector<16x128xf32> -> vector<16x128xf32>
    %127 = arith.addf %67, %126 : vector<16x128xf32>
    %c2 = arith.constant 2 : index
    %c0_61 = arith.constant 0 : index
    %c0_62 = arith.constant 0 : index
    %128 = vector.load %arg3[%c2, %c0_61, %c0_62] : memref<24x128x32xbf16, #tpu.memory_space<vmem>>, vector<1x128x32xbf16>
    %129 = vector.shape_cast %128 : vector<1x128x32xbf16> to vector<128x32xbf16>
    %cst_63 = arith.constant dense<0.000000e+00> : vector<16x32xf32>
    %130 = tpu.matmul %6, %129, %cst_63 {dimension_numbers = #tpu.dot_dimension_numbers<[1], [0], [0], [1], [0, 0, 1, 1], [], []>} : vector<16x128xbf16>, vector<128x32xbf16>, vector<16x32xf32> -> vector<16x32xf32>
    %c2_64 = arith.constant 2 : index
    %c0_65 = arith.constant 0 : index
    %131 = vector.load %arg4[%c2_64, %c0_65] : memref<24x32xf32, #tpu.memory_space<vmem>>, vector<1x32xf32>
    %132 = vector.shape_cast %131 : vector<1x32xf32> to vector<32xf32>
    %133 = vector.shape_cast %132 : vector<32xf32> to vector<1x32xf32>
    %134 = vector.broadcast %133 : vector<1x32xf32> to vector<16x32xf32>
    %135 = arith.addf %130, %134 : vector<16x32xf32>
    %c6 = arith.constant 6 : index
    %c0_66 = arith.constant 0 : index
    %c0_67 = arith.constant 0 : index
    %136 = vector.load %arg3[%c6, %c0_66, %c0_67] : memref<24x128x32xbf16, #tpu.memory_space<vmem>>, vector<1x128x32xbf16>
    %137 = vector.shape_cast %136 : vector<1x128x32xbf16> to vector<128x32xbf16>
    %cst_68 = arith.constant dense<0.000000e+00> : vector<16x32xf32>
    %138 = tpu.matmul %6, %137, %cst_68 {dimension_numbers = #tpu.dot_dimension_numbers<[1], [0], [0], [1], [0, 0, 1, 1], [], []>} : vector<16x128xbf16>, vector<128x32xbf16>, vector<16x32xf32> -> vector<16x32xf32>
    %c6_69 = arith.constant 6 : index
    %c0_70 = arith.constant 0 : index
    %139 = vector.load %arg4[%c6_69, %c0_70] : memref<24x32xf32, #tpu.memory_space<vmem>>, vector<1x32xf32>
    %140 = vector.shape_cast %139 : vector<1x32xf32> to vector<32xf32>
    %141 = vector.shape_cast %140 : vector<32xf32> to vector<1x32xf32>
    %142 = vector.broadcast %141 : vector<1x32xf32> to vector<16x32xf32>
    %143 = arith.addf %138, %142 : vector<16x32xf32>
    %c10 = arith.constant 10 : index
    %c0_71 = arith.constant 0 : index
    %c0_72 = arith.constant 0 : index
    %144 = vector.load %arg3[%c10, %c0_71, %c0_72] : memref<24x128x32xbf16, #tpu.memory_space<vmem>>, vector<1x128x32xbf16>
    %145 = vector.shape_cast %144 : vector<1x128x32xbf16> to vector<128x32xbf16>
    %cst_73 = arith.constant dense<0.000000e+00> : vector<16x32xf32>
    %146 = tpu.matmul %6, %145, %cst_73 {dimension_numbers = #tpu.dot_dimension_numbers<[1], [0], [0], [1], [0, 0, 1, 1], [], []>} : vector<16x128xbf16>, vector<128x32xbf16>, vector<16x32xf32> -> vector<16x32xf32>
    %c10_74 = arith.constant 10 : index
    %c0_75 = arith.constant 0 : index
    %147 = vector.load %arg4[%c10_74, %c0_75] : memref<24x32xf32, #tpu.memory_space<vmem>>, vector<1x32xf32>
    %148 = vector.shape_cast %147 : vector<1x32xf32> to vector<32xf32>
    %149 = vector.shape_cast %148 : vector<32xf32> to vector<1x32xf32>
    %150 = vector.broadcast %149 : vector<1x32xf32> to vector<16x32xf32>
    %151 = arith.addf %146, %150 : vector<16x32xf32>
    %152 = vector.extract_strided_slice %135 {offsets = [0, 0], sizes = [8, 32], strides = [1, 1]} : vector<16x32xf32> to vector<8x32xf32>
    %153 = vector.extract_strided_slice %143 {offsets = [0, 0], sizes = [8, 32], strides = [1, 1]} : vector<16x32xf32> to vector<8x32xf32>
    %154 = vector.extract_strided_slice %151 {offsets = [0, 0], sizes = [8, 32], strides = [1, 1]} : vector<16x32xf32> to vector<8x32xf32>
    %cst_76 = arith.constant dense<0.000000e+00> : vector<8x8xf32>
    %155 = tpu.matmul %152, %153, %cst_76 {dimension_numbers = #tpu.dot_dimension_numbers<[1], [1], [0], [0], [0, 0, 1, 0], [], []>} : vector<8x32xf32>, vector<8x32xf32>, vector<8x8xf32> -> vector<8x8xf32>
    %cst_77 = arith.constant dense<0xFF800000> : vector<8xf32>
    %156 = vector.multi_reduction <maximumf>, %155, %cst_77 [1] : vector<8x8xf32> to vector<8xf32>
    %157 = vector.shape_cast %156 : vector<8xf32> to vector<8x1xf32>
    %158 = vector.broadcast %157 : vector<8x1xf32> to vector<8x8xf32>
    %159 = arith.subf %155, %158 : vector<8x8xf32>
    %160 = math.exp %159 : vector<8x8xf32>
    %cst_78 = arith.constant dense<0.000000e+00> : vector<8xf32>
    %161 = vector.multi_reduction <add>, %160, %cst_78 [1] : vector<8x8xf32> to vector<8xf32>
    %162 = vector.shape_cast %161 : vector<8xf32> to vector<8x1xf32>
    %163 = tpu.reciprocal %162 {approx = true} : vector<8x1xf32> -> vector<8x1xf32>
    %164 = vector.broadcast %163 : vector<8x1xf32> to vector<8x8xf32>
    %165 = arith.mulf %160, %164 : vector<8x8xf32>
    %cst_79 = arith.constant dense<0.000000e+00> : vector<8x32xf32>
    %166 = tpu.matmul %165, %154, %cst_79 {dimension_numbers = #tpu.dot_dimension_numbers<[1], [0], [0], [1], [0, 0, 1, 1], [], []>} : vector<8x8xf32>, vector<8x32xf32>, vector<8x32xf32> -> vector<8x32xf32>
    %167 = vector.extract_strided_slice %135 {offsets = [8, 0], sizes = [8, 32], strides = [1, 1]} : vector<16x32xf32> to vector<8x32xf32>
    %168 = vector.extract_strided_slice %143 {offsets = [8, 0], sizes = [8, 32], strides = [1, 1]} : vector<16x32xf32> to vector<8x32xf32>
    %169 = vector.extract_strided_slice %151 {offsets = [8, 0], sizes = [8, 32], strides = [1, 1]} : vector<16x32xf32> to vector<8x32xf32>
    %cst_80 = arith.constant dense<0.000000e+00> : vector<8x8xf32>
    %170 = tpu.matmul %167, %168, %cst_80 {dimension_numbers = #tpu.dot_dimension_numbers<[1], [1], [0], [0], [0, 0, 1, 0], [], []>} : vector<8x32xf32>, vector<8x32xf32>, vector<8x8xf32> -> vector<8x8xf32>
    %cst_81 = arith.constant dense<0xFF800000> : vector<8xf32>
    %171 = vector.multi_reduction <maximumf>, %170, %cst_81 [1] : vector<8x8xf32> to vector<8xf32>
    %172 = vector.shape_cast %171 : vector<8xf32> to vector<8x1xf32>
    %173 = vector.broadcast %172 : vector<8x1xf32> to vector<8x8xf32>
    %174 = arith.subf %170, %173 : vector<8x8xf32>
    %175 = math.exp %174 : vector<8x8xf32>
    %cst_82 = arith.constant dense<0.000000e+00> : vector<8xf32>
    %176 = vector.multi_reduction <add>, %175, %cst_82 [1] : vector<8x8xf32> to vector<8xf32>
    %177 = vector.shape_cast %176 : vector<8xf32> to vector<8x1xf32>
    %178 = tpu.reciprocal %177 {approx = true} : vector<8x1xf32> -> vector<8x1xf32>
    %179 = vector.broadcast %178 : vector<8x1xf32> to vector<8x8xf32>
    %180 = arith.mulf %175, %179 : vector<8x8xf32>
    %cst_83 = arith.constant dense<0.000000e+00> : vector<8x32xf32>
    %181 = tpu.matmul %180, %169, %cst_83 {dimension_numbers = #tpu.dot_dimension_numbers<[1], [0], [0], [1], [0, 0, 1, 1], [], []>} : vector<8x8xf32>, vector<8x32xf32>, vector<8x32xf32> -> vector<8x32xf32>
    %182 = tpu.concatenate %166, %181 in 0 : vector<8x32xf32>, vector<8x32xf32> -> vector<16x32xf32>
    %183 = arith.truncf %182 : vector<16x32xf32> to vector<16x32xbf16>
    %c2_84 = arith.constant 2 : index
    %c0_85 = arith.constant 0 : index
    %c0_86 = arith.constant 0 : index
    %184 = vector.load %arg5[%c2_84, %c0_85, %c0_86] : memref<8x32x128xbf16, #tpu.memory_space<vmem>>, vector<1x32x128xbf16>
    %185 = vector.shape_cast %184 : vector<1x32x128xbf16> to vector<32x128xbf16>
    %cst_87 = arith.constant dense<0.000000e+00> : vector<16x128xf32>
    %186 = tpu.matmul %183, %185, %cst_87 {dimension_numbers = #tpu.dot_dimension_numbers<[1], [0], [0], [1], [0, 0, 1, 1], [], []>} : vector<16x32xbf16>, vector<32x128xbf16>, vector<16x128xf32> -> vector<16x128xf32>
    %187 = arith.addf %127, %186 : vector<16x128xf32>
    %c3 = arith.constant 3 : index
    %c0_88 = arith.constant 0 : index
    %c0_89 = arith.constant 0 : index
    %188 = vector.load %arg3[%c3, %c0_88, %c0_89] : memref<24x128x32xbf16, #tpu.memory_space<vmem>>, vector<1x128x32xbf16>
    %189 = vector.shape_cast %188 : vector<1x128x32xbf16> to vector<128x32xbf16>
    %cst_90 = arith.constant dense<0.000000e+00> : vector<16x32xf32>
    %190 = tpu.matmul %6, %189, %cst_90 {dimension_numbers = #tpu.dot_dimension_numbers<[1], [0], [0], [1], [0, 0, 1, 1], [], []>} : vector<16x128xbf16>, vector<128x32xbf16>, vector<16x32xf32> -> vector<16x32xf32>
    %c3_91 = arith.constant 3 : index
    %c0_92 = arith.constant 0 : index
    %191 = vector.load %arg4[%c3_91, %c0_92] : memref<24x32xf32, #tpu.memory_space<vmem>>, vector<1x32xf32>
    %192 = vector.shape_cast %191 : vector<1x32xf32> to vector<32xf32>
    %193 = vector.shape_cast %192 : vector<32xf32> to vector<1x32xf32>
    %194 = vector.broadcast %193 : vector<1x32xf32> to vector<16x32xf32>
    %195 = arith.addf %190, %194 : vector<16x32xf32>
    %c7 = arith.constant 7 : index
    %c0_93 = arith.constant 0 : index
    %c0_94 = arith.constant 0 : index
    %196 = vector.load %arg3[%c7, %c0_93, %c0_94] : memref<24x128x32xbf16, #tpu.memory_space<vmem>>, vector<1x128x32xbf16>
    %197 = vector.shape_cast %196 : vector<1x128x32xbf16> to vector<128x32xbf16>
    %cst_95 = arith.constant dense<0.000000e+00> : vector<16x32xf32>
    %198 = tpu.matmul %6, %197, %cst_95 {dimension_numbers = #tpu.dot_dimension_numbers<[1], [0], [0], [1], [0, 0, 1, 1], [], []>} : vector<16x128xbf16>, vector<128x32xbf16>, vector<16x32xf32> -> vector<16x32xf32>
    %c7_96 = arith.constant 7 : index
    %c0_97 = arith.constant 0 : index
    %199 = vector.load %arg4[%c7_96, %c0_97] : memref<24x32xf32, #tpu.memory_space<vmem>>, vector<1x32xf32>
    %200 = vector.shape_cast %199 : vector<1x32xf32> to vector<32xf32>
    %201 = vector.shape_cast %200 : vector<32xf32> to vector<1x32xf32>
    %202 = vector.broadcast %201 : vector<1x32xf32> to vector<16x32xf32>
    %203 = arith.addf %198, %202 : vector<16x32xf32>
    %c11 = arith.constant 11 : index
    %c0_98 = arith.constant 0 : index
    %c0_99 = arith.constant 0 : index
    %204 = vector.load %arg3[%c11, %c0_98, %c0_99] : memref<24x128x32xbf16, #tpu.memory_space<vmem>>, vector<1x128x32xbf16>
    %205 = vector.shape_cast %204 : vector<1x128x32xbf16> to vector<128x32xbf16>
    %cst_100 = arith.constant dense<0.000000e+00> : vector<16x32xf32>
    %206 = tpu.matmul %6, %205, %cst_100 {dimension_numbers = #tpu.dot_dimension_numbers<[1], [0], [0], [1], [0, 0, 1, 1], [], []>} : vector<16x128xbf16>, vector<128x32xbf16>, vector<16x32xf32> -> vector<16x32xf32>
    %c11_101 = arith.constant 11 : index
    %c0_102 = arith.constant 0 : index
    %207 = vector.load %arg4[%c11_101, %c0_102] : memref<24x32xf32, #tpu.memory_space<vmem>>, vector<1x32xf32>
    %208 = vector.shape_cast %207 : vector<1x32xf32> to vector<32xf32>
    %209 = vector.shape_cast %208 : vector<32xf32> to vector<1x32xf32>
    %210 = vector.broadcast %209 : vector<1x32xf32> to vector<16x32xf32>
    %211 = arith.addf %206, %210 : vector<16x32xf32>
    %212 = vector.extract_strided_slice %195 {offsets = [0, 0], sizes = [8, 32], strides = [1, 1]} : vector<16x32xf32> to vector<8x32xf32>
    %213 = vector.extract_strided_slice %203 {offsets = [0, 0], sizes = [8, 32], strides = [1, 1]} : vector<16x32xf32> to vector<8x32xf32>
    %214 = vector.extract_strided_slice %211 {offsets = [0, 0], sizes = [8, 32], strides = [1, 1]} : vector<16x32xf32> to vector<8x32xf32>
    %cst_103 = arith.constant dense<0.000000e+00> : vector<8x8xf32>
    %215 = tpu.matmul %212, %213, %cst_103 {dimension_numbers = #tpu.dot_dimension_numbers<[1], [1], [0], [0], [0, 0, 1, 0], [], []>} : vector<8x32xf32>, vector<8x32xf32>, vector<8x8xf32> -> vector<8x8xf32>
    %cst_104 = arith.constant dense<0xFF800000> : vector<8xf32>
    %216 = vector.multi_reduction <maximumf>, %215, %cst_104 [1] : vector<8x8xf32> to vector<8xf32>
    %217 = vector.shape_cast %216 : vector<8xf32> to vector<8x1xf32>
    %218 = vector.broadcast %217 : vector<8x1xf32> to vector<8x8xf32>
    %219 = arith.subf %215, %218 : vector<8x8xf32>
    %220 = math.exp %219 : vector<8x8xf32>
    %cst_105 = arith.constant dense<0.000000e+00> : vector<8xf32>
    %221 = vector.multi_reduction <add>, %220, %cst_105 [1] : vector<8x8xf32> to vector<8xf32>
    %222 = vector.shape_cast %221 : vector<8xf32> to vector<8x1xf32>
    %223 = tpu.reciprocal %222 {approx = true} : vector<8x1xf32> -> vector<8x1xf32>
    %224 = vector.broadcast %223 : vector<8x1xf32> to vector<8x8xf32>
    %225 = arith.mulf %220, %224 : vector<8x8xf32>
    %cst_106 = arith.constant dense<0.000000e+00> : vector<8x32xf32>
    %226 = tpu.matmul %225, %214, %cst_106 {dimension_numbers = #tpu.dot_dimension_numbers<[1], [0], [0], [1], [0, 0, 1, 1], [], []>} : vector<8x8xf32>, vector<8x32xf32>, vector<8x32xf32> -> vector<8x32xf32>
    %227 = vector.extract_strided_slice %195 {offsets = [8, 0], sizes = [8, 32], strides = [1, 1]} : vector<16x32xf32> to vector<8x32xf32>
    %228 = vector.extract_strided_slice %203 {offsets = [8, 0], sizes = [8, 32], strides = [1, 1]} : vector<16x32xf32> to vector<8x32xf32>
    %229 = vector.extract_strided_slice %211 {offsets = [8, 0], sizes = [8, 32], strides = [1, 1]} : vector<16x32xf32> to vector<8x32xf32>
    %cst_107 = arith.constant dense<0.000000e+00> : vector<8x8xf32>
    %230 = tpu.matmul %227, %228, %cst_107 {dimension_numbers = #tpu.dot_dimension_numbers<[1], [1], [0], [0], [0, 0, 1, 0], [], []>} : vector<8x32xf32>, vector<8x32xf32>, vector<8x8xf32> -> vector<8x8xf32>
    %cst_108 = arith.constant dense<0xFF800000> : vector<8xf32>
    %231 = vector.multi_reduction <maximumf>, %230, %cst_108 [1] : vector<8x8xf32> to vector<8xf32>
    %232 = vector.shape_cast %231 : vector<8xf32> to vector<8x1xf32>
    %233 = vector.broadcast %232 : vector<8x1xf32> to vector<8x8xf32>
    %234 = arith.subf %230, %233 : vector<8x8xf32>
    %235 = math.exp %234 : vector<8x8xf32>
    %cst_109 = arith.constant dense<0.000000e+00> : vector<8xf32>
    %236 = vector.multi_reduction <add>, %235, %cst_109 [1] : vector<8x8xf32> to vector<8xf32>
    %237 = vector.shape_cast %236 : vector<8xf32> to vector<8x1xf32>
    %238 = tpu.reciprocal %237 {approx = true} : vector<8x1xf32> -> vector<8x1xf32>
    %239 = vector.broadcast %238 : vector<8x1xf32> to vector<8x8xf32>
    %240 = arith.mulf %235, %239 : vector<8x8xf32>
    %cst_110 = arith.constant dense<0.000000e+00> : vector<8x32xf32>
    %241 = tpu.matmul %240, %229, %cst_110 {dimension_numbers = #tpu.dot_dimension_numbers<[1], [0], [0], [1], [0, 0, 1, 1], [], []>} : vector<8x8xf32>, vector<8x32xf32>, vector<8x32xf32> -> vector<8x32xf32>
    %242 = tpu.concatenate %226, %241 in 0 : vector<8x32xf32>, vector<8x32xf32> -> vector<16x32xf32>
    %243 = arith.truncf %242 : vector<16x32xf32> to vector<16x32xbf16>
    %c3_111 = arith.constant 3 : index
    %c0_112 = arith.constant 0 : index
    %c0_113 = arith.constant 0 : index
    %244 = vector.load %arg5[%c3_111, %c0_112, %c0_113] : memref<8x32x128xbf16, #tpu.memory_space<vmem>>, vector<1x32x128xbf16>
    %245 = vector.shape_cast %244 : vector<1x32x128xbf16> to vector<32x128xbf16>
    %cst_114 = arith.constant dense<0.000000e+00> : vector<16x128xf32>
    %246 = tpu.matmul %243, %245, %cst_114 {dimension_numbers = #tpu.dot_dimension_numbers<[1], [0], [0], [1], [0, 0, 1, 1], [], []>} : vector<16x32xbf16>, vector<32x128xbf16>, vector<16x128xf32> -> vector<16x128xf32>
    %247 = arith.addf %187, %246 : vector<16x128xf32>
    %c0_115 = arith.constant 0 : index
    %c0_116 = arith.constant 0 : index
    %248 = vector.load %arg6[%c0_115, %c0_116] : memref<12x128xf32, #tpu.memory_space<vmem>>, vector<1x128xf32>
    %249 = vector.shape_cast %248 : vector<1x128xf32> to vector<128xf32>
    %250 = vector.shape_cast %249 : vector<128xf32> to vector<1x128xf32>
    %251 = vector.broadcast %250 : vector<1x128xf32> to vector<16x128xf32>
    %252 = arith.addf %247, %251 : vector<16x128xf32>
    %253 = arith.addf %5, %252 : vector<16x128xf32>
    %c1_117 = arith.constant 1 : index
    %c0_118 = arith.constant 0 : index
    %254 = vector.load %arg6[%c1_117, %c0_118] : memref<12x128xf32, #tpu.memory_space<vmem>>, vector<1x128xf32>
    %255 = vector.shape_cast %254 : vector<1x128xf32> to vector<128xf32>
    %c2_119 = arith.constant 2 : index
    %c0_120 = arith.constant 0 : index
    %256 = vector.load %arg6[%c2_119, %c0_120] : memref<12x128xf32, #tpu.memory_space<vmem>>, vector<1x128xf32>
    %257 = vector.shape_cast %256 : vector<1x128xf32> to vector<128xf32>
    %cst_121 = arith.constant dense<0.000000e+00> : vector<16xf32>
    %258 = vector.multi_reduction <add>, %253, %cst_121 [1] : vector<16x128xf32> to vector<16xf32>
    %259 = vector.shape_cast %258 : vector<16xf32> to vector<16x1xf32>
    %cst_122 = arith.constant 1.280000e+02 : f32
    %260 = vector.broadcast %cst_122 : f32 to vector<16x1xf32>
    %261 = arith.divf %259, %260 : vector<16x1xf32>
    %262 = arith.mulf %253, %253 : vector<16x128xf32>
    %cst_123 = arith.constant dense<0.000000e+00> : vector<16xf32>
    %263 = vector.multi_reduction <add>, %262, %cst_123 [1] : vector<16x128xf32> to vector<16xf32>
    %264 = vector.shape_cast %263 : vector<16xf32> to vector<16x1xf32>
    %cst_124 = arith.constant 1.280000e+02 : f32
    %265 = vector.broadcast %cst_124 : f32 to vector<16x1xf32>
    %266 = arith.divf %264, %265 : vector<16x1xf32>
    %267 = arith.mulf %261, %261 : vector<16x1xf32>
    %268 = arith.subf %266, %267 : vector<16x1xf32>
    %269 = vector.broadcast %261 : vector<16x1xf32> to vector<16x128xf32>
    %270 = arith.subf %253, %269 : vector<16x128xf32>
    %cst_125 = arith.constant 9.99999974E-6 : f32
    %271 = vector.broadcast %cst_125 : f32 to vector<16x1xf32>
    %272 = arith.addf %268, %271 : vector<16x1xf32>
    %273 = math.rsqrt %272 : vector<16x1xf32>
    %274 = vector.broadcast %273 : vector<16x1xf32> to vector<16x128xf32>
    %275 = arith.mulf %270, %274 : vector<16x128xf32>
    %276 = vector.shape_cast %255 : vector<128xf32> to vector<1x128xf32>
    %277 = vector.broadcast %276 : vector<1x128xf32> to vector<16x128xf32>
    %278 = arith.mulf %275, %277 : vector<16x128xf32>
    %279 = vector.shape_cast %257 : vector<128xf32> to vector<1x128xf32>
    %280 = vector.broadcast %279 : vector<1x128xf32> to vector<16x128xf32>
    %281 = arith.addf %278, %280 : vector<16x128xf32>
    %282 = arith.truncf %281 : vector<16x128xf32> to vector<16x128xbf16>
    %c0_126 = arith.constant 0 : index
    %c0_127 = arith.constant 0 : index
    %c0_128 = arith.constant 0 : index
    %283 = vector.load %arg7[%c0_126, %c0_127, %c0_128] : memref<2x128x256xbf16, #tpu.memory_space<vmem>>, vector<1x128x256xbf16>
    %284 = vector.shape_cast %283 : vector<1x128x256xbf16> to vector<128x256xbf16>
    %cst_129 = arith.constant dense<0.000000e+00> : vector<16x256xf32>
    %285 = tpu.matmul %282, %284, %cst_129 {dimension_numbers = #tpu.dot_dimension_numbers<[1], [0], [0], [1], [0, 0, 1, 1], [], []>} : vector<16x128xbf16>, vector<128x256xbf16>, vector<16x256xf32> -> vector<16x256xf32>
    %c0_130 = arith.constant 0 : index
    %c0_131 = arith.constant 0 : index
    %286 = vector.load %arg8[%c0_130, %c0_131] : memref<2x256xf32, #tpu.memory_space<vmem>>, vector<1x256xf32>
    %287 = vector.shape_cast %286 : vector<1x256xf32> to vector<256xf32>
    %288 = vector.shape_cast %287 : vector<256xf32> to vector<1x256xf32>
    %289 = vector.broadcast %288 : vector<1x256xf32> to vector<16x256xf32>
    %290 = arith.addf %285, %289 : vector<16x256xf32>
    %cst_132 = arith.constant 0.000000e+00 : f32
    %291 = vector.broadcast %cst_132 : f32 to vector<16x256xf32>
    %292 = arith.maximumf %290, %291 : vector<16x256xf32>
    %293 = arith.truncf %292 : vector<16x256xf32> to vector<16x256xbf16>
    %c0_133 = arith.constant 0 : index
    %c0_134 = arith.constant 0 : index
    %c0_135 = arith.constant 0 : index
    %294 = vector.load %arg9[%c0_133, %c0_134, %c0_135] : memref<2x256x128xbf16, #tpu.memory_space<vmem>>, vector<1x256x128xbf16>
    %295 = vector.shape_cast %294 : vector<1x256x128xbf16> to vector<256x128xbf16>
    %cst_136 = arith.constant dense<0.000000e+00> : vector<16x128xf32>
    %296 = tpu.matmul %293, %295, %cst_136 {dimension_numbers = #tpu.dot_dimension_numbers<[1], [0], [0], [1], [0, 0, 1, 1], [], []>} : vector<16x256xbf16>, vector<256x128xbf16>, vector<16x128xf32> -> vector<16x128xf32>
    %c5_137 = arith.constant 5 : index
    %c0_138 = arith.constant 0 : index
    %297 = vector.load %arg6[%c5_137, %c0_138] : memref<12x128xf32, #tpu.memory_space<vmem>>, vector<1x128xf32>
    %298 = vector.shape_cast %297 : vector<1x128xf32> to vector<128xf32>
    %299 = vector.shape_cast %298 : vector<128xf32> to vector<1x128xf32>
    %300 = vector.broadcast %299 : vector<1x128xf32> to vector<16x128xf32>
    %301 = arith.addf %296, %300 : vector<16x128xf32>
    %302 = arith.addf %281, %301 : vector<16x128xf32>
    %c3_139 = arith.constant 3 : index
    %c0_140 = arith.constant 0 : index
    %303 = vector.load %arg6[%c3_139, %c0_140] : memref<12x128xf32, #tpu.memory_space<vmem>>, vector<1x128xf32>
    %304 = vector.shape_cast %303 : vector<1x128xf32> to vector<128xf32>
    %c4_141 = arith.constant 4 : index
    %c0_142 = arith.constant 0 : index
    %305 = vector.load %arg6[%c4_141, %c0_142] : memref<12x128xf32, #tpu.memory_space<vmem>>, vector<1x128xf32>
    %306 = vector.shape_cast %305 : vector<1x128xf32> to vector<128xf32>
    %cst_143 = arith.constant dense<0.000000e+00> : vector<16xf32>
    %307 = vector.multi_reduction <add>, %302, %cst_143 [1] : vector<16x128xf32> to vector<16xf32>
    %308 = vector.shape_cast %307 : vector<16xf32> to vector<16x1xf32>
    %cst_144 = arith.constant 1.280000e+02 : f32
    %309 = vector.broadcast %cst_144 : f32 to vector<16x1xf32>
    %310 = arith.divf %308, %309 : vector<16x1xf32>
    %311 = arith.mulf %302, %302 : vector<16x128xf32>
    %cst_145 = arith.constant dense<0.000000e+00> : vector<16xf32>
    %312 = vector.multi_reduction <add>, %311, %cst_145 [1] : vector<16x128xf32> to vector<16xf32>
    %313 = vector.shape_cast %312 : vector<16xf32> to vector<16x1xf32>
    %cst_146 = arith.constant 1.280000e+02 : f32
    %314 = vector.broadcast %cst_146 : f32 to vector<16x1xf32>
    %315 = arith.divf %313, %314 : vector<16x1xf32>
    %316 = arith.mulf %310, %310 : vector<16x1xf32>
    %317 = arith.subf %315, %316 : vector<16x1xf32>
    %318 = vector.broadcast %310 : vector<16x1xf32> to vector<16x128xf32>
    %319 = arith.subf %302, %318 : vector<16x128xf32>
    %cst_147 = arith.constant 9.99999974E-6 : f32
    %320 = vector.broadcast %cst_147 : f32 to vector<16x1xf32>
    %321 = arith.addf %317, %320 : vector<16x1xf32>
    %322 = math.rsqrt %321 : vector<16x1xf32>
    %323 = vector.broadcast %322 : vector<16x1xf32> to vector<16x128xf32>
    %324 = arith.mulf %319, %323 : vector<16x128xf32>
    %325 = vector.shape_cast %304 : vector<128xf32> to vector<1x128xf32>
    %326 = vector.broadcast %325 : vector<1x128xf32> to vector<16x128xf32>
    %327 = arith.mulf %324, %326 : vector<16x128xf32>
    %328 = vector.shape_cast %306 : vector<128xf32> to vector<1x128xf32>
    %329 = vector.broadcast %328 : vector<1x128xf32> to vector<16x128xf32>
    %330 = arith.addf %327, %329 : vector<16x128xf32>
    %331 = arith.truncf %330 : vector<16x128xf32> to vector<16x128xbf16>
    %cst_148 = arith.constant 0.000000e+00 : f32
    %332 = vector.broadcast %cst_148 : f32 to vector<16x128xf32>
    %c12 = arith.constant 12 : index
    %c0_149 = arith.constant 0 : index
    %c0_150 = arith.constant 0 : index
    %333 = vector.load %arg3[%c12, %c0_149, %c0_150] : memref<24x128x32xbf16, #tpu.memory_space<vmem>>, vector<1x128x32xbf16>
    %334 = vector.shape_cast %333 : vector<1x128x32xbf16> to vector<128x32xbf16>
    %cst_151 = arith.constant dense<0.000000e+00> : vector<16x32xf32>
    %335 = tpu.matmul %331, %334, %cst_151 {dimension_numbers = #tpu.dot_dimension_numbers<[1], [0], [0], [1], [0, 0, 1, 1], [], []>} : vector<16x128xbf16>, vector<128x32xbf16>, vector<16x32xf32> -> vector<16x32xf32>
    %c12_152 = arith.constant 12 : index
    %c0_153 = arith.constant 0 : index
    %336 = vector.load %arg4[%c12_152, %c0_153] : memref<24x32xf32, #tpu.memory_space<vmem>>, vector<1x32xf32>
    %337 = vector.shape_cast %336 : vector<1x32xf32> to vector<32xf32>
    %338 = vector.shape_cast %337 : vector<32xf32> to vector<1x32xf32>
    %339 = vector.broadcast %338 : vector<1x32xf32> to vector<16x32xf32>
    %340 = arith.addf %335, %339 : vector<16x32xf32>
    %c16 = arith.constant 16 : index
    %c0_154 = arith.constant 0 : index
    %c0_155 = arith.constant 0 : index
    %341 = vector.load %arg3[%c16, %c0_154, %c0_155] : memref<24x128x32xbf16, #tpu.memory_space<vmem>>, vector<1x128x32xbf16>
    %342 = vector.shape_cast %341 : vector<1x128x32xbf16> to vector<128x32xbf16>
    %cst_156 = arith.constant dense<0.000000e+00> : vector<16x32xf32>
    %343 = tpu.matmul %331, %342, %cst_156 {dimension_numbers = #tpu.dot_dimension_numbers<[1], [0], [0], [1], [0, 0, 1, 1], [], []>} : vector<16x128xbf16>, vector<128x32xbf16>, vector<16x32xf32> -> vector<16x32xf32>
    %c16_157 = arith.constant 16 : index
    %c0_158 = arith.constant 0 : index
    %344 = vector.load %arg4[%c16_157, %c0_158] : memref<24x32xf32, #tpu.memory_space<vmem>>, vector<1x32xf32>
    %345 = vector.shape_cast %344 : vector<1x32xf32> to vector<32xf32>
    %346 = vector.shape_cast %345 : vector<32xf32> to vector<1x32xf32>
    %347 = vector.broadcast %346 : vector<1x32xf32> to vector<16x32xf32>
    %348 = arith.addf %343, %347 : vector<16x32xf32>
    %c20 = arith.constant 20 : index
    %c0_159 = arith.constant 0 : index
    %c0_160 = arith.constant 0 : index
    %349 = vector.load %arg3[%c20, %c0_159, %c0_160] : memref<24x128x32xbf16, #tpu.memory_space<vmem>>, vector<1x128x32xbf16>
    %350 = vector.shape_cast %349 : vector<1x128x32xbf16> to vector<128x32xbf16>
    %cst_161 = arith.constant dense<0.000000e+00> : vector<16x32xf32>
    %351 = tpu.matmul %331, %350, %cst_161 {dimension_numbers = #tpu.dot_dimension_numbers<[1], [0], [0], [1], [0, 0, 1, 1], [], []>} : vector<16x128xbf16>, vector<128x32xbf16>, vector<16x32xf32> -> vector<16x32xf32>
    %c20_162 = arith.constant 20 : index
    %c0_163 = arith.constant 0 : index
    %352 = vector.load %arg4[%c20_162, %c0_163] : memref<24x32xf32, #tpu.memory_space<vmem>>, vector<1x32xf32>
    %353 = vector.shape_cast %352 : vector<1x32xf32> to vector<32xf32>
    %354 = vector.shape_cast %353 : vector<32xf32> to vector<1x32xf32>
    %355 = vector.broadcast %354 : vector<1x32xf32> to vector<16x32xf32>
    %356 = arith.addf %351, %355 : vector<16x32xf32>
    %357 = vector.extract_strided_slice %340 {offsets = [0, 0], sizes = [8, 32], strides = [1, 1]} : vector<16x32xf32> to vector<8x32xf32>
    %358 = vector.extract_strided_slice %348 {offsets = [0, 0], sizes = [8, 32], strides = [1, 1]} : vector<16x32xf32> to vector<8x32xf32>
    %359 = vector.extract_strided_slice %356 {offsets = [0, 0], sizes = [8, 32], strides = [1, 1]} : vector<16x32xf32> to vector<8x32xf32>
    %cst_164 = arith.constant dense<0.000000e+00> : vector<8x8xf32>
    %360 = tpu.matmul %357, %358, %cst_164 {dimension_numbers = #tpu.dot_dimension_numbers<[1], [1], [0], [0], [0, 0, 1, 0], [], []>} : vector<8x32xf32>, vector<8x32xf32>, vector<8x8xf32> -> vector<8x8xf32>
    %cst_165 = arith.constant dense<0xFF800000> : vector<8xf32>
    %361 = vector.multi_reduction <maximumf>, %360, %cst_165 [1] : vector<8x8xf32> to vector<8xf32>
    %362 = vector.shape_cast %361 : vector<8xf32> to vector<8x1xf32>
    %363 = vector.broadcast %362 : vector<8x1xf32> to vector<8x8xf32>
    %364 = arith.subf %360, %363 : vector<8x8xf32>
    %365 = math.exp %364 : vector<8x8xf32>
    %cst_166 = arith.constant dense<0.000000e+00> : vector<8xf32>
    %366 = vector.multi_reduction <add>, %365, %cst_166 [1] : vector<8x8xf32> to vector<8xf32>
    %367 = vector.shape_cast %366 : vector<8xf32> to vector<8x1xf32>
    %368 = tpu.reciprocal %367 {approx = true} : vector<8x1xf32> -> vector<8x1xf32>
    %369 = vector.broadcast %368 : vector<8x1xf32> to vector<8x8xf32>
    %370 = arith.mulf %365, %369 : vector<8x8xf32>
    %cst_167 = arith.constant dense<0.000000e+00> : vector<8x32xf32>
    %371 = tpu.matmul %370, %359, %cst_167 {dimension_numbers = #tpu.dot_dimension_numbers<[1], [0], [0], [1], [0, 0, 1, 1], [], []>} : vector<8x8xf32>, vector<8x32xf32>, vector<8x32xf32> -> vector<8x32xf32>
    %372 = vector.extract_strided_slice %340 {offsets = [8, 0], sizes = [8, 32], strides = [1, 1]} : vector<16x32xf32> to vector<8x32xf32>
    %373 = vector.extract_strided_slice %348 {offsets = [8, 0], sizes = [8, 32], strides = [1, 1]} : vector<16x32xf32> to vector<8x32xf32>
    %374 = vector.extract_strided_slice %356 {offsets = [8, 0], sizes = [8, 32], strides = [1, 1]} : vector<16x32xf32> to vector<8x32xf32>
    %cst_168 = arith.constant dense<0.000000e+00> : vector<8x8xf32>
    %375 = tpu.matmul %372, %373, %cst_168 {dimension_numbers = #tpu.dot_dimension_numbers<[1], [1], [0], [0], [0, 0, 1, 0], [], []>} : vector<8x32xf32>, vector<8x32xf32>, vector<8x8xf32> -> vector<8x8xf32>
    %cst_169 = arith.constant dense<0xFF800000> : vector<8xf32>
    %376 = vector.multi_reduction <maximumf>, %375, %cst_169 [1] : vector<8x8xf32> to vector<8xf32>
    %377 = vector.shape_cast %376 : vector<8xf32> to vector<8x1xf32>
    %378 = vector.broadcast %377 : vector<8x1xf32> to vector<8x8xf32>
    %379 = arith.subf %375, %378 : vector<8x8xf32>
    %380 = math.exp %379 : vector<8x8xf32>
    %cst_170 = arith.constant dense<0.000000e+00> : vector<8xf32>
    %381 = vector.multi_reduction <add>, %380, %cst_170 [1] : vector<8x8xf32> to vector<8xf32>
    %382 = vector.shape_cast %381 : vector<8xf32> to vector<8x1xf32>
    %383 = tpu.reciprocal %382 {approx = true} : vector<8x1xf32> -> vector<8x1xf32>
    %384 = vector.broadcast %383 : vector<8x1xf32> to vector<8x8xf32>
    %385 = arith.mulf %380, %384 : vector<8x8xf32>
    %cst_171 = arith.constant dense<0.000000e+00> : vector<8x32xf32>
    %386 = tpu.matmul %385, %374, %cst_171 {dimension_numbers = #tpu.dot_dimension_numbers<[1], [0], [0], [1], [0, 0, 1, 1], [], []>} : vector<8x8xf32>, vector<8x32xf32>, vector<8x32xf32> -> vector<8x32xf32>
    %387 = tpu.concatenate %371, %386 in 0 : vector<8x32xf32>, vector<8x32xf32> -> vector<16x32xf32>
    %388 = arith.truncf %387 : vector<16x32xf32> to vector<16x32xbf16>
    %c4_172 = arith.constant 4 : index
    %c0_173 = arith.constant 0 : index
    %c0_174 = arith.constant 0 : index
    %389 = vector.load %arg5[%c4_172, %c0_173, %c0_174] : memref<8x32x128xbf16, #tpu.memory_space<vmem>>, vector<1x32x128xbf16>
    %390 = vector.shape_cast %389 : vector<1x32x128xbf16> to vector<32x128xbf16>
    %cst_175 = arith.constant dense<0.000000e+00> : vector<16x128xf32>
    %391 = tpu.matmul %388, %390, %cst_175 {dimension_numbers = #tpu.dot_dimension_numbers<[1], [0], [0], [1], [0, 0, 1, 1], [], []>} : vector<16x32xbf16>, vector<32x128xbf16>, vector<16x128xf32> -> vector<16x128xf32>
    %392 = arith.addf %332, %391 : vector<16x128xf32>
    %c13 = arith.constant 13 : index
    %c0_176 = arith.constant 0 : index
    %c0_177 = arith.constant 0 : index
    %393 = vector.load %arg3[%c13, %c0_176, %c0_177] : memref<24x128x32xbf16, #tpu.memory_space<vmem>>, vector<1x128x32xbf16>
    %394 = vector.shape_cast %393 : vector<1x128x32xbf16> to vector<128x32xbf16>
    %cst_178 = arith.constant dense<0.000000e+00> : vector<16x32xf32>
    %395 = tpu.matmul %331, %394, %cst_178 {dimension_numbers = #tpu.dot_dimension_numbers<[1], [0], [0], [1], [0, 0, 1, 1], [], []>} : vector<16x128xbf16>, vector<128x32xbf16>, vector<16x32xf32> -> vector<16x32xf32>
    %c13_179 = arith.constant 13 : index
    %c0_180 = arith.constant 0 : index
    %396 = vector.load %arg4[%c13_179, %c0_180] : memref<24x32xf32, #tpu.memory_space<vmem>>, vector<1x32xf32>
    %397 = vector.shape_cast %396 : vector<1x32xf32> to vector<32xf32>
    %398 = vector.shape_cast %397 : vector<32xf32> to vector<1x32xf32>
    %399 = vector.broadcast %398 : vector<1x32xf32> to vector<16x32xf32>
    %400 = arith.addf %395, %399 : vector<16x32xf32>
    %c17 = arith.constant 17 : index
    %c0_181 = arith.constant 0 : index
    %c0_182 = arith.constant 0 : index
    %401 = vector.load %arg3[%c17, %c0_181, %c0_182] : memref<24x128x32xbf16, #tpu.memory_space<vmem>>, vector<1x128x32xbf16>
    %402 = vector.shape_cast %401 : vector<1x128x32xbf16> to vector<128x32xbf16>
    %cst_183 = arith.constant dense<0.000000e+00> : vector<16x32xf32>
    %403 = tpu.matmul %331, %402, %cst_183 {dimension_numbers = #tpu.dot_dimension_numbers<[1], [0], [0], [1], [0, 0, 1, 1], [], []>} : vector<16x128xbf16>, vector<128x32xbf16>, vector<16x32xf32> -> vector<16x32xf32>
    %c17_184 = arith.constant 17 : index
    %c0_185 = arith.constant 0 : index
    %404 = vector.load %arg4[%c17_184, %c0_185] : memref<24x32xf32, #tpu.memory_space<vmem>>, vector<1x32xf32>
    %405 = vector.shape_cast %404 : vector<1x32xf32> to vector<32xf32>
    %406 = vector.shape_cast %405 : vector<32xf32> to vector<1x32xf32>
    %407 = vector.broadcast %406 : vector<1x32xf32> to vector<16x32xf32>
    %408 = arith.addf %403, %407 : vector<16x32xf32>
    %c21 = arith.constant 21 : index
    %c0_186 = arith.constant 0 : index
    %c0_187 = arith.constant 0 : index
    %409 = vector.load %arg3[%c21, %c0_186, %c0_187] : memref<24x128x32xbf16, #tpu.memory_space<vmem>>, vector<1x128x32xbf16>
    %410 = vector.shape_cast %409 : vector<1x128x32xbf16> to vector<128x32xbf16>
    %cst_188 = arith.constant dense<0.000000e+00> : vector<16x32xf32>
    %411 = tpu.matmul %331, %410, %cst_188 {dimension_numbers = #tpu.dot_dimension_numbers<[1], [0], [0], [1], [0, 0, 1, 1], [], []>} : vector<16x128xbf16>, vector<128x32xbf16>, vector<16x32xf32> -> vector<16x32xf32>
    %c21_189 = arith.constant 21 : index
    %c0_190 = arith.constant 0 : index
    %412 = vector.load %arg4[%c21_189, %c0_190] : memref<24x32xf32, #tpu.memory_space<vmem>>, vector<1x32xf32>
    %413 = vector.shape_cast %412 : vector<1x32xf32> to vector<32xf32>
    %414 = vector.shape_cast %413 : vector<32xf32> to vector<1x32xf32>
    %415 = vector.broadcast %414 : vector<1x32xf32> to vector<16x32xf32>
    %416 = arith.addf %411, %415 : vector<16x32xf32>
    %417 = vector.extract_strided_slice %400 {offsets = [0, 0], sizes = [8, 32], strides = [1, 1]} : vector<16x32xf32> to vector<8x32xf32>
    %418 = vector.extract_strided_slice %408 {offsets = [0, 0], sizes = [8, 32], strides = [1, 1]} : vector<16x32xf32> to vector<8x32xf32>
    %419 = vector.extract_strided_slice %416 {offsets = [0, 0], sizes = [8, 32], strides = [1, 1]} : vector<16x32xf32> to vector<8x32xf32>
    %cst_191 = arith.constant dense<0.000000e+00> : vector<8x8xf32>
    %420 = tpu.matmul %417, %418, %cst_191 {dimension_numbers = #tpu.dot_dimension_numbers<[1], [1], [0], [0], [0, 0, 1, 0], [], []>} : vector<8x32xf32>, vector<8x32xf32>, vector<8x8xf32> -> vector<8x8xf32>
    %cst_192 = arith.constant dense<0xFF800000> : vector<8xf32>
    %421 = vector.multi_reduction <maximumf>, %420, %cst_192 [1] : vector<8x8xf32> to vector<8xf32>
    %422 = vector.shape_cast %421 : vector<8xf32> to vector<8x1xf32>
    %423 = vector.broadcast %422 : vector<8x1xf32> to vector<8x8xf32>
    %424 = arith.subf %420, %423 : vector<8x8xf32>
    %425 = math.exp %424 : vector<8x8xf32>
    %cst_193 = arith.constant dense<0.000000e+00> : vector<8xf32>
    %426 = vector.multi_reduction <add>, %425, %cst_193 [1] : vector<8x8xf32> to vector<8xf32>
    %427 = vector.shape_cast %426 : vector<8xf32> to vector<8x1xf32>
    %428 = tpu.reciprocal %427 {approx = true} : vector<8x1xf32> -> vector<8x1xf32>
    %429 = vector.broadcast %428 : vector<8x1xf32> to vector<8x8xf32>
    %430 = arith.mulf %425, %429 : vector<8x8xf32>
    %cst_194 = arith.constant dense<0.000000e+00> : vector<8x32xf32>
    %431 = tpu.matmul %430, %419, %cst_194 {dimension_numbers = #tpu.dot_dimension_numbers<[1], [0], [0], [1], [0, 0, 1, 1], [], []>} : vector<8x8xf32>, vector<8x32xf32>, vector<8x32xf32> -> vector<8x32xf32>
    %432 = vector.extract_strided_slice %400 {offsets = [8, 0], sizes = [8, 32], strides = [1, 1]} : vector<16x32xf32> to vector<8x32xf32>
    %433 = vector.extract_strided_slice %408 {offsets = [8, 0], sizes = [8, 32], strides = [1, 1]} : vector<16x32xf32> to vector<8x32xf32>
    %434 = vector.extract_strided_slice %416 {offsets = [8, 0], sizes = [8, 32], strides = [1, 1]} : vector<16x32xf32> to vector<8x32xf32>
    %cst_195 = arith.constant dense<0.000000e+00> : vector<8x8xf32>
    %435 = tpu.matmul %432, %433, %cst_195 {dimension_numbers = #tpu.dot_dimension_numbers<[1], [1], [0], [0], [0, 0, 1, 0], [], []>} : vector<8x32xf32>, vector<8x32xf32>, vector<8x8xf32> -> vector<8x8xf32>
    %cst_196 = arith.constant dense<0xFF800000> : vector<8xf32>
    %436 = vector.multi_reduction <maximumf>, %435, %cst_196 [1] : vector<8x8xf32> to vector<8xf32>
    %437 = vector.shape_cast %436 : vector<8xf32> to vector<8x1xf32>
    %438 = vector.broadcast %437 : vector<8x1xf32> to vector<8x8xf32>
    %439 = arith.subf %435, %438 : vector<8x8xf32>
    %440 = math.exp %439 : vector<8x8xf32>
    %cst_197 = arith.constant dense<0.000000e+00> : vector<8xf32>
    %441 = vector.multi_reduction <add>, %440, %cst_197 [1] : vector<8x8xf32> to vector<8xf32>
    %442 = vector.shape_cast %441 : vector<8xf32> to vector<8x1xf32>
    %443 = tpu.reciprocal %442 {approx = true} : vector<8x1xf32> -> vector<8x1xf32>
    %444 = vector.broadcast %443 : vector<8x1xf32> to vector<8x8xf32>
    %445 = arith.mulf %440, %444 : vector<8x8xf32>
    %cst_198 = arith.constant dense<0.000000e+00> : vector<8x32xf32>
    %446 = tpu.matmul %445, %434, %cst_198 {dimension_numbers = #tpu.dot_dimension_numbers<[1], [0], [0], [1], [0, 0, 1, 1], [], []>} : vector<8x8xf32>, vector<8x32xf32>, vector<8x32xf32> -> vector<8x32xf32>
    %447 = tpu.concatenate %431, %446 in 0 : vector<8x32xf32>, vector<8x32xf32> -> vector<16x32xf32>
    %448 = arith.truncf %447 : vector<16x32xf32> to vector<16x32xbf16>
    %c5_199 = arith.constant 5 : index
    %c0_200 = arith.constant 0 : index
    %c0_201 = arith.constant 0 : index
    %449 = vector.load %arg5[%c5_199, %c0_200, %c0_201] : memref<8x32x128xbf16, #tpu.memory_space<vmem>>, vector<1x32x128xbf16>
    %450 = vector.shape_cast %449 : vector<1x32x128xbf16> to vector<32x128xbf16>
    %cst_202 = arith.constant dense<0.000000e+00> : vector<16x128xf32>
    %451 = tpu.matmul %448, %450, %cst_202 {dimension_numbers = #tpu.dot_dimension_numbers<[1], [0], [0], [1], [0, 0, 1, 1], [], []>} : vector<16x32xbf16>, vector<32x128xbf16>, vector<16x128xf32> -> vector<16x128xf32>
    %452 = arith.addf %392, %451 : vector<16x128xf32>
    %c14 = arith.constant 14 : index
    %c0_203 = arith.constant 0 : index
    %c0_204 = arith.constant 0 : index
    %453 = vector.load %arg3[%c14, %c0_203, %c0_204] : memref<24x128x32xbf16, #tpu.memory_space<vmem>>, vector<1x128x32xbf16>
    %454 = vector.shape_cast %453 : vector<1x128x32xbf16> to vector<128x32xbf16>
    %cst_205 = arith.constant dense<0.000000e+00> : vector<16x32xf32>
    %455 = tpu.matmul %331, %454, %cst_205 {dimension_numbers = #tpu.dot_dimension_numbers<[1], [0], [0], [1], [0, 0, 1, 1], [], []>} : vector<16x128xbf16>, vector<128x32xbf16>, vector<16x32xf32> -> vector<16x32xf32>
    %c14_206 = arith.constant 14 : index
    %c0_207 = arith.constant 0 : index
    %456 = vector.load %arg4[%c14_206, %c0_207] : memref<24x32xf32, #tpu.memory_space<vmem>>, vector<1x32xf32>
    %457 = vector.shape_cast %456 : vector<1x32xf32> to vector<32xf32>
    %458 = vector.shape_cast %457 : vector<32xf32> to vector<1x32xf32>
    %459 = vector.broadcast %458 : vector<1x32xf32> to vector<16x32xf32>
    %460 = arith.addf %455, %459 : vector<16x32xf32>
    %c18 = arith.constant 18 : index
    %c0_208 = arith.constant 0 : index
    %c0_209 = arith.constant 0 : index
    %461 = vector.load %arg3[%c18, %c0_208, %c0_209] : memref<24x128x32xbf16, #tpu.memory_space<vmem>>, vector<1x128x32xbf16>
    %462 = vector.shape_cast %461 : vector<1x128x32xbf16> to vector<128x32xbf16>
    %cst_210 = arith.constant dense<0.000000e+00> : vector<16x32xf32>
    %463 = tpu.matmul %331, %462, %cst_210 {dimension_numbers = #tpu.dot_dimension_numbers<[1], [0], [0], [1], [0, 0, 1, 1], [], []>} : vector<16x128xbf16>, vector<128x32xbf16>, vector<16x32xf32> -> vector<16x32xf32>
    %c18_211 = arith.constant 18 : index
    %c0_212 = arith.constant 0 : index
    %464 = vector.load %arg4[%c18_211, %c0_212] : memref<24x32xf32, #tpu.memory_space<vmem>>, vector<1x32xf32>
    %465 = vector.shape_cast %464 : vector<1x32xf32> to vector<32xf32>
    %466 = vector.shape_cast %465 : vector<32xf32> to vector<1x32xf32>
    %467 = vector.broadcast %466 : vector<1x32xf32> to vector<16x32xf32>
    %468 = arith.addf %463, %467 : vector<16x32xf32>
    %c22 = arith.constant 22 : index
    %c0_213 = arith.constant 0 : index
    %c0_214 = arith.constant 0 : index
    %469 = vector.load %arg3[%c22, %c0_213, %c0_214] : memref<24x128x32xbf16, #tpu.memory_space<vmem>>, vector<1x128x32xbf16>
    %470 = vector.shape_cast %469 : vector<1x128x32xbf16> to vector<128x32xbf16>
    %cst_215 = arith.constant dense<0.000000e+00> : vector<16x32xf32>
    %471 = tpu.matmul %331, %470, %cst_215 {dimension_numbers = #tpu.dot_dimension_numbers<[1], [0], [0], [1], [0, 0, 1, 1], [], []>} : vector<16x128xbf16>, vector<128x32xbf16>, vector<16x32xf32> -> vector<16x32xf32>
    %c22_216 = arith.constant 22 : index
    %c0_217 = arith.constant 0 : index
    %472 = vector.load %arg4[%c22_216, %c0_217] : memref<24x32xf32, #tpu.memory_space<vmem>>, vector<1x32xf32>
    %473 = vector.shape_cast %472 : vector<1x32xf32> to vector<32xf32>
    %474 = vector.shape_cast %473 : vector<32xf32> to vector<1x32xf32>
    %475 = vector.broadcast %474 : vector<1x32xf32> to vector<16x32xf32>
    %476 = arith.addf %471, %475 : vector<16x32xf32>
    %477 = vector.extract_strided_slice %460 {offsets = [0, 0], sizes = [8, 32], strides = [1, 1]} : vector<16x32xf32> to vector<8x32xf32>
    %478 = vector.extract_strided_slice %468 {offsets = [0, 0], sizes = [8, 32], strides = [1, 1]} : vector<16x32xf32> to vector<8x32xf32>
    %479 = vector.extract_strided_slice %476 {offsets = [0, 0], sizes = [8, 32], strides = [1, 1]} : vector<16x32xf32> to vector<8x32xf32>
    %cst_218 = arith.constant dense<0.000000e+00> : vector<8x8xf32>
    %480 = tpu.matmul %477, %478, %cst_218 {dimension_numbers = #tpu.dot_dimension_numbers<[1], [1], [0], [0], [0, 0, 1, 0], [], []>} : vector<8x32xf32>, vector<8x32xf32>, vector<8x8xf32> -> vector<8x8xf32>
    %cst_219 = arith.constant dense<0xFF800000> : vector<8xf32>
    %481 = vector.multi_reduction <maximumf>, %480, %cst_219 [1] : vector<8x8xf32> to vector<8xf32>
    %482 = vector.shape_cast %481 : vector<8xf32> to vector<8x1xf32>
    %483 = vector.broadcast %482 : vector<8x1xf32> to vector<8x8xf32>
    %484 = arith.subf %480, %483 : vector<8x8xf32>
    %485 = math.exp %484 : vector<8x8xf32>
    %cst_220 = arith.constant dense<0.000000e+00> : vector<8xf32>
    %486 = vector.multi_reduction <add>, %485, %cst_220 [1] : vector<8x8xf32> to vector<8xf32>
    %487 = vector.shape_cast %486 : vector<8xf32> to vector<8x1xf32>
    %488 = tpu.reciprocal %487 {approx = true} : vector<8x1xf32> -> vector<8x1xf32>
    %489 = vector.broadcast %488 : vector<8x1xf32> to vector<8x8xf32>
    %490 = arith.mulf %485, %489 : vector<8x8xf32>
    %cst_221 = arith.constant dense<0.000000e+00> : vector<8x32xf32>
    %491 = tpu.matmul %490, %479, %cst_221 {dimension_numbers = #tpu.dot_dimension_numbers<[1], [0], [0], [1], [0, 0, 1, 1], [], []>} : vector<8x8xf32>, vector<8x32xf32>, vector<8x32xf32> -> vector<8x32xf32>
    %492 = vector.extract_strided_slice %460 {offsets = [8, 0], sizes = [8, 32], strides = [1, 1]} : vector<16x32xf32> to vector<8x32xf32>
    %493 = vector.extract_strided_slice %468 {offsets = [8, 0], sizes = [8, 32], strides = [1, 1]} : vector<16x32xf32> to vector<8x32xf32>
    %494 = vector.extract_strided_slice %476 {offsets = [8, 0], sizes = [8, 32], strides = [1, 1]} : vector<16x32xf32> to vector<8x32xf32>
    %cst_222 = arith.constant dense<0.000000e+00> : vector<8x8xf32>
    %495 = tpu.matmul %492, %493, %cst_222 {dimension_numbers = #tpu.dot_dimension_numbers<[1], [1], [0], [0], [0, 0, 1, 0], [], []>} : vector<8x32xf32>, vector<8x32xf32>, vector<8x8xf32> -> vector<8x8xf32>
    %cst_223 = arith.constant dense<0xFF800000> : vector<8xf32>
    %496 = vector.multi_reduction <maximumf>, %495, %cst_223 [1] : vector<8x8xf32> to vector<8xf32>
    %497 = vector.shape_cast %496 : vector<8xf32> to vector<8x1xf32>
    %498 = vector.broadcast %497 : vector<8x1xf32> to vector<8x8xf32>
    %499 = arith.subf %495, %498 : vector<8x8xf32>
    %500 = math.exp %499 : vector<8x8xf32>
    %cst_224 = arith.constant dense<0.000000e+00> : vector<8xf32>
    %501 = vector.multi_reduction <add>, %500, %cst_224 [1] : vector<8x8xf32> to vector<8xf32>
    %502 = vector.shape_cast %501 : vector<8xf32> to vector<8x1xf32>
    %503 = tpu.reciprocal %502 {approx = true} : vector<8x1xf32> -> vector<8x1xf32>
    %504 = vector.broadcast %503 : vector<8x1xf32> to vector<8x8xf32>
    %505 = arith.mulf %500, %504 : vector<8x8xf32>
    %cst_225 = arith.constant dense<0.000000e+00> : vector<8x32xf32>
    %506 = tpu.matmul %505, %494, %cst_225 {dimension_numbers = #tpu.dot_dimension_numbers<[1], [0], [0], [1], [0, 0, 1, 1], [], []>} : vector<8x8xf32>, vector<8x32xf32>, vector<8x32xf32> -> vector<8x32xf32>
    %507 = tpu.concatenate %491, %506 in 0 : vector<8x32xf32>, vector<8x32xf32> -> vector<16x32xf32>
    %508 = arith.truncf %507 : vector<16x32xf32> to vector<16x32xbf16>
    %c6_226 = arith.constant 6 : index
    %c0_227 = arith.constant 0 : index
    %c0_228 = arith.constant 0 : index
    %509 = vector.load %arg5[%c6_226, %c0_227, %c0_228] : memref<8x32x128xbf16, #tpu.memory_space<vmem>>, vector<1x32x128xbf16>
    %510 = vector.shape_cast %509 : vector<1x32x128xbf16> to vector<32x128xbf16>
    %cst_229 = arith.constant dense<0.000000e+00> : vector<16x128xf32>
    %511 = tpu.matmul %508, %510, %cst_229 {dimension_numbers = #tpu.dot_dimension_numbers<[1], [0], [0], [1], [0, 0, 1, 1], [], []>} : vector<16x32xbf16>, vector<32x128xbf16>, vector<16x128xf32> -> vector<16x128xf32>
    %512 = arith.addf %452, %511 : vector<16x128xf32>
    %c15 = arith.constant 15 : index
    %c0_230 = arith.constant 0 : index
    %c0_231 = arith.constant 0 : index
    %513 = vector.load %arg3[%c15, %c0_230, %c0_231] : memref<24x128x32xbf16, #tpu.memory_space<vmem>>, vector<1x128x32xbf16>
    %514 = vector.shape_cast %513 : vector<1x128x32xbf16> to vector<128x32xbf16>
    %cst_232 = arith.constant dense<0.000000e+00> : vector<16x32xf32>
    %515 = tpu.matmul %331, %514, %cst_232 {dimension_numbers = #tpu.dot_dimension_numbers<[1], [0], [0], [1], [0, 0, 1, 1], [], []>} : vector<16x128xbf16>, vector<128x32xbf16>, vector<16x32xf32> -> vector<16x32xf32>
    %c15_233 = arith.constant 15 : index
    %c0_234 = arith.constant 0 : index
    %516 = vector.load %arg4[%c15_233, %c0_234] : memref<24x32xf32, #tpu.memory_space<vmem>>, vector<1x32xf32>
    %517 = vector.shape_cast %516 : vector<1x32xf32> to vector<32xf32>
    %518 = vector.shape_cast %517 : vector<32xf32> to vector<1x32xf32>
    %519 = vector.broadcast %518 : vector<1x32xf32> to vector<16x32xf32>
    %520 = arith.addf %515, %519 : vector<16x32xf32>
    %c19 = arith.constant 19 : index
    %c0_235 = arith.constant 0 : index
    %c0_236 = arith.constant 0 : index
    %521 = vector.load %arg3[%c19, %c0_235, %c0_236] : memref<24x128x32xbf16, #tpu.memory_space<vmem>>, vector<1x128x32xbf16>
    %522 = vector.shape_cast %521 : vector<1x128x32xbf16> to vector<128x32xbf16>
    %cst_237 = arith.constant dense<0.000000e+00> : vector<16x32xf32>
    %523 = tpu.matmul %331, %522, %cst_237 {dimension_numbers = #tpu.dot_dimension_numbers<[1], [0], [0], [1], [0, 0, 1, 1], [], []>} : vector<16x128xbf16>, vector<128x32xbf16>, vector<16x32xf32> -> vector<16x32xf32>
    %c19_238 = arith.constant 19 : index
    %c0_239 = arith.constant 0 : index
    %524 = vector.load %arg4[%c19_238, %c0_239] : memref<24x32xf32, #tpu.memory_space<vmem>>, vector<1x32xf32>
    %525 = vector.shape_cast %524 : vector<1x32xf32> to vector<32xf32>
    %526 = vector.shape_cast %525 : vector<32xf32> to vector<1x32xf32>
    %527 = vector.broadcast %526 : vector<1x32xf32> to vector<16x32xf32>
    %528 = arith.addf %523, %527 : vector<16x32xf32>
    %c23 = arith.constant 23 : index
    %c0_240 = arith.constant 0 : index
    %c0_241 = arith.constant 0 : index
    %529 = vector.load %arg3[%c23, %c0_240, %c0_241] : memref<24x128x32xbf16, #tpu.memory_space<vmem>>, vector<1x128x32xbf16>
    %530 = vector.shape_cast %529 : vector<1x128x32xbf16> to vector<128x32xbf16>
    %cst_242 = arith.constant dense<0.000000e+00> : vector<16x32xf32>
    %531 = tpu.matmul %331, %530, %cst_242 {dimension_numbers = #tpu.dot_dimension_numbers<[1], [0], [0], [1], [0, 0, 1, 1], [], []>} : vector<16x128xbf16>, vector<128x32xbf16>, vector<16x32xf32> -> vector<16x32xf32>
    %c23_243 = arith.constant 23 : index
    %c0_244 = arith.constant 0 : index
    %532 = vector.load %arg4[%c23_243, %c0_244] : memref<24x32xf32, #tpu.memory_space<vmem>>, vector<1x32xf32>
    %533 = vector.shape_cast %532 : vector<1x32xf32> to vector<32xf32>
    %534 = vector.shape_cast %533 : vector<32xf32> to vector<1x32xf32>
    %535 = vector.broadcast %534 : vector<1x32xf32> to vector<16x32xf32>
    %536 = arith.addf %531, %535 : vector<16x32xf32>
    %537 = vector.extract_strided_slice %520 {offsets = [0, 0], sizes = [8, 32], strides = [1, 1]} : vector<16x32xf32> to vector<8x32xf32>
    %538 = vector.extract_strided_slice %528 {offsets = [0, 0], sizes = [8, 32], strides = [1, 1]} : vector<16x32xf32> to vector<8x32xf32>
    %539 = vector.extract_strided_slice %536 {offsets = [0, 0], sizes = [8, 32], strides = [1, 1]} : vector<16x32xf32> to vector<8x32xf32>
    %cst_245 = arith.constant dense<0.000000e+00> : vector<8x8xf32>
    %540 = tpu.matmul %537, %538, %cst_245 {dimension_numbers = #tpu.dot_dimension_numbers<[1], [1], [0], [0], [0, 0, 1, 0], [], []>} : vector<8x32xf32>, vector<8x32xf32>, vector<8x8xf32> -> vector<8x8xf32>
    %cst_246 = arith.constant dense<0xFF800000> : vector<8xf32>
    %541 = vector.multi_reduction <maximumf>, %540, %cst_246 [1] : vector<8x8xf32> to vector<8xf32>
    %542 = vector.shape_cast %541 : vector<8xf32> to vector<8x1xf32>
    %543 = vector.broadcast %542 : vector<8x1xf32> to vector<8x8xf32>
    %544 = arith.subf %540, %543 : vector<8x8xf32>
    %545 = math.exp %544 : vector<8x8xf32>
    %cst_247 = arith.constant dense<0.000000e+00> : vector<8xf32>
    %546 = vector.multi_reduction <add>, %545, %cst_247 [1] : vector<8x8xf32> to vector<8xf32>
    %547 = vector.shape_cast %546 : vector<8xf32> to vector<8x1xf32>
    %548 = tpu.reciprocal %547 {approx = true} : vector<8x1xf32> -> vector<8x1xf32>
    %549 = vector.broadcast %548 : vector<8x1xf32> to vector<8x8xf32>
    %550 = arith.mulf %545, %549 : vector<8x8xf32>
    %cst_248 = arith.constant dense<0.000000e+00> : vector<8x32xf32>
    %551 = tpu.matmul %550, %539, %cst_248 {dimension_numbers = #tpu.dot_dimension_numbers<[1], [0], [0], [1], [0, 0, 1, 1], [], []>} : vector<8x8xf32>, vector<8x32xf32>, vector<8x32xf32> -> vector<8x32xf32>
    %552 = vector.extract_strided_slice %520 {offsets = [8, 0], sizes = [8, 32], strides = [1, 1]} : vector<16x32xf32> to vector<8x32xf32>
    %553 = vector.extract_strided_slice %528 {offsets = [8, 0], sizes = [8, 32], strides = [1, 1]} : vector<16x32xf32> to vector<8x32xf32>
    %554 = vector.extract_strided_slice %536 {offsets = [8, 0], sizes = [8, 32], strides = [1, 1]} : vector<16x32xf32> to vector<8x32xf32>
    %cst_249 = arith.constant dense<0.000000e+00> : vector<8x8xf32>
    %555 = tpu.matmul %552, %553, %cst_249 {dimension_numbers = #tpu.dot_dimension_numbers<[1], [1], [0], [0], [0, 0, 1, 0], [], []>} : vector<8x32xf32>, vector<8x32xf32>, vector<8x8xf32> -> vector<8x8xf32>
    %cst_250 = arith.constant dense<0xFF800000> : vector<8xf32>
    %556 = vector.multi_reduction <maximumf>, %555, %cst_250 [1] : vector<8x8xf32> to vector<8xf32>
    %557 = vector.shape_cast %556 : vector<8xf32> to vector<8x1xf32>
    %558 = vector.broadcast %557 : vector<8x1xf32> to vector<8x8xf32>
    %559 = arith.subf %555, %558 : vector<8x8xf32>
    %560 = math.exp %559 : vector<8x8xf32>
    %cst_251 = arith.constant dense<0.000000e+00> : vector<8xf32>
    %561 = vector.multi_reduction <add>, %560, %cst_251 [1] : vector<8x8xf32> to vector<8xf32>
    %562 = vector.shape_cast %561 : vector<8xf32> to vector<8x1xf32>
    %563 = tpu.reciprocal %562 {approx = true} : vector<8x1xf32> -> vector<8x1xf32>
    %564 = vector.broadcast %563 : vector<8x1xf32> to vector<8x8xf32>
    %565 = arith.mulf %560, %564 : vector<8x8xf32>
    %cst_252 = arith.constant dense<0.000000e+00> : vector<8x32xf32>
    %566 = tpu.matmul %565, %554, %cst_252 {dimension_numbers = #tpu.dot_dimension_numbers<[1], [0], [0], [1], [0, 0, 1, 1], [], []>} : vector<8x8xf32>, vector<8x32xf32>, vector<8x32xf32> -> vector<8x32xf32>
    %567 = tpu.concatenate %551, %566 in 0 : vector<8x32xf32>, vector<8x32xf32> -> vector<16x32xf32>
    %568 = arith.truncf %567 : vector<16x32xf32> to vector<16x32xbf16>
    %c7_253 = arith.constant 7 : index
    %c0_254 = arith.constant 0 : index
    %c0_255 = arith.constant 0 : index
    %569 = vector.load %arg5[%c7_253, %c0_254, %c0_255] : memref<8x32x128xbf16, #tpu.memory_space<vmem>>, vector<1x32x128xbf16>
    %570 = vector.shape_cast %569 : vector<1x32x128xbf16> to vector<32x128xbf16>
    %cst_256 = arith.constant dense<0.000000e+00> : vector<16x128xf32>
    %571 = tpu.matmul %568, %570, %cst_256 {dimension_numbers = #tpu.dot_dimension_numbers<[1], [0], [0], [1], [0, 0, 1, 1], [], []>} : vector<16x32xbf16>, vector<32x128xbf16>, vector<16x128xf32> -> vector<16x128xf32>
    %572 = arith.addf %512, %571 : vector<16x128xf32>
    %c6_257 = arith.constant 6 : index
    %c0_258 = arith.constant 0 : index
    %573 = vector.load %arg6[%c6_257, %c0_258] : memref<12x128xf32, #tpu.memory_space<vmem>>, vector<1x128xf32>
    %574 = vector.shape_cast %573 : vector<1x128xf32> to vector<128xf32>
    %575 = vector.shape_cast %574 : vector<128xf32> to vector<1x128xf32>
    %576 = vector.broadcast %575 : vector<1x128xf32> to vector<16x128xf32>
    %577 = arith.addf %572, %576 : vector<16x128xf32>
    %578 = arith.addf %330, %577 : vector<16x128xf32>
    %c7_259 = arith.constant 7 : index
    %c0_260 = arith.constant 0 : index
    %579 = vector.load %arg6[%c7_259, %c0_260] : memref<12x128xf32, #tpu.memory_space<vmem>>, vector<1x128xf32>
    %580 = vector.shape_cast %579 : vector<1x128xf32> to vector<128xf32>
    %c8_261 = arith.constant 8 : index
    %c0_262 = arith.constant 0 : index
    %581 = vector.load %arg6[%c8_261, %c0_262] : memref<12x128xf32, #tpu.memory_space<vmem>>, vector<1x128xf32>
    %582 = vector.shape_cast %581 : vector<1x128xf32> to vector<128xf32>
    %cst_263 = arith.constant dense<0.000000e+00> : vector<16xf32>
    %583 = vector.multi_reduction <add>, %578, %cst_263 [1] : vector<16x128xf32> to vector<16xf32>
    %584 = vector.shape_cast %583 : vector<16xf32> to vector<16x1xf32>
    %cst_264 = arith.constant 1.280000e+02 : f32
    %585 = vector.broadcast %cst_264 : f32 to vector<16x1xf32>
    %586 = arith.divf %584, %585 : vector<16x1xf32>
    %587 = arith.mulf %578, %578 : vector<16x128xf32>
    %cst_265 = arith.constant dense<0.000000e+00> : vector<16xf32>
    %588 = vector.multi_reduction <add>, %587, %cst_265 [1] : vector<16x128xf32> to vector<16xf32>
    %589 = vector.shape_cast %588 : vector<16xf32> to vector<16x1xf32>
    %cst_266 = arith.constant 1.280000e+02 : f32
    %590 = vector.broadcast %cst_266 : f32 to vector<16x1xf32>
    %591 = arith.divf %589, %590 : vector<16x1xf32>
    %592 = arith.mulf %586, %586 : vector<16x1xf32>
    %593 = arith.subf %591, %592 : vector<16x1xf32>
    %594 = vector.broadcast %586 : vector<16x1xf32> to vector<16x128xf32>
    %595 = arith.subf %578, %594 : vector<16x128xf32>
    %cst_267 = arith.constant 9.99999974E-6 : f32
    %596 = vector.broadcast %cst_267 : f32 to vector<16x1xf32>
    %597 = arith.addf %593, %596 : vector<16x1xf32>
    %598 = math.rsqrt %597 : vector<16x1xf32>
    %599 = vector.broadcast %598 : vector<16x1xf32> to vector<16x128xf32>
    %600 = arith.mulf %595, %599 : vector<16x128xf32>
    %601 = vector.shape_cast %580 : vector<128xf32> to vector<1x128xf32>
    %602 = vector.broadcast %601 : vector<1x128xf32> to vector<16x128xf32>
    %603 = arith.mulf %600, %602 : vector<16x128xf32>
    %604 = vector.shape_cast %582 : vector<128xf32> to vector<1x128xf32>
    %605 = vector.broadcast %604 : vector<1x128xf32> to vector<16x128xf32>
    %606 = arith.addf %603, %605 : vector<16x128xf32>
    %607 = arith.truncf %606 : vector<16x128xf32> to vector<16x128xbf16>
    %c1_268 = arith.constant 1 : index
    %c0_269 = arith.constant 0 : index
    %c0_270 = arith.constant 0 : index
    %608 = vector.load %arg7[%c1_268, %c0_269, %c0_270] : memref<2x128x256xbf16, #tpu.memory_space<vmem>>, vector<1x128x256xbf16>
    %609 = vector.shape_cast %608 : vector<1x128x256xbf16> to vector<128x256xbf16>
    %cst_271 = arith.constant dense<0.000000e+00> : vector<16x256xf32>
    %610 = tpu.matmul %607, %609, %cst_271 {dimension_numbers = #tpu.dot_dimension_numbers<[1], [0], [0], [1], [0, 0, 1, 1], [], []>} : vector<16x128xbf16>, vector<128x256xbf16>, vector<16x256xf32> -> vector<16x256xf32>
    %c1_272 = arith.constant 1 : index
    %c0_273 = arith.constant 0 : index
    %611 = vector.load %arg8[%c1_272, %c0_273] : memref<2x256xf32, #tpu.memory_space<vmem>>, vector<1x256xf32>
    %612 = vector.shape_cast %611 : vector<1x256xf32> to vector<256xf32>
    %613 = vector.shape_cast %612 : vector<256xf32> to vector<1x256xf32>
    %614 = vector.broadcast %613 : vector<1x256xf32> to vector<16x256xf32>
    %615 = arith.addf %610, %614 : vector<16x256xf32>
    %cst_274 = arith.constant 0.000000e+00 : f32
    %616 = vector.broadcast %cst_274 : f32 to vector<16x256xf32>
    %617 = arith.maximumf %615, %616 : vector<16x256xf32>
    %618 = arith.truncf %617 : vector<16x256xf32> to vector<16x256xbf16>
    %c1_275 = arith.constant 1 : index
    %c0_276 = arith.constant 0 : index
    %c0_277 = arith.constant 0 : index
    %619 = vector.load %arg9[%c1_275, %c0_276, %c0_277] : memref<2x256x128xbf16, #tpu.memory_space<vmem>>, vector<1x256x128xbf16>
    %620 = vector.shape_cast %619 : vector<1x256x128xbf16> to vector<256x128xbf16>
    %cst_278 = arith.constant dense<0.000000e+00> : vector<16x128xf32>
    %621 = tpu.matmul %618, %620, %cst_278 {dimension_numbers = #tpu.dot_dimension_numbers<[1], [0], [0], [1], [0, 0, 1, 1], [], []>} : vector<16x256xbf16>, vector<256x128xbf16>, vector<16x128xf32> -> vector<16x128xf32>
    %c11_279 = arith.constant 11 : index
    %c0_280 = arith.constant 0 : index
    %622 = vector.load %arg6[%c11_279, %c0_280] : memref<12x128xf32, #tpu.memory_space<vmem>>, vector<1x128xf32>
    %623 = vector.shape_cast %622 : vector<1x128xf32> to vector<128xf32>
    %624 = vector.shape_cast %623 : vector<128xf32> to vector<1x128xf32>
    %625 = vector.broadcast %624 : vector<1x128xf32> to vector<16x128xf32>
    %626 = arith.addf %621, %625 : vector<16x128xf32>
    %627 = arith.addf %606, %626 : vector<16x128xf32>
    %c9_281 = arith.constant 9 : index
    %c0_282 = arith.constant 0 : index
    %628 = vector.load %arg6[%c9_281, %c0_282] : memref<12x128xf32, #tpu.memory_space<vmem>>, vector<1x128xf32>
    %629 = vector.shape_cast %628 : vector<1x128xf32> to vector<128xf32>
    %c10_283 = arith.constant 10 : index
    %c0_284 = arith.constant 0 : index
    %630 = vector.load %arg6[%c10_283, %c0_284] : memref<12x128xf32, #tpu.memory_space<vmem>>, vector<1x128xf32>
    %631 = vector.shape_cast %630 : vector<1x128xf32> to vector<128xf32>
    %cst_285 = arith.constant dense<0.000000e+00> : vector<16xf32>
    %632 = vector.multi_reduction <add>, %627, %cst_285 [1] : vector<16x128xf32> to vector<16xf32>
    %633 = vector.shape_cast %632 : vector<16xf32> to vector<16x1xf32>
    %cst_286 = arith.constant 1.280000e+02 : f32
    %634 = vector.broadcast %cst_286 : f32 to vector<16x1xf32>
    %635 = arith.divf %633, %634 : vector<16x1xf32>
    %636 = arith.mulf %627, %627 : vector<16x128xf32>
    %cst_287 = arith.constant dense<0.000000e+00> : vector<16xf32>
    %637 = vector.multi_reduction <add>, %636, %cst_287 [1] : vector<16x128xf32> to vector<16xf32>
    %638 = vector.shape_cast %637 : vector<16xf32> to vector<16x1xf32>
    %cst_288 = arith.constant 1.280000e+02 : f32
    %639 = vector.broadcast %cst_288 : f32 to vector<16x1xf32>
    %640 = arith.divf %638, %639 : vector<16x1xf32>
    %641 = arith.mulf %635, %635 : vector<16x1xf32>
    %642 = arith.subf %640, %641 : vector<16x1xf32>
    %643 = vector.broadcast %635 : vector<16x1xf32> to vector<16x128xf32>
    %644 = arith.subf %627, %643 : vector<16x128xf32>
    %cst_289 = arith.constant 9.99999974E-6 : f32
    %645 = vector.broadcast %cst_289 : f32 to vector<16x1xf32>
    %646 = arith.addf %642, %645 : vector<16x1xf32>
    %647 = math.rsqrt %646 : vector<16x1xf32>
    %648 = vector.broadcast %647 : vector<16x1xf32> to vector<16x128xf32>
    %649 = arith.mulf %644, %648 : vector<16x128xf32>
    %650 = vector.shape_cast %629 : vector<128xf32> to vector<1x128xf32>
    %651 = vector.broadcast %650 : vector<1x128xf32> to vector<16x128xf32>
    %652 = arith.mulf %649, %651 : vector<16x128xf32>
    %653 = vector.shape_cast %631 : vector<128xf32> to vector<1x128xf32>
    %654 = vector.broadcast %653 : vector<1x128xf32> to vector<16x128xf32>
    %655 = arith.addf %652, %654 : vector<16x128xf32>
    %c0_290 = arith.constant 0 : index
    %c0_291 = arith.constant 0 : index
    %656 = vector.load %arg10[%c0_290, %c0_291] : memref<16x128xf32, #tpu.memory_space<vmem>>, vector<16x128xf32>
    tpu.vector_store %arg10[%c0_290, %c0_291], %655 {strides = array<i32>} : memref<16x128xf32, #tpu.memory_space<vmem>>, vector<16x128xf32>,
    return
  }
}

</mosaic_0001>

<bundles_post_ra>
// kernel: tpu_custom_call.1
= control target key start
LH: loop header
LB: loop body
LE: loop exit
PB: predicated region body
PF: predicated region fallthrough
CT: control target
= control target key end

     0   :  { %vm58_vm0 = vcmask 1040384   ;;  %vm54_vm1 = vcmask 146432   ;;  %s7473_s0 = inlined_call_operand.vmem [shape: f32[16,18], index: 0, kind: input, shape index: {}]   ;;  %s7474_s1 = inlined_call_operand.vmem [shape: bf16[18,128], index: 1, kind: input, shape index: {}]   ;;  %s7475_s2 = inlined_call_operand.vmem [shape: f32[16,128], index: 2, kind: input, shape index: {}]   ;;  %s7476_s3 = inlined_call_operand.vmem [shape: bf16[24,128,32], index: 3, kind: input, shape index: {}]   ;;  %s7477_s4 = inlined_call_operand.vmem [shape: f32[24,32], index: 4, kind: input, shape index: {}]   ;;  %s7478_s5 = inlined_call_operand.vmem [shape: bf16[8,32,128], index: 5, kind: input, shape index: {}]   ;;  %s7479_s6 = inlined_call_operand.vmem [shape: f32[12,128], index: 6, kind: input, shape index: {}]   ;;  %s7480_s7 = inlined_call_operand.vmem [shape: bf16[2,128,256], index: 7, kind: input, shape index: {}]   ;;  %s7481_s8 = inlined_call_operand.vmem [shape: f32[2,256], index: 8, kind: input, shape index: {}]   ;;  %s7482_s9 = inlined_call_operand.vmem [shape: bf16[2,256,128], index: 9, kind: input, shape index: {}]   ;;  %s7483_s10 = inlined_call_operand.hbm [shape: f32[16,128], index: 10, kind: output, shape index: {}]  }
   0x1   :  { %v42_v0 = vld [vmem:[%s7474_s1 + $0x8] sm:$0x1]  ;;  %v5732_v2 = vld [vmem:[%s7476_s3 + $0x238] sm:$0xff]  ;;  %v5731_v5 = vld [vmem:[%s7476_s3 + $0x230] sm:$0xff] }
   0x2   :  { %v50_v1 = vunpack.c.l.b16 %v42_v0  ;;  %v5716_v3 = vld [vmem:[%s7476_s3 + $0x38] sm:$0xff]  ;;  %305 = vmatpush.bf16.msra.mxu3 %v5732_v2  ;;  %v5715_v7 = vld [vmem:[%s7476_s3 + $0x30] sm:$0xff]  ;;  %v5708_v10 = vld [vmem:[%s7474_s1] sm:$0xff] }
   0x3   :  { %v5724_v6 = vld [vmem:[%s7476_s3 + $0x138] sm:$0xff]  ;;  %143 = vmatpush.bf16.msra.mxu1 %v5716_v3  ;;  %v5723_v9 = vld [vmem:[%s7476_s3 + $0x130] sm:$0xff]  ;;  %v37_v11 = vld [vmem:[%s7473_s0] sm:$0xff] }
   0x4   :  { %v52_v4 = vpack.c.b16 %v50_v1, %v50_v1  ;;  %224 = vmatpush.bf16.msra.mxu2 %v5724_v6  ;;  %v38_v12 = vld [vmem:[%s7473_s0 + $0x8] sm:$0xff]  ;;  %v5729_v17 = vld [vmem:[%s7476_s3 + $0x220] sm:$0xff]  ;;  %v5728_v20 = vld [vmem:[%s7476_s3 + $0x218] sm:$0xff] }
   0x5   :  { %v5730_v13 = vld [vmem:[%s7476_s3 + $0x228] sm:$0xff]  ;;  %v39_v15 = vpack.c.bf16 %v38_v12, %v37_v11  ;;  %v5713_v18 = vld [vmem:[%s7476_s3 + $0x20] sm:$0xff]  ;;  %v5712_v21 = vld [vmem:[%s7476_s3 + $0x18] sm:$0xff] }
   0x6   :  { %v60_v8 = vsel %vm58_vm0, %v52_v4, 0  ;;  %306 = vmatpush.bf16.msra.mxu3 %v5731_v5  ;;  %v5714_v14 = vld [vmem:[%s7476_s3 + $0x28] sm:$0xff]  ;;  %v5721_v19 = vld [vmem:[%s7476_s3 + $0x120] sm:$0xff]  ;;  %v5720_v22 = vld [vmem:[%s7476_s3 + $0x118] sm:$0xff] }
   0x7   :  { %68 = vmatpush.bf16.msra.mxu0 %v60_v8  ;;  %144 = vmatpush.bf16.msra.mxu1 %v5715_v7  ;;  %v5722_v16 = vld [vmem:[%s7476_s3 + $0x128] sm:$0xff]  ;;  %v5727_v23 = vld [vmem:[%s7476_s3 + $0x210] sm:$0xff] }
   0x8   :  { %225 = vmatpush.bf16.msra.mxu2 %v5723_v9  ;;  %v5711_v24 = vld [vmem:[%s7476_s3 + $0x10] sm:$0xff]  ;;  %v5726_v26 = vld [vmem:[%s7476_s3 + $0x208] sm:$0xff] }
   0x9   :  { %v5719_v25 = vld [vmem:[%s7476_s3 + $0x110] sm:$0xff] }
   0xa   :  { %307 = vmatpush.bf16.msra.mxu3 %v5730_v13 }
   0xb   :  { %69 = vmatpush.bf16.msra.mxu0 %v5708_v10  ;;  %145 = vmatpush.bf16.msra.mxu1 %v5714_v14 }
   0xc   :  { %226 = vmatpush.bf16.msra.mxu2 %v5722_v16 }
   0xe   :  { %4118 = vmatmul.msk.bf16.vlgmr.msra.gmra.mxu0 %vm54_vm1, %v39_v15  ;;  %308 = vmatpush.bf16.msra.mxu3 %v5729_v17 }
   0xf   :  { %146 = vmatpush.bf16.msra.mxu1 %v5713_v18 }
  0x10   :  { %227 = vmatpush.bf16.msra.mxu2 %v5721_v19 }
  0x12   :  { %309 = vmatpush.bf16.msra.mxu3 %v5728_v20 }
  0x13   :  { %147 = vmatpush.bf16.msra.mxu1 %v5712_v21 }
  0x14   :  { %228 = vmatpush.bf16.msra.mxu2 %v5720_v22 }
  0x16   :  { %310 = vmatpush.bf16.msra.mxu3 %v5727_v23 }
  0x17   :  { %15 = vsyncpa [#allocation3], 0  ;;  %148 = vmatpush.bf16.msra.mxu1 %v5711_v24  ;;  %v5710_v27 = vld [vmem:[%s7476_s3 + $0x8] sm:$0xff]  ;;  %v5725_v29 = vld [vmem:[%s7476_s3 + $0x200] sm:$0xff]  ;;  %vm319_vm2 = vcmask 261120   ;;  %vm346_vm3 = vcmask 64512  }
  0x18   :  { %229 = vmatpush.bf16.msra.mxu2 %v5719_v25  ;;  %v5718_v28 = vld [vmem:[%s7476_s3 + $0x108] sm:$0xff]  ;;  %v5758_v30 = vld [vmem:[%s7476_s3 + $0x278] sm:$0xff]  ;;  %v5709_v31 = vld [vmem:[%s7476_s3] sm:$0xff]  ;;  %s4102_s11 = sshll.u32 %s7483_s10, 4  ;;  %s6132_s12 = smov 8   ;;  %s4103_s11 = int_to_ptr.hbm [resolvable:$true] %s4102_s11 }
  0x19   :  { %v5717_v32 = vld [vmem:[%s7476_s3 + $0x100] sm:$0xff]  ;;  %v5742_v33 = vld [vmem:[%s7476_s3 + $0x78] sm:$0xff]  ;;  %v5757_v35 = vld [vmem:[%s7476_s3 + $0x270] sm:$0xff] }
  0x1a   :  { %311 = vmatpush.bf16.msra.mxu3 %v5726_v26  ;;  %v5750_v34 = vld [vmem:[%s7476_s3 + $0x178] sm:$0xff]  ;;  %v5756_v36 = vld [vmem:[%s7476_s3 + $0x268] sm:$0xff]  ;;  %v5755_v37 = vld [vmem:[%s7476_s3 + $0x260] sm:$0xff] }
  0x1b   :  { %149 = vmatpush.bf16.msra.mxu1 %v5710_v27  ;;  %v5754_v38 = vld [vmem:[%s7476_s3 + $0x258] sm:$0xff]  ;;  %v5741_v39 = vld [vmem:[%s7476_s3 + $0x70] sm:$0xff]  ;;  %v5740_v42 = vld [vmem:[%s7476_s3 + $0x68] sm:$0xff] }
  0x1c   :  { %230 = vmatpush.bf16.msra.mxu2 %v5718_v28  ;;  %v5749_v40 = vld [vmem:[%s7476_s3 + $0x170] sm:$0xff]  ;;  %v5748_v43 = vld [vmem:[%s7476_s3 + $0x168] sm:$0xff]  ;;  %v5739_v45 = vld [vmem:[%s7476_s3 + $0x60] sm:$0xff] }
  0x1d   :  { %v5753_v41 = vld [vmem:[%s7476_s3 + $0x250] sm:$0xff]  ;;  %v5752_v44 = vld [vmem:[%s7476_s3 + $0x248] sm:$0xff]  ;;  %v5747_v46 = vld [vmem:[%s7476_s3 + $0x160] sm:$0xff] }
  0x1e   :  { %312 = vmatpush.bf16.msra.mxu3 %v5725_v29  ;;  %v5751_v47 = vld [vmem:[%s7476_s3 + $0x240] sm:$0xff]  ;;  %v5738_v48 = vld [vmem:[%s7476_s3 + $0x58] sm:$0xff]  ;;  %v5737_v50 = vld [vmem:[%s7476_s3 + $0x50] sm:$0xff] }
  0x1f   :  { %150 = vmatpush.bf16.msra.mxu1 %v5709_v31  ;;  %v5746_v49 = vld [vmem:[%s7476_s3 + $0x158] sm:$0xff]  ;;  %v5745_v51 = vld [vmem:[%s7476_s3 + $0x150] sm:$0xff]  ;;  %v5736_v52 = vld [vmem:[%s7476_s3 + $0x48] sm:$0xff] }
  0x20   :  { %231 = vmatpush.bf16.msra.mxu2 %v5717_v32  ;;  %v5744_v53 = vld [vmem:[%s7476_s3 + $0x148] sm:$0xff]  ;;  %v5735_v54 = vld [vmem:[%s7476_s3 + $0x40] sm:$0xff]  ;;  %v5768_v63 = vld [vmem:[%s7476_s3 + $0xb8] sm:$0xff] }
  0x21   :  { %v5743_v55 = vld [vmem:[%s7476_s3 + $0x140] sm:$0xff]  ;;  %v44_v58 = vld [vmem:[%s7475_s2 + $0x8] sm:$0xff]  ;;  %v5767_v0 = vld [vmem:[%s7476_s3 + $0xb0] sm:$0xff] }
  0x22   :  { %675 = vmatpush.bf16.msrb.mxu3 %v5758_v30  ;;  %v43_v57 = vld [vmem:[%s7475_s2] sm:$0xff]  ;;  %v5766_v1 = vld [vmem:[%s7476_s3 + $0xa8] sm:$0xff]  ;;  %v5764_v3 = vld [vmem:[%s7476_s3 + $0x98] sm:$0xff] }
  0x23   :  { %513 = vmatpush.bf16.msrb.mxu1 %v5742_v33  ;;  %v5765_v2 = vld [vmem:[%s7476_s3 + $0xa0] sm:$0xff]  ;;  %v5763_v4 = vld [vmem:[%s7476_s3 + $0x90] sm:$0xff]  ;;  %v5762_v5 = vld [vmem:[%s7476_s3 + $0x88] sm:$0xff] }
  0x24   :  { %594 = vmatpush.bf16.msrb.mxu2 %v5750_v34  ;;  %v5761_v6 = vld [vmem:[%s7476_s3 + $0x80] sm:$0xff]  ;;  %v5987_v8 = vld [vmem:[%s7477_s4 + $0x8] ss:$0 sm:$0xff] }
  0x25   :  { %v5986_v7 = vld [vmem:[%s7477_s4 + $0x4] ss:$0 sm:$0xff]  ;;  %v5985_v9 = vld [vmem:[%s7477_s4] ss:$0 sm:$0xff]  ;;  %v5989_v31 = vld [vmem:[%s7477_s4 + $0x5] ss:$0 sm:$0xff] }
  0x26   :  { %676 = vmatpush.bf16.msrb.mxu3 %v5757_v35 }
  0x27   :  { %514 = vmatpush.bf16.msrb.mxu1 %v5741_v39 }
  0x28   :  { %595 = vmatpush.bf16.msrb.mxu2 %v5749_v40 }
  0x2a   :  { %677 = vmatpush.bf16.msrb.mxu3 %v5756_v36 }
  0x2b   :  { %515 = vmatpush.bf16.msrb.mxu1 %v5740_v42 }
  0x2c   :  { %596 = vmatpush.bf16.msrb.mxu2 %v5748_v43  ;;  %v5734_v43 = vld [vmem:[%s7478_s5 + $0x8] sm:$0xff] }
  0x2e   :  { %678 = vmatpush.bf16.msrb.mxu3 %v5755_v37 }
  0x2f   :  { %516 = vmatpush.bf16.msrb.mxu1 %v5739_v45  ;;  %v5990_v45 = vld [vmem:[%s7477_s4 + $0x9] ss:$0 sm:$0xff] }
  0x30   :  { %597 = vmatpush.bf16.msrb.mxu2 %v5747_v46 }
  0x32   :  { %679 = vmatpush.bf16.msrb.mxu3 %v5754_v38 }
  0x33   :  { %517 = vmatpush.bf16.msrb.mxu1 %v5738_v48 }
  0x34   :  { %598 = vmatpush.bf16.msrb.mxu2 %v5746_v49 }
  0x36   :  { %680 = vmatpush.bf16.msrb.mxu3 %v5753_v41 }
  0x37   :  { %518 = vmatpush.bf16.msrb.mxu1 %v5737_v50  ;;  %v5988_v50 = vld [vmem:[%s7477_s4 + $0x1] ss:$0 sm:$0xff] }
  0x38   :  { %599 = vmatpush.bf16.msrb.mxu2 %v5745_v51 }
  0x3a   :  { %681 = vmatpush.bf16.msrb.mxu3 %v5752_v44 }
  0x3b   :  { %519 = vmatpush.bf16.msrb.mxu1 %v5736_v52 }
  0x3c   :  { %600 = vmatpush.bf16.msrb.mxu2 %v5744_v53 }
  0x3e   :  { %682 = vmatpush.bf16.msrb.mxu3 %v5751_v47 }
  0x3f   :  { %520 = vmatpush.bf16.msrb.mxu1 %v5735_v54 }
  0x40   :  { %601 = vmatpush.bf16.msrb.mxu2 %v5743_v55  ;;  %v5733_v55 = vld [vmem:[%s7478_s5] sm:$0xff] }
  0x8b   :  { %v71_v56 = vpop.f32.mrf.mxu0 }
  0x8c   :  { %v6350_v60 = vadd.f32 %v71_v56, %v43_v57 }
  0x93   :  { %v73_v59 = vpop.f32.mrf.mxu0 }
  0x94   :  { %v6352_v61 = vadd.f32 %v73_v59, %v44_v58 }
  0x96   :  { %v6356_v62 = vpack.c.bf16 %v6352_v61, %v6350_v60 }
  0x98   :  { %151 = vmatmul.bf16.vlgmr.msra.gmra.mxu1 %v6356_v62  ;;  %232 = vmatmul.bf16.vlgmr.msra.gmra.mxu2 %v6356_v62 }
  0x99   :  { %313 = vmatmul.bf16.vlgmr.msra.gmra.mxu3 %v6356_v62  ;;  %865 = vmatpush.bf16.msra.mxu2 %v5734_v43  ;;  %v5788_v43 = vld [vmem:[%s7476_s3 + $0xc8] sm:$0xff] }
  0x9a   :  { %940 = vmatpush.bf16.msra.mxu3 %v5768_v63 }
  0x9d   :  { %866 = vmatpush.bf16.msra.mxu2 %v5733_v55  ;;  %v5800_v55 = vld [vmem:[%s7476_s3 + $0x1e8] sm:$0xff] }
  0x9e   :  { %941 = vmatpush.bf16.msra.mxu3 %v5767_v0 }
  0xa2   :  { %942 = vmatpush.bf16.msra.mxu3 %v5766_v1 }
  0xa6   :  { %943 = vmatpush.bf16.msra.mxu3 %v5765_v2 }
  0xa8   :  { %521 = vmatmul.bf16.vlgmr.msrb.gmra.mxu1 %v6356_v62  ;;  %602 = vmatmul.bf16.vlgmr.msrb.gmra.mxu2 %v6356_v62 }
  0xa9   :  { %683 = vmatmul.bf16.vlgmr.msrb.gmra.mxu3 %v6356_v62 }
  0xaa   :  { %944 = vmatpush.bf16.msra.mxu3 %v5764_v3 }
  0xae   :  { %945 = vmatpush.bf16.msra.mxu3 %v5763_v4 }
  0xb2   :  { %946 = vmatpush.bf16.msra.mxu3 %v5762_v5 }
  0xb6   :  { %947 = vmatpush.bf16.msra.mxu3 %v5761_v6 }
  0xb9   :  { %948 = vmatmul.bf16.vlgmr.msra.gmra.mxu3 %v6356_v62 }
 0x115   :  { %v152_v11 = vpop.f32.mrf.mxu1 }
 0x116   :  { %v153_v15 = vadd.f32 %v5985_v9, %v152_v11 }
 0x11b   :  { %v233_v10 = vpop.f32.mrf.mxu2 }
 0x11c   :  { %v234_v12 = vadd.f32 %v5986_v7, %v233_v10  ;;  %v314_v13 = vpop.f32.mrf.mxu3 }
 0x11d   :  { %v315_v14 = vadd.f32 %v5987_v8, %v314_v13  ;;  %v154_v30 = vpop.f32.mrf.mxu1 }
 0x11e   :  { %4247 = vmatpush.xpose.msk.msrb.mxu0 %vm319_vm2, %v234_v12  ;;  %v155_v33 = vadd.f32 %v5985_v9, %v154_v30 }
 0x121   :  { %4248 = vmatmul.msk.f32.vlgmr.msrb.gmra.mxu0 %vm319_vm2, %v153_v15  ;;  %v5775_v15 = vld [vmem:[%s7476_s3 + $0x1b0] sm:$0xff] }
 0x122   :  { %376 = vmatpush.msra.mxu0 %v315_v14  ;;  %v5776_v14 = vld [vmem:[%s7476_s3 + $0x1b8] sm:$0xff] }
 0x123   :  { %v235_v16 = vpop.f32.mrf.mxu2 }
 0x124   :  { %v236_v17 = vadd.f32 %v5986_v7, %v235_v16  ;;  %v316_v26 = vpop.f32.mrf.mxu3  ;;  %v5774_v16 = vld [vmem:[%s7476_s3 + $0x1a8] sm:$0xff] }
 0x125   :  { %v317_v29 = vadd.f32 %v5987_v8, %v316_v26  ;;  %v522_v51 = vpop.f32.mrf.mxu1  ;;  %v5769_v26 = vld [vmem:[%s7476_s3 + $0x180] sm:$0xff] }
 0x126   :  { %4250 = vmatpush.xpose.msk.msrb.mxu0 %vm319_vm2, %v236_v17  ;;  %v523_v53 = vadd.f32 %v5988_v50, %v522_v51  ;;  %v5773_v17 = vld [vmem:[%s7476_s3 + $0x1a0] sm:$0xff]  ;;  %v5801_v51 = vld [vmem:[%s7476_s3 + $0x1f0] sm:$0xff] }
 0x12b   :  { %v603_v32 = vpop.f32.mrf.mxu2 }
 0x12c   :  { %v604_v34 = vadd.f32 %v5989_v31, %v603_v32  ;;  %v684_v46 = vpop.f32.mrf.mxu3  ;;  %v5793_v32 = vld [vmem:[%s7476_s3 + $0xf0] sm:$0xff] }
 0x12d   :  { %v685_v49 = vadd.f32 %v5990_v45, %v684_v46  ;;  %v524_v9 = vpop.f32.mrf.mxu1  ;;  %v5778_v46 = vld [vmem:[%s7476_s3 + $0x288] sm:$0xff] }
 0x12e   :  { %v525_v10 = vadd.f32 %v5988_v50, %v524_v9 }
 0x133   :  { %v605_v52 = vpop.f32.mrf.mxu2 }
 0x134   :  { %v606_v54 = vadd.f32 %v5989_v31, %v605_v52  ;;  %v686_v5 = vpop.f32.mrf.mxu3  ;;  %v5760_v31 = vld [vmem:[%s7478_s5 + $0x18] sm:$0xff]  ;;  %v5992_v52 = vld [vmem:[%s7477_s4 + $0x6] ss:$0 sm:$0xff] }
 0x135   :  { %v687_v8 = vadd.f32 %v5990_v45, %v686_v5  ;;  %836 = vmatpush.bf16.msra.mxu1 %v5760_v31  ;;  %v5787_v45 = vld [vmem:[%s7476_s3 + $0xc0] sm:$0xff] }
 0x19e   :  { %v343_v18 = vpop.f32.mrf.mxu0 }
 0x19f   :  { %v347_v19 = vsel %vm346_vm3, %v343_v18, -inf }
 0x1a0   :  { %348 = vmax.xlane.f32.xlu0 %v347_v19 }
 0x213   :  { %v349_v20 = vpop.xlane.xlu0 %348 }
 0x214   :  { %v350_v21 = vsub.f32 %v343_v18, %v349_v20  ;;  %v5772_v18 = vld [vmem:[%s7476_s3 + $0x198] sm:$0xff] }
 0x216   :  { %v351_v22 = vmul.f32 1.442695, %v350_v21 }
 0x218   :  { %6021 = vpow2.f32 %v351_v22 }
 0x21e   :  { %v6022_v23 = vpop.eup %6021 }
 0x21f   :  { %v353_v24 = vsel %vm346_vm3, %v6022_v23, 0.0 }
 0x220   :  { %354 = vadd.xlane.f32.xlu0 %v353_v24  ;;  %v5771_v24 = vld [vmem:[%s7476_s3 + $0x190] sm:$0xff] }
 0x293   :  { %v355_v25 = vpop.xlane.xlu0 %354 }
 0x294   :  { %6023 = vrcp.f32 %v355_v25  ;;  %v5770_v25 = vld [vmem:[%s7476_s3 + $0x188] sm:$0xff] }
 0x29a   :  { %v6024_v27 = vpop.eup %6023 }
 0x29b   :  { %v357_v28 = vmul.f32 %v6024_v27, %v6022_v23 }
 0x29d   :  { %4249 = vmatmul.msk.f32.vlgmr.msra.gmra.mxu0 %vm346_vm3, %v357_v28 }
 0x29e   :  { %436 = vmatpush.msra.mxu0 %v317_v29  ;;  %v5794_v29 = vld [vmem:[%s7476_s3 + $0xf8] sm:$0xff] }
 0x2a5   :  { %4251 = vmatmul.msk.f32.vlgmr.msrb.gmra.mxu0 %vm319_vm2, %v155_v33  ;;  %v5759_v33 = vld [vmem:[%s7478_s5 + $0x10] sm:$0xff] }
 0x2a6   :  { %4397 = vmatpush.xpose.msk.msrb.mxu0 %vm319_vm2, %v604_v34  ;;  %v5784_v34 = vld [vmem:[%s7476_s3 + $0x2b8] sm:$0xff]  ;;  %837 = vmatpush.bf16.msra.mxu1 %v5759_v33 }
 0x2aa   :  { %1102 = vmatpush.bf16.msrb.mxu1 %v5784_v34  ;;  %v5810_v34 = vld [vmem:[%s7476_s3 + $0x2f8] sm:$0xff] }
 0x31a   :  { %v378_v35 = vpop.f32.mrf.mxu0 }
 0x322   :  { %v404_v36 = vpop.f32.mrf.mxu0 }
 0x323   :  { %v407_v37 = vsel %vm346_vm3, %v404_v36, -inf }
 0x324   :  { %408 = vmax.xlane.f32.xlu1 %v407_v37  ;;  %v5791_v37 = vld [vmem:[%s7476_s3 + $0xe0] sm:$0xff] }
 0x397   :  { %v409_v38 = vpop.xlane.xlu1 %408 }
 0x398   :  { %v410_v39 = vsub.f32 %v404_v36, %v409_v38  ;;  %v5783_v36 = vld [vmem:[%s7476_s3 + $0x2b0] sm:$0xff]  ;;  %v5782_v38 = vld [vmem:[%s7476_s3 + $0x2a8] sm:$0xff] }
 0x399   :  { %1103 = vmatpush.bf16.msrb.mxu1 %v5783_v36  ;;  %v5808_v36 = vld [vmem:[%s7476_s3 + $0x2e8] sm:$0xff] }
 0x39a   :  { %v411_v40 = vmul.f32 1.442695, %v410_v39  ;;  %v5790_v39 = vld [vmem:[%s7476_s3 + $0xd8] sm:$0xff] }
 0x39c   :  { %6025 = vpow2.f32 %v411_v40  ;;  %v5781_v40 = vld [vmem:[%s7476_s3 + $0x2a0] sm:$0xff] }
 0x39d   :  { %1104 = vmatpush.bf16.msrb.mxu1 %v5782_v38 }
 0x3a1   :  { %1105 = vmatpush.bf16.msrb.mxu1 %v5781_v40 }
 0x3a2   :  { %v6026_v41 = vpop.eup %6025 }
 0x3a3   :  { %v413_v42 = vsel %vm346_vm3, %v6026_v41, 0.0 }
 0x3a4   :  { %414 = vadd.xlane.f32.xlu1 %v413_v42  ;;  %v5780_v42 = vld [vmem:[%s7476_s3 + $0x298] sm:$0xff] }
 0x3a5   :  { %1106 = vmatpush.bf16.msrb.mxu1 %v5780_v42 }
 0x417   :  { %v415_v44 = vpop.xlane.xlu1 %414 }
 0x418   :  { %6027 = vrcp.f32 %v415_v44  ;;  %v5779_v44 = vld [vmem:[%s7476_s3 + $0x290] sm:$0xff] }
 0x419   :  { %1107 = vmatpush.bf16.msrb.mxu1 %v5779_v44  ;;  %v5805_v44 = vld [vmem:[%s7476_s3 + $0x2d0] sm:$0xff] }
 0x41d   :  { %1108 = vmatpush.bf16.msrb.mxu1 %v5778_v46  ;;  %v5803_v46 = vld [vmem:[%s7476_s3 + $0x2c0] sm:$0xff] }
 0x41e   :  { %v6028_v47 = vpop.eup %6027 }
 0x41f   :  { %v417_v48 = vmul.f32 %v6028_v47, %v6026_v41  ;;  %v5789_v41 = vld [vmem:[%s7476_s3 + $0xd0] sm:$0xff]  ;;  %v5777_v47 = vld [vmem:[%s7476_s3 + $0x280] sm:$0xff] }
 0x421   :  { %4252 = vmatmul.msk.f32.vlgmr.msra.gmra.mxu0 %vm346_vm3, %v417_v48  ;;  %1109 = vmatpush.bf16.msrb.mxu1 %v5777_v47 }
 0x422   :  { %744 = vmatpush.msra.mxu0 %v685_v49  ;;  %v5802_v49 = vld [vmem:[%s7476_s3 + $0x1f8] sm:$0xff] }
 0x429   :  { %4398 = vmatmul.msk.f32.vlgmr.msrb.gmra.mxu0 %vm319_vm2, %v523_v53  ;;  %v5991_v53 = vld [vmem:[%s7477_s4 + $0x2] ss:$0 sm:$0xff] }
 0x42a   :  { %4400 = vmatpush.xpose.msk.msrb.mxu0 %vm319_vm2, %v606_v54 }
 0x49e   :  { %v438_v56 = vpop.f32.mrf.mxu0 }
 0x49f   :  { %v441_v57 = vpack.c.bf16 %v438_v56, %v378_v35  ;;  %v5792_v35 = vld [vmem:[%s7476_s3 + $0xe8] sm:$0xff]  ;;  %v949_v56 = vpop.f32.mrf.mxu3 }
 0x4a1   :  { %4424 = vmatmul.msk.bf16.vlgmr.msra.gmra.mxu2 %vm319_vm2, %v441_v57 }
 0x4a6   :  { %v712_v58 = vpop.f32.mrf.mxu0 }
 0x4a7   :  { %v715_v59 = vsel %vm346_vm3, %v712_v58, -inf }
 0x4a8   :  { %716 = vmax.xlane.f32.xlu2 %v715_v59  ;;  %v5799_v59 = vld [vmem:[%s7476_s3 + $0x1e0] sm:$0xff] }
 0x51b   :  { %v717_v63 = vpop.xlane.xlu2 %716 }
 0x51c   :  { %v718_v0 = vsub.f32 %v712_v58, %v717_v63  ;;  %v950_v58 = vadd.f32 %v5991_v53, %v949_v56  ;;  %v5798_v63 = vld [vmem:[%s7476_s3 + $0x1d8] sm:$0xff] }
 0x51e   :  { %v719_v1 = vmul.f32 1.442695, %v718_v0  ;;  %v5797_v0 = vld [vmem:[%s7476_s3 + $0x1d0] sm:$0xff] }
 0x520   :  { %6029 = vpow2.f32 %v719_v1  ;;  %v5796_v1 = vld [vmem:[%s7476_s3 + $0x1c8] sm:$0xff] }
 0x526   :  { %v6030_v2 = vpop.eup %6029 }
 0x527   :  { %v721_v3 = vsel %vm346_vm3, %v6030_v2, 0.0 }
 0x528   :  { %722 = vadd.xlane.f32.xlu2 %v721_v3  ;;  %v6552_v3 = vpop.f32.mrf.mxu2 }
 0x59b   :  { %v723_v4 = vpop.xlane.xlu2 %722 }
 0x59c   :  { %6031 = vrcp.f32 %v723_v4 }
 0x5a2   :  { %v6032_v6 = vpop.eup %6031 }
 0x5a3   :  { %v725_v7 = vmul.f32 %v6032_v6, %v6030_v2  ;;  %v5795_v2 = vld [vmem:[%s7476_s3 + $0x1c0] sm:$0xff]  ;;  %v6558_v6 = vpop.f32.mrf.mxu2 }
 0x5a5   :  { %4399 = vmatmul.msk.f32.vlgmr.msra.gmra.mxu0 %vm346_vm3, %v725_v7  ;;  %v5994_v7 = vld [vmem:[%s7477_s4 + $0xa] ss:$0 sm:$0xff] }
 0x5a6   :  { %804 = vmatpush.msra.mxu0 %v687_v8 }
 0x5ad   :  { %4401 = vmatmul.msk.f32.vlgmr.msrb.gmra.mxu0 %vm319_vm2, %v525_v10 }
 0x5ae   :  { %1021 = vmatpush.bf16.msrb.mxu0 %v5776_v14 }
 0x5b2   :  { %1022 = vmatpush.bf16.msrb.mxu0 %v5775_v15 }
 0x5b6   :  { %1023 = vmatpush.bf16.msrb.mxu0 %v5774_v16 }
 0x5ba   :  { %1024 = vmatpush.bf16.msrb.mxu0 %v5773_v17 }
 0x5be   :  { %1025 = vmatpush.bf16.msrb.mxu0 %v5772_v18 }
 0x5c2   :  { %1026 = vmatpush.bf16.msrb.mxu0 %v5771_v24 }
 0x5c6   :  { %1027 = vmatpush.bf16.msrb.mxu0 %v5770_v25  ;;  %v5785_v25 = vld [vmem:[%s7478_s5 + $0x20] sm:$0xff] }
 0x5ca   :  { %1028 = vmatpush.bf16.msrb.mxu0 %v5769_v26  ;;  %v951_v26 = vpop.f32.mrf.mxu3 }
 0x622   :  { %v6431_v11 = vpop.f32.mrf.mxu0 }
 0x62a   :  { %v772_v12 = vpop.f32.mrf.mxu0 }
 0x62b   :  { %v775_v13 = vsel %vm346_vm3, %v772_v12, -inf }
 0x62c   :  { %776 = vmax.xlane.f32.xlu0 %v775_v13 }
 0x69f   :  { %v777_v19 = vpop.xlane.xlu0 %776 }
 0x6a0   :  { %v778_v20 = vsub.f32 %v772_v12, %v777_v19 }
 0x6a2   :  { %v779_v21 = vmul.f32 1.442695, %v778_v20 }
 0x6a4   :  { %6033 = vpow2.f32 %v779_v21 }
 0x6aa   :  { %v6034_v22 = vpop.eup %6033 }
 0x6ab   :  { %v781_v23 = vsel %vm346_vm3, %v6034_v22, 0.0 }
 0x6ac   :  { %782 = vadd.xlane.f32.xlu1 %v781_v23  ;;  %v5786_v23 = vld [vmem:[%s7478_s5 + $0x28] sm:$0xff] }
 0x71f   :  { %v783_v27 = vpop.xlane.xlu1 %782 }
 0x720   :  { %6035 = vrcp.f32 %v783_v27  ;;  %v5995_v27 = vld [vmem:[%s7477_s4 + $0x7] ss:$0 sm:$0xff] }
 0x726   :  { %v6036_v28 = vpop.eup %6035 }
 0x727   :  { %v785_v30 = vmul.f32 %v6036_v28, %v6034_v22 }
 0x729   :  { %4402 = vmatmul.msk.f32.vlgmr.msra.gmra.mxu0 %vm346_vm3, %v785_v30 }
 0x72a   :  { %1340 = vmatpush.bf16.msra.mxu0 %v5794_v29  ;;  %v952_v29 = vadd.f32 %v5991_v53, %v951_v26  ;;  %v5812_v26 = vld [vmem:[%s7478_s5 + $0x38] sm:$0xff] }
 0x72e   :  { %1341 = vmatpush.bf16.msra.mxu0 %v5793_v32 }
 0x731   :  { %1029 = vmatmul.bf16.vlgmr.msrb.gmra.mxu0 %v6356_v62 }
 0x732   :  { %1342 = vmatpush.bf16.msra.mxu0 %v5792_v35  ;;  %v5809_v35 = vld [vmem:[%s7476_s3 + $0x2f0] sm:$0xff] }
 0x736   :  { %1343 = vmatpush.bf16.msra.mxu0 %v5791_v37  ;;  %v5807_v37 = vld [vmem:[%s7476_s3 + $0x2e0] sm:$0xff] }
 0x73a   :  { %1344 = vmatpush.bf16.msra.mxu0 %v5790_v39 }
 0x73e   :  { %1345 = vmatpush.bf16.msra.mxu0 %v5789_v41 }
 0x742   :  { %1346 = vmatpush.bf16.msra.mxu0 %v5788_v43  ;;  %v5806_v43 = vld [vmem:[%s7476_s3 + $0x2d8] sm:$0xff] }
 0x746   :  { %1347 = vmatpush.bf16.msra.mxu0 %v5787_v45  ;;  %v5804_v45 = vld [vmem:[%s7476_s3 + $0x2c8] sm:$0xff] }
 0x749   :  { %1348 = vmatmul.bf16.vlgmr.msra.gmra.mxu0 %v6356_v62 }
 0x7a6   :  { %v806_v48 = vpop.f32.mrf.mxu0 }
 0x7a7   :  { %v809_v50 = vpack.c.bf16 %v806_v48, %v6431_v11 }
 0x7a9   :  { %4415 = vmatmul.msk.bf16.vlgmr.msra.gmra.mxu1 %vm319_vm2, %v809_v50 }
 0x7aa   :  { %1421 = vmatpush.bf16.msra.mxu1 %v5802_v49 }
 0x7ae   :  { %v1030_v54 = vpop.f32.mrf.mxu0  ;;  %1422 = vmatpush.bf16.msra.mxu1 %v5801_v51 }
 0x7af   :  { %v1031_v57 = vadd.f32 %v5992_v52, %v1030_v54 }
 0x7b1   :  { %4569 = vmatpush.xpose.msk.msrb.mxu2 %vm319_vm2, %v1031_v57 }
 0x7b2   :  { %1423 = vmatpush.bf16.msra.mxu1 %v5800_v55  ;;  %v5993_v55 = vld [vmem:[%s7477_s4 + $0x3] ss:$0 sm:$0xff] }
 0x7b4   :  { %4570 = vmatmul.msk.f32.vlgmr.msrb.gmra.mxu2 %vm319_vm2, %v950_v58 }
 0x7b6   :  { %1424 = vmatpush.bf16.msra.mxu1 %v5799_v59  ;;  %v1032_v8 = vpop.f32.mrf.mxu0 }
 0x7b7   :  { %v1033_v12 = vadd.f32 %v5992_v52, %v1032_v8  ;;  %v5996_v52 = vld [vmem:[%s7477_s4 + $0xb] ss:$0 sm:$0xff] }
 0x7b9   :  { %1110 = vmatmul.bf16.vlgmr.msrb.gmra.mxu1 %v6356_v62 }
 0x7ba   :  { %1425 = vmatpush.bf16.msra.mxu1 %v5798_v63 }
 0x7be   :  { %1426 = vmatpush.bf16.msra.mxu1 %v5797_v0 }
 0x7c2   :  { %1427 = vmatpush.bf16.msra.mxu1 %v5796_v1 }
 0x7c6   :  { %1428 = vmatpush.bf16.msra.mxu1 %v5795_v2  ;;  %v1349_v56 = vpop.f32.mrf.mxu0 }
 0x7c7   :  { %v1350_v59 = vadd.f32 %v5993_v55, %v1349_v56 }
 0x7c9   :  { %1429 = vmatmul.bf16.vlgmr.msra.gmra.mxu1 %v6356_v62 }
 0x7ca   :  { %1663 = vmatpush.bf16.msrb.mxu1 %v5812_v26  ;;  %v4761_v26 = vld [vmem:[%s7480_s7 + $0x10] sm:$0xf] }
 0x826   :  { %v6554_v4 = vpop.f32.mrf.mxu1 }
 0x827   :  { %v869_v0 = vadd.f32 %v6552_v3, %v6554_v4 }
 0x82e   :  { %v6556_v5 = vpop.f32.mrf.mxu1 }
 0x836   :  { %v1111_v9 = vpop.f32.mrf.mxu1 }
 0x837   :  { %v1112_v10 = vadd.f32 %v5994_v7, %v1111_v9  ;;  %v1139_v11 = vpop.f32.mrf.mxu2 }
 0x838   :  { %v1142_v13 = vsel %vm346_vm3, %v1139_v11, -inf }
 0x839   :  { %1171 = vmatpush.msra.mxu2 %v1112_v10  ;;  %1143 = vmax.xlane.f32.xlu2 %v1142_v13 }
 0x83b   :  { %4572 = vmatpush.xpose.msk.msrb.mxu2 %vm319_vm2, %v1033_v12 }
 0x83e   :  { %v1113_v14 = vpop.f32.mrf.mxu1 }
 0x83f   :  { %v1114_v15 = vadd.f32 %v5994_v7, %v1113_v14  ;;  %v871_v7 = vadd.f32 %v6558_v6, %v6556_v5  ;;  %v1351_v5 = vpop.f32.mrf.mxu0 }
 0x840   :  { %v1352_v6 = vadd.f32 %v5993_v55, %v1351_v5  ;;  %v4803_v55 = vld [vmem:[%s7480_s7 + $0x68] sm:$0xf0] }
 0x841   :  { %1231 = vmatpush.msrb.mxu3 %v1114_v15 }
 0x843   :  { %1502 = vmatpush.bf16.msra.mxu3 %v5810_v34 }
 0x846   :  { %v1430_v28 = vpop.f32.mrf.mxu1 }
 0x847   :  { %v1431_v30 = vadd.f32 %v5995_v27, %v1430_v28  ;;  %1503 = vmatpush.bf16.msra.mxu3 %v5809_v35 }
 0x84b   :  { %1504 = vmatpush.bf16.msra.mxu3 %v5808_v36 }
 0x84e   :  { %v1432_v57 = vpop.f32.mrf.mxu1 }
 0x84f   :  { %1505 = vmatpush.bf16.msra.mxu3 %v5807_v37  ;;  %v1433_v63 = vadd.f32 %v5995_v27, %v1432_v57 }
 0x853   :  { %1506 = vmatpush.bf16.msra.mxu3 %v5806_v43 }
 0x857   :  { %1507 = vmatpush.bf16.msra.mxu3 %v5805_v44 }
 0x85b   :  { %1508 = vmatpush.bf16.msra.mxu3 %v5804_v45  ;;  %v4809_v45 = vld [vmem:[%s7480_s7 + $0x70] sm:$0xf] }
 0x85f   :  { %1509 = vmatpush.bf16.msra.mxu3 %v5803_v46  ;;  %v5828_v46 = vld [vmem:[%s7480_s7 + $0x74] sm:$0xf0] }
 0x8ac   :  { %v1144_v16 = vpop.xlane.xlu2 %1143 }
 0x8ad   :  { %v1145_v17 = vsub.f32 %v1139_v11, %v1144_v16 }
 0x8af   :  { %v1146_v18 = vmul.f32 1.442695, %v1145_v17 }
 0x8b1   :  { %6037 = vpow2.f32 %v1146_v18 }
 0x8b7   :  { %v6038_v19 = vpop.eup %6037 }
 0x8b8   :  { %v1148_v20 = vsel %vm346_vm3, %v6038_v19, 0.0 }
 0x8b9   :  { %1149 = vadd.xlane.f32.xlu0 %v1148_v20 }
 0x92c   :  { %v1150_v21 = vpop.xlane.xlu0 %1149 }
 0x92d   :  { %6039 = vrcp.f32 %v1150_v21 }
 0x933   :  { %v6040_v22 = vpop.eup %6039 }
 0x934   :  { %v1152_v24 = vmul.f32 %v6040_v22, %v6038_v19 }
 0x936   :  { %4571 = vmatmul.msk.f32.vlgmr.msra.gmra.mxu2 %vm346_vm3, %v1152_v24 }
 0x937   :  { %1263 = vmatpush.bf16.msra.mxu2 %v5786_v23 }
 0x93b   :  { %1264 = vmatpush.bf16.msra.mxu2 %v5785_v25 }
 0x93e   :  { %4573 = vmatmul.msk.f32.vlgmr.msrb.gmra.mxu2 %vm319_vm2, %v952_v29 }
 0x93f   :  { %4732 = vmatpush.xpose.msk.msrb.mxu2 %vm319_vm2, %v1431_v30  ;;  %v5811_v30 = vld [vmem:[%s7478_s5 + $0x30] sm:$0xff] }
 0x940   :  { %1664 = vmatpush.bf16.msrb.mxu1 %v5811_v30 }
 0x9b9   :  { %v1173_v31 = vpop.f32.mrf.mxu2 }
 0x9c1   :  { %v1199_v32 = vpop.f32.mrf.mxu2 }
 0x9c2   :  { %v1202_v33 = vsel %vm346_vm3, %v1199_v32, -inf }
 0x9c3   :  { %1203 = vmax.xlane.f32.xlu1 %v1202_v33  ;;  %v5997_v33 = vld [vmem:[%s7479_s6] ss:$0 sm:$0xff] }
 0xa36   :  { %v1204_v38 = vpop.xlane.xlu1 %1203 }
 0xa37   :  { %v1205_v39 = vsub.f32 %v1199_v32, %v1204_v38 }
 0xa39   :  { %v1206_v40 = vmul.f32 1.442695, %v1205_v39 }
 0xa3b   :  { %6041 = vpow2.f32 %v1206_v40 }
 0xa41   :  { %v6042_v41 = vpop.eup %6041 }
 0xa42   :  { %v1208_v42 = vsel %vm346_vm3, %v6042_v41, 0.0 }
 0xa43   :  { %1209 = vadd.xlane.f32.xlu2 %v1208_v42 }
 0xab6   :  { %v1210_v47 = vpop.xlane.xlu2 %1209 }
 0xab7   :  { %6043 = vrcp.f32 %v1210_v47  ;;  %v4810_v47 = vor.u32 %v5828_v46, %v4809_v45 }
 0xabd   :  { %v6044_v48 = vpop.eup %6043 }
 0xabe   :  { %v1212_v49 = vmul.f32 %v6044_v48, %v6042_v41  ;;  %v4811_v48 = vld [vmem:[%s7480_s7 + $0x78] sm:$0xf0] }
 0xac0   :  { %4574 = vmatmul.msk.f32.vlgmr.msrb.gmra.mxu3 %vm346_vm3, %v1212_v49 }
 0xac1   :  { %1841 = vmatpush.bf16.msrb.mxu3 %v4810_v47  ;;  %v5836_v47 = vld [vmem:[%s7482_s9 + $0x38] sm:$0xff] }
 0xac8   :  { %1510 = vmatmul.bf16.vlgmr.msra.gmra.mxu3 %v6356_v62 }
 0xb43   :  { %v1233_v50 = vpop.f32.mrf.mxu3 }
 0xb44   :  { %v1236_v51 = vpack.c.bf16 %v1233_v50, %v1173_v31 }
 0xb46   :  { %4587 = vmatmul.msk.bf16.vlgmr.msra.gmra.mxu2 %vm319_vm2, %v1236_v51  ;;  %v4801_v51 = vld [vmem:[%s7480_s7 + $0x60] sm:$0xf] }
 0xb4b   :  { %v1511_v53 = vpop.f32.mrf.mxu3 }
 0xb4c   :  { %v1512_v54 = vadd.f32 %v5996_v52, %v1511_v53  ;;  %v5825_v53 = vld [vmem:[%s7480_s7 + $0x64] sm:$0xf] }
 0xb4d   :  { %v4806_v56 = vor.u32 %v5825_v53, %v4803_v55  ;;  %v5834_v55 = vld [vmem:[%s7482_s9 + $0x28] sm:$0xff] }
 0xb4e   :  { %1571 = vmatpush.msra.mxu2 %v1512_v54 }
 0xb53   :  { %v1513_v58 = vpop.f32.mrf.mxu3 }
 0xb54   :  { %v1514_v62 = vadd.f32 %v5996_v52, %v1513_v58  ;;  %v5826_v52 = vld [vmem:[%s7480_s7 + $0x64] sm:$0xf0]  ;;  %v4793_v58 = vld [vmem:[%s7480_s7 + $0x50] sm:$0xf] }
 0xb55   :  { %v4802_v54 = vor.u32 %v5826_v52, %v4801_v51  ;;  %v5843_v51 = vld [vmem:[%s7482_s9 + $0x70] sm:$0xff] }
 0xb56   :  { %4733 = vmatmul.msk.f32.vlgmr.msrb.gmra.mxu2 %vm319_vm2, %v1350_v59  ;;  %1631 = vmatpush.msrb.mxu0 %v1514_v62  ;;  %v5824_v59 = vld [vmem:[%s7480_s7 + $0x54] sm:$0xf0]  ;;  %v5823_v62 = vld [vmem:[%s7480_s7 + $0x54] sm:$0xf] }
 0xb57   :  { %4735 = vmatpush.xpose.msk.msrb.mxu2 %vm319_vm2, %v1433_v63  ;;  %1842 = vmatpush.bf16.msrb.mxu3 %v4802_v54  ;;  %v4794_v63 = vor.u32 %v5824_v59, %v4793_v58  ;;  %v5833_v59 = vld [vmem:[%s7482_s9 + $0x20] sm:$0xff] }
 0xb58   :  { %2005 = vmatpush.bf16.msra.mxu0 %v5836_v47  ;;  %v5866_v47 = vld [vmem:[%s7476_s3 + $0x528] sm:$0xff] }
 0xb5b   :  { %1843 = vmatpush.bf16.msrb.mxu3 %v4794_v63 }
 0xbc9   :  { %v1266_v1 = vpop.f32.mrf.mxu2 }
 0xbca   :  { %v1271_v2 = vadd.f32 %v1266_v1, %v869_v0  ;;  %v4795_v0 = vld [vmem:[%s7480_s7 + $0x58] sm:$0xf0] }
 0xbcb   :  { %v4798_v1 = vor.u32 %v5823_v62, %v4795_v0  ;;  %v5841_v62 = vld [vmem:[%s7482_s9 + $0x60] sm:$0xff] }
 0xbd1   :  { %v1268_v8 = vpop.f32.mrf.mxu2 }
 0xbd2   :  { %v1272_v9 = vadd.f32 %v1268_v8, %v871_v7  ;;  %v4785_v7 = vld [vmem:[%s7480_s7 + $0x40] sm:$0xf]  ;;  %v5822_v8 = vld [vmem:[%s7480_s7 + $0x44] sm:$0xf0] }
 0xbd9   :  { %v1539_v10 = vpop.f32.mrf.mxu2 }
 0xbda   :  { %v1542_v11 = vsel %vm346_vm3, %v1539_v10, -inf }
 0xbdb   :  { %1543 = vmax.xlane.f32.xlu0 %v1542_v11  ;;  %v4787_v11 = vld [vmem:[%s7480_s7 + $0x48] sm:$0xf0] }
 0xc4e   :  { %v1544_v12 = vpop.xlane.xlu0 %1543 }
 0xc4f   :  { %v1545_v13 = vsub.f32 %v1539_v10, %v1544_v12  ;;  %v4786_v10 = vor.u32 %v5822_v8, %v4785_v7 }
 0xc51   :  { %v1546_v14 = vmul.f32 1.442695, %v1545_v13  ;;  %1844 = vmatpush.bf16.msrb.mxu3 %v4786_v10 }
 0xc53   :  { %6045 = vpow2.f32 %v1546_v14  ;;  %v4777_v14 = vld [vmem:[%s7480_s7 + $0x30] sm:$0xf] }
 0xc59   :  { %v6046_v15 = vpop.eup %6045 }
 0xc5a   :  { %v1548_v16 = vsel %vm346_vm3, %v6046_v15, 0.0 }
 0xc5b   :  { %1549 = vadd.xlane.f32.xlu1 %v1548_v16  ;;  %v5819_v16 = vld [vmem:[%s7480_s7 + $0x34] sm:$0xf] }
 0xcce   :  { %v1550_v3 = vpop.xlane.xlu1 %1549 }
 0xccf   :  { %6047 = vrcp.f32 %v1550_v3 }
 0xcd5   :  { %v6048_v4 = vpop.eup %6047 }
 0xcd6   :  { %v1552_v17 = vmul.f32 %v6048_v4, %v6046_v15  ;;  %v5820_v15 = vld [vmem:[%s7480_s7 + $0x34] sm:$0xf0]  ;;  %v4779_v4 = vld [vmem:[%s7480_s7 + $0x38] sm:$0xf0] }
 0xcd7   :  { %v4778_v3 = vor.u32 %v5820_v15, %v4777_v14 }
 0xcd8   :  { %4734 = vmatmul.msk.f32.vlgmr.msra.gmra.mxu2 %vm346_vm3, %v1552_v17  ;;  %v4782_v17 = vor.u32 %v5819_v16, %v4779_v4 }
 0xcd9   :  { %1845 = vmatpush.bf16.msrb.mxu3 %v4778_v3 }
 0xce0   :  { %4736 = vmatmul.msk.f32.vlgmr.msrb.gmra.mxu2 %vm319_vm2, %v1352_v6  ;;  %v4769_v6 = vld [vmem:[%s7480_s7 + $0x20] sm:$0xf] }
 0xd5b   :  { %v1573_v18 = vpop.f32.mrf.mxu2 }
 0xd63   :  { %v1599_v19 = vpop.f32.mrf.mxu2 }
 0xd64   :  { %v1602_v20 = vsel %vm346_vm3, %v1599_v19, -inf }
 0xd65   :  { %1603 = vmax.xlane.f32.xlu2 %v1602_v20 }
 0xdd8   :  { %v1604_v21 = vpop.xlane.xlu2 %1603 }
 0xdd9   :  { %v1605_v22 = vsub.f32 %v1599_v19, %v1604_v21  ;;  %v5817_v19 = vld [vmem:[%s7480_s7 + $0x24] sm:$0xf]  ;;  %v4771_v21 = vld [vmem:[%s7480_s7 + $0x28] sm:$0xf0] }
 0xddb   :  { %v1606_v23 = vmul.f32 1.442695, %v1605_v22 }
 0xddd   :  { %6049 = vpow2.f32 %v1606_v23  ;;  %v4774_v23 = vor.u32 %v5817_v19, %v4771_v21  ;;  %v5831_v21 = vld [vmem:[%s7482_s9 + $0x10] sm:$0xff] }
 0xde3   :  { %v6050_v24 = vpop.eup %6049 }
 0xde4   :  { %v1608_v25 = vsel %vm346_vm3, %v6050_v24, 0.0 }
 0xde5   :  { %1609 = vadd.xlane.f32.xlu0 %v1608_v25 }
 0xe58   :  { %v1610_v27 = vpop.xlane.xlu0 %1609 }
 0xe59   :  { %6051 = vrcp.f32 %v1610_v27  ;;  %v5816_v27 = vld [vmem:[%s7480_s7 + $0x14] sm:$0xf0] }
 0xe5f   :  { %v6052_v28 = vpop.eup %6051 }
 0xe60   :  { %v1612_v29 = vmul.f32 %v6052_v28, %v6050_v24  ;;  %v5815_v28 = vld [vmem:[%s7480_s7 + $0x14] sm:$0xf] }
 0xe62   :  { %4737 = vmatmul.msk.f32.vlgmr.msrb.gmra.mxu0 %vm346_vm3, %v1612_v29 }
 0xedf   :  { %v1633_v31 = vpop.f32.mrf.mxu0 }
 0xee0   :  { %v1636_v32 = vpack.c.bf16 %v1633_v31, %v1573_v18  ;;  %v5818_v18 = vld [vmem:[%s7480_s7 + $0x24] sm:$0xf0]  ;;  %v4762_v31 = vor.u32 %v5816_v27, %v4761_v26  ;;  %v5837_v26 = vld [vmem:[%s7482_s9 + $0x40] sm:$0xff] }
 0xee1   :  { %v4770_v20 = vor.u32 %v5818_v18, %v4769_v6  ;;  %v1755_v27 = vld [vmem:[%s7481_s8] ss:$2 sm:$0x3] }
 0xee2   :  { %4750 = vmatmul.msk.bf16.vlgmr.msrb.gmra.mxu1 %vm319_vm2, %v1636_v32  ;;  %v4763_v32 = vld [vmem:[%s7480_s7 + $0x18] sm:$0xf0] }
 0xee3   :  { %1846 = vmatpush.bf16.msrb.mxu3 %v4770_v20  ;;  %v5832_v20 = vld [vmem:[%s7482_s9 + $0x18] sm:$0xff] }
 0xee7   :  { %1847 = vmatpush.bf16.msrb.mxu3 %v4762_v31  ;;  %v1758_v31 = vperm.slane %v1755_v27, 1 }
 0xf5f   :  { %v1666_v34 = vpop.f32.mrf.mxu1 }
 0xf60   :  { %v1671_v35 = vadd.f32 %v1666_v34, %v1271_v2  ;;  %v5814_v34 = vld [vmem:[%s7480_s7 + $0x4] sm:$0xf0] }
 0xf62   :  { %v1675_v36 = vadd.f32 %v5997_v33, %v1671_v35  ;;  %v4766_v35 = vor.u32 %v5815_v28, %v4763_v32 }
 0xf64   :  { %v6637_v37 = vadd.f32 %v1675_v36, %v6350_v60  ;;  %v6129_v60 = vmov 128.0   ;;  %v5813_v36 = vld [vmem:[%s7480_s7 + $0x4] sm:$0xf] }
 0xf65   :  { %6053 = vrcp.f32 %v6129_v60 }
 0xf66   :  { %1681 = vadd.xlane.f32.xlu1 %v6637_v37  ;;  %v1694_v38 = vmul.f32 %v6637_v37, %v6637_v37 }
 0xf67   :  { %v1668_v39 = vpop.f32.mrf.mxu1 }
 0xf68   :  { %v1672_v40 = vadd.f32 %v1668_v39, %v1272_v9  ;;  %1696 = vadd.xlane.f32.xlu0 %v1694_v38  ;;  %v5821_v9 = vld [vmem:[%s7480_s7 + $0x44] sm:$0xf]  ;;  %v4755_v38 = vld [vmem:[%s7480_s7 + $0x8] sm:$0xf0] }
 0xf69   :  { %v4790_v12 = vor.u32 %v5821_v9, %v4787_v11 }
 0xf6a   :  { %v1676_v41 = vadd.f32 %v5997_v33, %v1672_v40  ;;  %v4753_v33 = vld [vmem:[%s7480_s7] sm:$0xf] }
 0xf6b   :  { %v6054_v44 = vpop.eup %6053  ;;  %v4754_v40 = vor.u32 %v5814_v34, %v4753_v33 }
 0xf6c   :  { %v6643_v42 = vadd.f32 %v1676_v41, %v6352_v61  ;;  %v5827_v61 = vld [vmem:[%s7480_s7 + $0x74] sm:$0xf]  ;;  %v1686_v50 = vmul.f32 128.0, %v6054_v44  ;;  %vm1690_vm4 = vweird.f32 %v6054_v44  ;;  %v4758_v41 = vor.u32 %v5813_v36, %v4755_v38 }
 0xf6d   :  { %v4814_v49 = vor.u32 %v5827_v61, %v4811_v48  ;;  %1848 = vmatpush.bf16.msrb.mxu3 %v4754_v40  ;;  %v5844_v48 = vld [vmem:[%s7482_s9 + $0x78] sm:$0xff] }
 0xf6e   :  { %1683 = vadd.xlane.f32.xlu2 %v6643_v42  ;;  %v1695_v43 = vmul.f32 %v6643_v42, %v6643_v42  ;;  %v1687_v57 = vsub.f32 1.0, %v1686_v50  ;;  %2019 = vmatpush.bf16.msra.mxu1 %v5844_v48  ;;  %v5835_v50 = vld [vmem:[%s7482_s9 + $0x30] sm:$0xff]  ;;  %v5865_v48 = vld [vmem:[%s7476_s3 + $0x520] sm:$0xff] }
 0xf6f   :  { %1855 = vmatpush.bf16.msra.mxu2 %v4814_v49  ;;  %2006 = vmatpush.bf16.msra.mxu0 %v5835_v50 }
 0xf70   :  { %1698 = vadd.xlane.f32.xlu1 %v1695_v43  ;;  %v1688_v2 = vmul.f32 %v6054_v44, %v1687_v57 }
 0xf72   :  { %v1689_v13 = vadd.f32 %v6054_v44, %v1688_v2  ;;  %2020 = vmatpush.bf16.msra.mxu1 %v5843_v51 }
 0xf73   :  { %1856 = vmatpush.bf16.msra.mxu2 %v4806_v56  ;;  %v5842_v56 = vld [vmem:[%s7482_s9 + $0x68] sm:$0xff]  ;;  %2007 = vmatpush.bf16.msra.mxu0 %v5834_v55 }
 0xf74   :  { %v6708_v5 = vsel %vm1690_vm4, %v6054_v44, %v1689_v13  ;;  %v5998_v13 = vld [vmem:[%s7479_s6 + $0x1] ss:$0 sm:$0xff] }
 0xf76   :  { %2021 = vmatpush.bf16.msra.mxu1 %v5842_v56 }
 0xf77   :  { %1857 = vmatpush.bf16.msra.mxu2 %v4798_v1  ;;  %2008 = vmatpush.bf16.msra.mxu0 %v5833_v59 }
 0xf7a   :  { %2022 = vmatpush.bf16.msra.mxu1 %v5841_v62 }
 0xf7b   :  { %1858 = vmatpush.bf16.msra.mxu2 %v4790_v12  ;;  %2009 = vmatpush.bf16.msra.mxu0 %v5832_v20  ;;  %v5878_v20 = vld [vmem:[%s7476_s3 + $0x378] sm:$0xff] }
 0xf7f   :  { %1859 = vmatpush.bf16.msra.mxu2 %v4782_v17  ;;  %v5999_v17 = vld [vmem:[%s7479_s6 + $0x2] ss:$0 sm:$0xff]  ;;  %2010 = vmatpush.bf16.msra.mxu0 %v5831_v21  ;;  %v5847_v21 = vld [vmem:[%s7476_s3 + $0x310] sm:$0xff] }
 0xf83   :  { %1860 = vmatpush.bf16.msra.mxu2 %v4774_v23  ;;  %v5830_v23 = vld [vmem:[%s7482_s9 + $0x8] sm:$0xff] }
 0xf84   :  { %2011 = vmatpush.bf16.msra.mxu0 %v5830_v23 }
 0xf87   :  { %1861 = vmatpush.bf16.msra.mxu2 %v4766_v35 }
 0xf8b   :  { %1862 = vmatpush.bf16.msra.mxu2 %v4758_v41 }
 0xfd9   :  { %v1682_v22 = vpop.xlane.xlu1 %1681 }
 0xfda   :  { %v6723_v24 = vmul.f32 %v6708_v5, %v1682_v22  ;;  %v5839_v22 = vld [vmem:[%s7482_s9 + $0x50] sm:$0xff] }
 0xfdb   :  { %v1697_v25 = vpop.xlane.xlu0 %1696 }
 0xfdc   :  { %v1702_v29 = vmul.f32 %v6723_v24, %v6723_v24  ;;  %v1700_v30 = vmul.f32 %v1697_v25, %v6708_v5  ;;  %v1706_v10 = vsub.f32 %v6637_v37, %v6723_v24  ;;  %v5838_v24 = vld [vmem:[%s7482_s9 + $0x48] sm:$0xff]  ;;  %v5829_v25 = vld [vmem:[%s7482_s9] sm:$0xff] }
 0xfdd   :  { %2012 = vmatpush.bf16.msra.mxu0 %v5829_v25 }
 0xfde   :  { %v1704_v39 = vsub.f32 %v1700_v30, %v1702_v29  ;;  %v1757_v30 = vperm.slane %v1755_v27, 0 }
 0xfe0   :  { %v1708_v43 = vadd.f32 1e-05, %v1704_v39 }
 0xfe1   :  { %v1684_v60 = vpop.xlane.xlu2 %1683 }
 0xfe2   :  { %6055 = vrsqrt.f32 %v1708_v43  ;;  %v1693_v44 = vmul.f32 %v6708_v5, %v1684_v60  ;;  %vm1716_vm6 = vweird.f32 %v1708_v43 }
 0xfe3   :  { %v1699_v45 = vpop.xlane.xlu1 %1698 }
 0xfe4   :  { %v1703_v46 = vmul.f32 %v1693_v44, %v1693_v44  ;;  %v1701_v61 = vmul.f32 %v1699_v45, %v6708_v5  ;;  %v1707_v15 = vsub.f32 %v6643_v42, %v1693_v44  ;;  %v5840_v42 = vld [vmem:[%s7482_s9 + $0x58] sm:$0xff] }
 0xfe5   :  { %2023 = vmatpush.bf16.msra.mxu1 %v5840_v42  ;;  %v5868_v45 = vld [vmem:[%s7476_s3 + $0x538] sm:$0xff] }
 0xfe6   :  { %v1705_v49 = vsub.f32 %v1701_v61, %v1703_v46  ;;  %v5860_v46 = vld [vmem:[%s7476_s3 + $0x438] sm:$0xff]  ;;  %2317 = vmatpush.bf16.msrb.mxu0 %v5868_v45  ;;  %v5867_v61 = vld [vmem:[%s7476_s3 + $0x530] sm:$0xff] }
 0xfe7   :  { %2236 = vmatpush.bf16.msrb.mxu2 %v5860_v46  ;;  %v5882_v42 = vld [vmem:[%s7476_s3 + $0x458] sm:$0xff]  ;;  %v5873_v45 = vld [vmem:[%s7476_s3 + $0x350] sm:$0xff] }
 0xfe8   :  { %v6056_v52 = vpop.eup %6055  ;;  %v1709_v53 = vadd.f32 1e-05, %v1705_v49  ;;  %v6000_v49 = vld [vmem:[%s7479_s6 + $0x5] ss:$0 sm:$0xff] }
 0xfe9   :  { %v1711_v54 = vmul.f32 %v6056_v52, %v1708_v43  ;;  %vm1717_vm5 = vweird.f32 %v6056_v52  ;;  %2024 = vmatpush.bf16.msra.mxu1 %v5839_v22  ;;  %v5877_v22 = vld [vmem:[%s7476_s3 + $0x370] sm:$0xff] }
 0xfea   :  { %6057 = vrsqrt.f32 %v1709_v53  ;;  %vm1718_vm7 = vmor %vm1716_vm6, %vm1717_vm5  ;;  %vm1726_vm9 = vweird.f32 %v1709_v53  ;;  %2318 = vmatpush.bf16.msrb.mxu0 %v5867_v61 }
 0xfeb   :  { %v1712_v57 = vmul.f32 %v6056_v52, %v1711_v54 }
 0xfed   :  { %v1713_v58 = vmul.f32 0.5, %v1712_v57  ;;  %2025 = vmatpush.bf16.msra.mxu1 %v5838_v24 }
 0xfee   :  { %2319 = vmatpush.bf16.msrb.mxu0 %v5866_v47 }
 0xfef   :  { %v1714_v63 = vsub.f32 1.5, %v1713_v58 }
 0xff0   :  { %v6058_v0 = vpop.eup %6057 }
 0xff1   :  { %v1715_v1 = vmul.f32 %v6056_v52, %v1714_v63  ;;  %v1721_v2 = vmul.f32 %v6058_v0, %v1709_v53  ;;  %vm1727_vm8 = vweird.f32 %v6058_v0  ;;  %2026 = vmatpush.bf16.msra.mxu1 %v5837_v26  ;;  %v5881_v26 = vld [vmem:[%s7476_s3 + $0x450] sm:$0xff] }
 0xff2   :  { %vm1728_vm10 = vmor %vm1726_vm9, %vm1727_vm8  ;;  %2320 = vmatpush.bf16.msrb.mxu0 %v5865_v48  ;;  %v5872_v48 = vld [vmem:[%s7476_s3 + $0x348] sm:$0xff] }
 0xff3   :  { %v1722_v7 = vmul.f32 %v6058_v0, %v1721_v2  ;;  %v1719_v8 = vsel %vm1718_vm7, %v6056_v52, %v1715_v1  ;;  %v5859_v1 = vld [vmem:[%s7476_s3 + $0x430] sm:$0xff] }
 0xff4   :  { %v1730_v12 = vmul.f32 %v1719_v8, %v1706_v10  ;;  %2237 = vmatpush.bf16.msrb.mxu2 %v5859_v1  ;;  %v5863_v2 = vld [vmem:[%s7476_s3 + $0x510] sm:$0xff]  ;;  %v5862_v8 = vld [vmem:[%s7476_s3 + $0x508] sm:$0xff]  ;;  %v5852_v10 = vld [vmem:[%s7476_s3 + $0x338] sm:$0xff] }
 0xff5   :  { %v1723_v9 = vmul.f32 0.5, %v1722_v7  ;;  %v5858_v7 = vld [vmem:[%s7476_s3 + $0x428] sm:$0xff]  ;;  %2155 = vmatpush.bf16.msra.mxu3 %v5852_v10  ;;  %v6001_v1 = vld [vmem:[%s7479_s6 + $0x3] ss:$0 sm:$0xff]  ;;  %v6002_v10 = vld [vmem:[%s7479_s6 + $0x4] ss:$0 sm:$0xff] }
 0xff6   :  { %v1733_v4 = vmul.f32 %v5998_v13, %v1730_v12  ;;  %v5856_v12 = vld [vmem:[%s7476_s3 + $0x418] sm:$0xff] }
 0xff7   :  { %v1724_v11 = vsub.f32 1.5, %v1723_v9  ;;  %v5857_v9 = vld [vmem:[%s7476_s3 + $0x420] sm:$0xff] }
 0xff8   :  { %v1736_v6 = vadd.f32 %v5999_v17, %v1733_v4  ;;  %2238 = vmatpush.bf16.msrb.mxu2 %v5858_v7  ;;  %v5854_v4 = vld [vmem:[%s7476_s3 + $0x408] sm:$0xff] }
 0xff9   :  { %v1725_v14 = vmul.f32 %v6058_v0, %v1724_v11  ;;  %v5861_v11 = vld [vmem:[%s7476_s3 + $0x500] sm:$0xff] }
 0xffb   :  { %v1729_v16 = vsel %vm1728_vm10, %v6058_v0, %v1725_v14  ;;  %v5864_v0 = vld [vmem:[%s7476_s3 + $0x518] sm:$0xff]  ;;  %v5851_v14 = vld [vmem:[%s7476_s3 + $0x330] sm:$0xff] }
 0xffc   :  { %v1731_v3 = vmul.f32 %v1729_v16, %v1707_v15  ;;  %2321 = vmatpush.bf16.msrb.mxu0 %v5864_v0  ;;  %2239 = vmatpush.bf16.msrb.mxu2 %v5857_v9  ;;  %v5855_v15 = vld [vmem:[%s7476_s3 + $0x410] sm:$0xff] }
 0xffd   :  { %2156 = vmatpush.bf16.msra.mxu3 %v5851_v14  ;;  %v5885_v16 = vld [vmem:[%s7476_s3 + $0x470] sm:$0xff] }
 0xffe   :  { %v1734_v37 = vmul.f32 %v5998_v13, %v1731_v3  ;;  %v5886_v13 = vld [vmem:[%s7476_s3 + $0x478] sm:$0xff]  ;;  %v5850_v3 = vld [vmem:[%s7476_s3 + $0x328] sm:$0xff] }
0x1000   :  { %v1737_v18 = vadd.f32 %v5999_v17, %v1734_v37  ;;  %2322 = vmatpush.bf16.msrb.mxu0 %v5863_v2  ;;  %2240 = vmatpush.bf16.msrb.mxu2 %v5856_v12  ;;  %v5884_v17 = vld [vmem:[%s7476_s3 + $0x468] sm:$0xff]  ;;  %v5849_v37 = vld [vmem:[%s7476_s3 + $0x320] sm:$0xff] }
0x1001   :  { %2157 = vmatpush.bf16.msra.mxu3 %v5850_v3  ;;  %v5902_v3 = vld [vmem:[%s7476_s3 + $0x3a8] sm:$0xff] }
0x1002   :  { %v1738_v19 = vpack.c.bf16 %v1737_v18, %v1736_v6 }
0x1004   :  { %1849 = vmatmul.bf16.vlgmr.msrb.gmra.mxu3 %v1738_v19  ;;  %1863 = vmatmul.bf16.vlgmr.msra.gmra.mxu2 %v1738_v19  ;;  %v5848_v19 = vld [vmem:[%s7476_s3 + $0x318] sm:$0xff] }
0x1005   :  { %2323 = vmatpush.bf16.msrb.mxu0 %v5862_v8  ;;  %2241 = vmatpush.bf16.msrb.mxu2 %v5855_v15 }
0x1006   :  { %2158 = vmatpush.bf16.msra.mxu3 %v5849_v37  ;;  %v5899_v37 = vld [vmem:[%s7476_s3 + $0x390] sm:$0xff] }
0x1009   :  { %2324 = vmatpush.bf16.msrb.mxu0 %v5861_v11  ;;  %2242 = vmatpush.bf16.msrb.mxu2 %v5854_v4  ;;  %v5901_v4 = vld [vmem:[%s7476_s3 + $0x3a0] sm:$0xff] }
0x100a   :  { %2159 = vmatpush.bf16.msra.mxu3 %v5848_v19  ;;  %v6003_v19 = vld [vmem:[%s7477_s4 + $0x14] ss:$0 sm:$0xff] }
0x100e   :  { %2160 = vmatpush.bf16.msra.mxu3 %v5847_v21  ;;  %v6005_v21 = vld [vmem:[%s7477_s4 + $0x10] ss:$0 sm:$0xff] }
0x1087   :  { %v1850_v28 = vpop.f32.mrf.mxu3  ;;  %v1864_v29 = vpop.f32.mrf.mxu2 }
0x1088   :  { %v1851_v32 = vadd.f32 %v1850_v28, %v1757_v30  ;;  %v1865_v33 = vadd.f32 %v1864_v29, %v1758_v31  ;;  %v5846_v29 = vld [vmem:[%s7476_s3 + $0x308] sm:$0xff] }
0x1089   :  { %2161 = vmatpush.bf16.msra.mxu3 %v5846_v29 }
0x108a   :  { %v1869_v39 = vmax.f32 %v1851_v32, 0.0  ;;  %v1870_v40 = vmax.f32 %v1865_v33, 0.0  ;;  %v5880_v32 = vld [vmem:[%s7476_s3 + $0x448] sm:$0xff] }
0x108f   :  { %v1852_v34 = vpop.f32.mrf.mxu3  ;;  %v1866_v35 = vpop.f32.mrf.mxu2 }
0x1090   :  { %v1853_v36 = vadd.f32 %v1852_v34, %v1757_v30  ;;  %v1867_v38 = vadd.f32 %v1866_v35, %v1758_v31  ;;  %v5876_v30 = vld [vmem:[%s7476_s3 + $0x368] sm:$0xff]  ;;  %v5845_v34 = vld [vmem:[%s7476_s3 + $0x300] sm:$0xff] }
0x1091   :  { %v5875_v35 = vld [vmem:[%s7476_s3 + $0x360] sm:$0xff]  ;;  %2162 = vmatpush.bf16.msra.mxu3 %v5845_v34 }
0x1092   :  { %v1871_v41 = vmax.f32 %v1853_v36, 0.0  ;;  %v1872_v43 = vmax.f32 %v1867_v38, 0.0 }
0x1094   :  { %v1873_v60 = vpack.c.bf16 %v1871_v41, %v1869_v39  ;;  %v1874_v44 = vpack.c.bf16 %v1872_v43, %v1870_v40  ;;  %v5879_v40 = vld [vmem:[%s7476_s3 + $0x440] sm:$0xff] }
0x1096   :  { %2013 = vmatmul.bf16.vlgmr.msra.gmra.mxu0 %v1873_v60  ;;  %2027 = vmatmul.bf16.vlgmr.msra.gmra.mxu1 %v1874_v44  ;;  %v5874_v60 = vld [vmem:[%s7476_s3 + $0x358] sm:$0xff] }
0x1097   :  { %2605 = vmatpush.bf16.msra.mxu0 %v5886_v13 }
0x109b   :  { %2606 = vmatpush.bf16.msra.mxu0 %v5885_v16  ;;  %v5903_v16 = vld [vmem:[%s7476_s3 + $0x3b0] sm:$0xff] }
0x109f   :  { %2607 = vmatpush.bf16.msra.mxu0 %v5884_v17  ;;  %v5900_v17 = vld [vmem:[%s7476_s3 + $0x398] sm:$0xff] }
0x1113   :  { %v2014_v50 = vpop.f32.mrf.mxu0  ;;  %v2028_v51 = vpop.f32.mrf.mxu1 }
0x1114   :  { %v2015_v52 = vadd.f32 %v6000_v49, %v2014_v50 }
0x1116   :  { %v2029_v53 = vadd.f32 %v2028_v51, %v2015_v52  ;;  %v5871_v51 = vld [vmem:[%s7476_s3 + $0x340] sm:$0xff] }
0x1118   :  { %v6832_v54 = vadd.f32 %v2029_v53, %v1736_v6  ;;  %v5853_v6 = vld [vmem:[%s7476_s3 + $0x400] sm:$0xff] }
0x1119   :  { %2243 = vmatpush.bf16.msrb.mxu2 %v5853_v6  ;;  %v5898_v6 = vld [vmem:[%s7476_s3 + $0x388] sm:$0xff] }
0x111a   :  { %2037 = vadd.xlane.f32.xlu2 %v6832_v54  ;;  %v2043_v55 = vmul.f32 %v6832_v54, %v6832_v54 }
0x111b   :  { %v2016_v56 = vpop.f32.mrf.mxu0  ;;  %v2030_v58 = vpop.f32.mrf.mxu1 }
0x111c   :  { %v2017_v57 = vadd.f32 %v6000_v49, %v2016_v56  ;;  %2045 = vadd.xlane.f32.xlu1 %v2043_v55 }
0x111d   :  { %2524 = vmatpush.bf16.msra.mxu2 %v5878_v20 }
0x111e   :  { %v2031_v59 = vadd.f32 %v2030_v58, %v2017_v57 }
0x1120   :  { %v6837_v62 = vadd.f32 %v2031_v59, %v1737_v18  ;;  %v5883_v18 = vld [vmem:[%s7476_s3 + $0x460] sm:$0xff] }
0x1121   :  { %2608 = vmatpush.bf16.msra.mxu0 %v5883_v18  ;;  %2525 = vmatpush.bf16.msra.mxu2 %v5877_v22  ;;  %v5897_v18 = vld [vmem:[%s7476_s3 + $0x380] sm:$0xff] }
0x1122   :  { %2039 = vadd.xlane.f32.xlu0 %v6837_v62  ;;  %v2044_v63 = vmul.f32 %v6837_v62, %v6837_v62 }
0x1124   :  { %2047 = vadd.xlane.f32.xlu2 %v2044_v63 }
0x1125   :  { %2609 = vmatpush.bf16.msra.mxu0 %v5882_v42  ;;  %2526 = vmatpush.bf16.msra.mxu2 %v5876_v30  ;;  %v7011_v30 = vld [vmem:[%s7477_s4 + $0x11] ss:$0 sm:$0xff] }
0x1129   :  { %2610 = vmatpush.bf16.msra.mxu0 %v5881_v26  ;;  %2527 = vmatpush.bf16.msra.mxu2 %v5875_v35 }
0x112d   :  { %2611 = vmatpush.bf16.msra.mxu0 %v5880_v32  ;;  %2528 = vmatpush.bf16.msra.mxu2 %v5874_v60 }
0x1131   :  { %2612 = vmatpush.bf16.msra.mxu0 %v5879_v40  ;;  %2529 = vmatpush.bf16.msra.mxu2 %v5873_v45  ;;  %v5894_v45 = vld [vmem:[%s7476_s3 + $0x578] sm:$0xff] }
0x1135   :  { %2530 = vmatpush.bf16.msra.mxu2 %v5872_v48 }
0x1139   :  { %2531 = vmatpush.bf16.msra.mxu2 %v5871_v51  ;;  %v5889_v51 = vld [vmem:[%s7476_s3 + $0x550] sm:$0xff] }
0x118d   :  { %v2038_v23 = vpop.xlane.xlu2 %2037 }
0x118e   :  { %v2041_v24 = vmul.f32 %v2038_v23, %v6708_v5  ;;  %v6004_v23 = vld [vmem:[%s7477_s4 + $0xc] ss:$0 sm:$0xff] }
0x118f   :  { %v2046_v25 = vpop.xlane.xlu1 %2045 }
0x1190   :  { %v2051_v27 = vmul.f32 %v2041_v24, %v2041_v24  ;;  %v2049_v28 = vmul.f32 %v2046_v25, %v6708_v5  ;;  %v2055_v63 = vsub.f32 %v6832_v54, %v2041_v24 }
0x1192   :  { %v2053_v31 = vsub.f32 %v2049_v28, %v2051_v27 }
0x1194   :  { %v2057_v33 = vadd.f32 1e-05, %v2053_v31 }
0x1195   :  { %v2040_v36 = vpop.xlane.xlu0 %2039 }
0x1196   :  { %6059 = vrsqrt.f32 %v2057_v33  ;;  %v2042_v38 = vmul.f32 %v2040_v36, %v6708_v5  ;;  %vm2065_vm12 = vweird.f32 %v2057_v33 }
0x1197   :  { %v2048_v39 = vpop.xlane.xlu2 %2047 }
0x1198   :  { %v2052_v41 = vmul.f32 %v2042_v38, %v2042_v38  ;;  %v2050_v43 = vmul.f32 %v2048_v39, %v6708_v5  ;;  %v2056_v8 = vsub.f32 %v6837_v62, %v2042_v38  ;;  %v5904_v62 = vld [vmem:[%s7476_s3 + $0x3b8] sm:$0xff] }
0x119a   :  { %v2054_v44 = vsub.f32 %v2050_v43, %v2052_v41 }
0x119c   :  { %v6060_v46 = vpop.eup %6059  ;;  %v2058_v61 = vadd.f32 1e-05, %v2054_v44 }
0x119d   :  { %v2060_v47 = vmul.f32 %v6060_v46, %v2057_v33  ;;  %vm2066_vm11 = vweird.f32 %v6060_v46 }
0x119e   :  { %6061 = vrsqrt.f32 %v2058_v61  ;;  %vm2067_vm13 = vmor %vm2065_vm12, %vm2066_vm11  ;;  %vm2075_vm15 = vweird.f32 %v2058_v61 }
0x119f   :  { %v2061_v49 = vmul.f32 %v6060_v46, %v2060_v47  ;;  %v5892_v47 = vld [vmem:[%s7476_s3 + $0x568] sm:$0xff] }
0x11a1   :  { %v2062_v50 = vmul.f32 0.5, %v2061_v49  ;;  %v5891_v49 = vld [vmem:[%s7476_s3 + $0x560] sm:$0xff] }
0x11a3   :  { %v2063_v52 = vsub.f32 1.5, %v2062_v50  ;;  %v5890_v50 = vld [vmem:[%s7476_s3 + $0x558] sm:$0xff] }
0x11a4   :  { %v6062_v53 = vpop.eup %6061 }
0x11a5   :  { %v2064_v55 = vmul.f32 %v6060_v46, %v2063_v52  ;;  %v2070_v56 = vmul.f32 %v6062_v53, %v2058_v61  ;;  %vm2076_vm14 = vweird.f32 %v6062_v53  ;;  %v5893_v61 = vld [vmem:[%s7476_s3 + $0x570] sm:$0xff]  ;;  %v5888_v52 = vld [vmem:[%s7476_s3 + $0x548] sm:$0xff] }
0x11a6   :  { %vm2077_vm0 = vmor %vm2075_vm15, %vm2076_vm14 }
0x11a7   :  { %v2071_v57 = vmul.f32 %v6062_v53, %v2070_v56  ;;  %v2068_v58 = vsel %vm2067_vm13, %v6060_v46, %v2064_v55  ;;  %v5912_v55 = vld [vmem:[%s7476_s3 + $0x4b8] sm:$0xff]  ;;  %v5911_v56 = vld [vmem:[%s7476_s3 + $0x4b0] sm:$0xff] }
0x11a8   :  { %v2079_v2 = vmul.f32 %v2068_v58, %v2055_v63  ;;  %v5909_v58 = vld [vmem:[%s7476_s3 + $0x4a0] sm:$0xff]  ;;  %v5907_v63 = vld [vmem:[%s7476_s3 + $0x490] sm:$0xff] }
0x11a9   :  { %v2072_v59 = vmul.f32 0.5, %v2071_v57  ;;  %v5910_v57 = vld [vmem:[%s7476_s3 + $0x4a8] sm:$0xff] }
0x11aa   :  { %v2082_v11 = vmul.f32 %v6001_v1, %v2079_v2 }
0x11ab   :  { %v2073_v0 = vsub.f32 1.5, %v2072_v59  ;;  %v5908_v59 = vld [vmem:[%s7476_s3 + $0x498] sm:$0xff] }
0x11ac   :  { %v6959_v13 = vadd.f32 %v6002_v10, %v2082_v11 }
0x11ad   :  { %v2074_v7 = vmul.f32 %v6062_v53, %v2073_v0  ;;  %v5906_v0 = vld [vmem:[%s7476_s3 + $0x488] sm:$0xff] }
0x11af   :  { %v2078_v9 = vsel %vm2077_vm0, %v6062_v53, %v2074_v7  ;;  %v5887_v53 = vld [vmem:[%s7476_s3 + $0x540] sm:$0xff] }
0x11b0   :  { %v2080_v12 = vmul.f32 %v2078_v9, %v2056_v8 }
0x11b2   :  { %v2083_v54 = vmul.f32 %v6001_v1, %v2080_v12  ;;  %v5905_v1 = vld [vmem:[%s7476_s3 + $0x480] sm:$0xff] }
0x11b4   :  { %v6961_v14 = vadd.f32 %v6002_v10, %v2083_v54 }
0x11b6   :  { %v6965_v15 = vpack.c.bf16 %v6961_v14, %v6959_v13 }
0x11b8   :  { %2163 = vmatmul.bf16.vlgmr.msra.gmra.mxu3 %v6965_v15  ;;  %2244 = vmatmul.bf16.vlgmr.msrb.gmra.mxu2 %v6965_v15 }
0x11b9   :  { %2325 = vmatmul.bf16.vlgmr.msrb.gmra.mxu0 %v6965_v15 }
0x11ba   :  { %2951 = vmatpush.bf16.msrb.mxu0 %v5904_v62 }
0x11be   :  { %2952 = vmatpush.bf16.msrb.mxu0 %v5903_v16  ;;  %v6009_v16 = vld [vmem:[%s7477_s4 + $0x15] ss:$0 sm:$0xff] }
0x11c2   :  { %2953 = vmatpush.bf16.msrb.mxu0 %v5902_v3 }
0x11c6   :  { %2954 = vmatpush.bf16.msrb.mxu0 %v5901_v4 }
0x11c8   :  { %2532 = vmatmul.bf16.vlgmr.msra.gmra.mxu2 %v6965_v15 }
0x11c9   :  { %2613 = vmatmul.bf16.vlgmr.msra.gmra.mxu0 %v6965_v15 }
0x11ca   :  { %2955 = vmatpush.bf16.msrb.mxu0 %v5900_v17 }
0x11ce   :  { %2956 = vmatpush.bf16.msrb.mxu0 %v5899_v37 }
0x11d2   :  { %2957 = vmatpush.bf16.msrb.mxu0 %v5898_v6  ;;  %v6007_v6 = vld [vmem:[%s7477_s4 + $0xd] ss:$0 sm:$0xff] }
0x11d6   :  { %2958 = vmatpush.bf16.msrb.mxu0 %v5897_v18 }
0x11d9   :  { %2959 = vmatmul.bf16.vlgmr.msrb.gmra.mxu0 %v6965_v15 }
0x1236   :  { %v2326_v20 = vpop.f32.mrf.mxu0 }
0x1237   :  { %v2327_v42 = vadd.f32 %v6003_v19, %v2326_v20 }
0x1239   :  { %2386 = vmatpush.msrb.mxu1 %v2327_v42 }
0x123b   :  { %v2245_v22 = vpop.f32.mrf.mxu2  ;;  %v2164_v25 = vpop.f32.mrf.mxu3 }
0x123c   :  { %v2246_v24 = vadd.f32 %v6005_v21, %v2245_v22  ;;  %v2165_v28 = vadd.f32 %v6004_v23, %v2164_v25 }
0x123e   :  { %v2328_v26 = vpop.f32.mrf.mxu0  ;;  %5023 = vmatpush.xpose.msk.msrb.mxu3 %vm319_vm2, %v2246_v24 }
0x123f   :  { %v2329_v27 = vadd.f32 %v6003_v19, %v2328_v26 }
0x1241   :  { %5024 = vmatmul.msk.f32.vlgmr.msrb.gmra.mxu3 %vm319_vm2, %v2165_v28 }
0x1242   :  { %2446 = vmatpush.msra.mxu3 %v2329_v27 }
0x1243   :  { %v2247_v29 = vpop.f32.mrf.mxu2  ;;  %v2166_v34 = vpop.f32.mrf.mxu3 }
0x1244   :  { %v2248_v31 = vadd.f32 %v6005_v21, %v2247_v29  ;;  %v2167_v48 = vadd.f32 %v6004_v23, %v2166_v34 }
0x1246   :  { %v2614_v32 = vpop.f32.mrf.mxu0  ;;  %5026 = vmatpush.xpose.msk.msra.mxu1 %vm319_vm2, %v2248_v31 }
0x1247   :  { %v2615_v33 = vadd.f32 %v7011_v30, %v2614_v32 }
0x1249   :  { %5177 = vmatpush.xpose.msk.msrb.mxu3 %vm319_vm2, %v2615_v33 }
0x124b   :  { %v2533_v18 = vpop.f32.mrf.mxu2 }
0x124c   :  { %v2534_v20 = vadd.f32 %v6007_v6, %v2533_v18  ;;  %v5924_v18 = vld [vmem:[%s7476_s3 + $0x3c8] sm:$0xff] }
0x124e   :  { %v2616_v19 = vpop.f32.mrf.mxu0 }
0x124f   :  { %v2617_v42 = vadd.f32 %v7011_v30, %v2616_v19 }
0x1253   :  { %v2535_v34 = vpop.f32.mrf.mxu2 }
0x12c4   :  { %v2354_v35 = vpop.f32.mrf.mxu3 }
0x12c5   :  { %v2357_v36 = vsel %vm346_vm3, %v2354_v35, -inf }
0x12c6   :  { %2358 = vmax.xlane.f32.xlu0 %v2357_v36 }
0x1339   :  { %v2359_v38 = vpop.xlane.xlu0 %2358 }
0x133a   :  { %v2360_v39 = vsub.f32 %v2354_v35, %v2359_v38  ;;  %v2536_v35 = vadd.f32 %v6007_v6, %v2535_v34 }
0x133c   :  { %v2361_v40 = vmul.f32 1.442695, %v2360_v39 }
0x133e   :  { %6063 = vpow2.f32 %v2361_v40 }
0x1344   :  { %v6064_v41 = vpop.eup %6063 }
0x1345   :  { %v2363_v43 = vsel %vm346_vm3, %v6064_v41, 0.0 }
0x1346   :  { %2364 = vadd.xlane.f32.xlu1 %v2363_v43 }
0x13b9   :  { %v2365_v60 = vpop.xlane.xlu1 %2364 }
0x13ba   :  { %6065 = vrcp.f32 %v2365_v60 }
0x13c0   :  { %v6066_v44 = vpop.eup %6065 }
0x13c1   :  { %v2367_v46 = vmul.f32 %v6066_v44, %v6064_v41 }
0x13c3   :  { %5025 = vmatmul.msk.f32.vlgmr.msrb.gmra.mxu1 %vm346_vm3, %v2367_v46  ;;  %v5869_v46 = vld [vmem:[%s7478_s5 + $0x40] sm:$0xff] }
0x13c4   :  { %2686 = vmatpush.bf16.msrb.mxu1 %v5894_v45  ;;  %v5870_v45 = vld [vmem:[%s7478_s5 + $0x48] sm:$0xff] }
0x13c8   :  { %2687 = vmatpush.bf16.msrb.mxu1 %v5893_v61 }
0x13cb   :  { %5027 = vmatmul.msk.f32.vlgmr.msra.gmra.mxu1 %vm319_vm2, %v2167_v48  ;;  %v5895_v48 = vld [vmem:[%s7478_s5 + $0x50] sm:$0xff] }
0x13cc   :  { %2688 = vmatpush.bf16.msrb.mxu1 %v5892_v47  ;;  %v5896_v47 = vld [vmem:[%s7478_s5 + $0x58] sm:$0xff] }
0x13cd   :  { %2847 = vmatpush.bf16.msrb.mxu2 %v5896_v47  ;;  %v5922_v47 = vld [vmem:[%s7478_s5 + $0x68] sm:$0xff] }
0x13d0   :  { %2689 = vmatpush.bf16.msrb.mxu1 %v5891_v49  ;;  %v7105_v49 = vld [vmem:[%s7477_s4 + $0x12] ss:$0 sm:$0xff] }
0x13d1   :  { %2848 = vmatpush.bf16.msrb.mxu2 %v5895_v48 }
0x13d4   :  { %2690 = vmatpush.bf16.msrb.mxu1 %v5890_v50  ;;  %v5920_v50 = vld [vmem:[%s7476_s3 + $0x5b8] sm:$0xff] }
0x13d5   :  { %3113 = vmatpush.bf16.msra.mxu2 %v5920_v50 }
0x13d8   :  { %2691 = vmatpush.bf16.msrb.mxu1 %v5889_v51 }
0x13dc   :  { %2692 = vmatpush.bf16.msrb.mxu1 %v5888_v52 }
0x13e0   :  { %2693 = vmatpush.bf16.msrb.mxu1 %v5887_v53 }
0x13e3   :  { %2694 = vmatmul.bf16.vlgmr.msrb.gmra.mxu1 %v6965_v15 }
0x13e4   :  { %3032 = vmatpush.bf16.msra.mxu1 %v5912_v55 }
0x13e8   :  { %3033 = vmatpush.bf16.msra.mxu1 %v5911_v56  ;;  %v5919_v56 = vld [vmem:[%s7476_s3 + $0x5b0] sm:$0xff] }
0x13e9   :  { %3114 = vmatpush.bf16.msra.mxu2 %v5919_v56  ;;  %v5946_v56 = vld [vmem:[%s7476_s3 + $0x5f8] sm:$0xff] }
0x13ec   :  { %3034 = vmatpush.bf16.msra.mxu1 %v5910_v57  ;;  %v5918_v57 = vld [vmem:[%s7476_s3 + $0x5a8] sm:$0xff] }
0x13ed   :  { %3115 = vmatpush.bf16.msra.mxu2 %v5918_v57  ;;  %v5945_v57 = vld [vmem:[%s7476_s3 + $0x5f0] sm:$0xff] }
0x13f0   :  { %3035 = vmatpush.bf16.msra.mxu1 %v5909_v58 }
0x13f4   :  { %3036 = vmatpush.bf16.msra.mxu1 %v5908_v59  ;;  %v5917_v59 = vld [vmem:[%s7476_s3 + $0x5a0] sm:$0xff] }
0x13f5   :  { %3116 = vmatpush.bf16.msra.mxu2 %v5917_v59  ;;  %v5943_v59 = vld [vmem:[%s7476_s3 + $0x5e0] sm:$0xff] }
0x13f8   :  { %3037 = vmatpush.bf16.msra.mxu1 %v5907_v63  ;;  %v5916_v63 = vld [vmem:[%s7476_s3 + $0x598] sm:$0xff] }
0x13f9   :  { %3117 = vmatpush.bf16.msra.mxu2 %v5916_v63 }
0x13fc   :  { %3038 = vmatpush.bf16.msra.mxu1 %v5906_v0  ;;  %v5915_v0 = vld [vmem:[%s7476_s3 + $0x590] sm:$0xff] }
0x13fd   :  { %3118 = vmatpush.bf16.msra.mxu2 %v5915_v0 }
0x1400   :  { %3039 = vmatpush.bf16.msra.mxu1 %v5905_v1  ;;  %v7133_v1 = vld [vmem:[%s7477_s4 + $0xe] ss:$0 sm:$0xff] }
0x1403   :  { %3040 = vmatmul.bf16.vlgmr.msra.gmra.mxu1 %v6965_v15 }
0x1404   :  { %3274 = vmatpush.bf16.msrb.mxu1 %v5922_v47 }
0x1440   :  { %v7070_v2 = vpop.f32.mrf.mxu1 }
0x1448   :  { %v2414_v7 = vpop.f32.mrf.mxu1 }
0x1449   :  { %v2417_v8 = vsel %vm346_vm3, %v2414_v7, -inf }
0x144a   :  { %2418 = vmax.xlane.f32.xlu2 %v2417_v8 }
0x1460   :  { %v2695_v3 = vpop.f32.mrf.mxu1 }
0x1461   :  { %v2696_v37 = vadd.f32 %v6009_v16, %v2695_v3  ;;  %v5927_v3 = vld [vmem:[%s7476_s3 + $0x3e0] sm:$0xff] }
0x1468   :  { %v2697_v30 = vpop.f32.mrf.mxu1 }
0x1469   :  { %v2698_v33 = vadd.f32 %v6009_v16, %v2697_v30  ;;  %v5928_v16 = vld [vmem:[%s7476_s3 + $0x3e8] sm:$0xff] }
0x1480   :  { %v3041_v51 = vpop.f32.mrf.mxu1 }
0x1481   :  { %v3042_v55 = vadd.f32 %v7105_v49, %v3041_v51 }
0x14bd   :  { %v2419_v9 = vpop.xlane.xlu2 %2418 }
0x14be   :  { %v2420_v10 = vsub.f32 %v2414_v7, %v2419_v9  ;;  %v5914_v7 = vld [vmem:[%s7476_s3 + $0x588] sm:$0xff]  ;;  %v5913_v9 = vld [vmem:[%s7476_s3 + $0x580] sm:$0xff] }
0x14bf   :  { %3119 = vmatpush.bf16.msra.mxu2 %v5914_v7 }
0x14c0   :  { %v2421_v11 = vmul.f32 1.442695, %v2420_v10 }
0x14c2   :  { %6067 = vpow2.f32 %v2421_v11  ;;  %v5930_v11 = vld [vmem:[%s7476_s3 + $0x3f8] sm:$0xff] }
0x14c3   :  { %3120 = vmatpush.bf16.msra.mxu2 %v5913_v9  ;;  %v5941_v9 = vld [vmem:[%s7476_s3 + $0x5d0] sm:$0xff] }
0x14c8   :  { %v6068_v12 = vpop.eup %6067 }
0x14c9   :  { %v2423_v54 = vsel %vm346_vm3, %v6068_v12, 0.0 }
0x14ca   :  { %2424 = vadd.xlane.f32.xlu0 %v2423_v54  ;;  %v5929_v54 = vld [vmem:[%s7476_s3 + $0x3f0] sm:$0xff] }
0x153d   :  { %v2425_v62 = vpop.xlane.xlu0 %2424 }
0x153e   :  { %6069 = vrcp.f32 %v2425_v62 }
0x1544   :  { %v6070_v4 = vpop.eup %6069 }
0x1545   :  { %v2427_v17 = vmul.f32 %v6070_v4, %v6068_v12 }
0x1547   :  { %5028 = vmatmul.msk.f32.vlgmr.msra.gmra.mxu3 %vm346_vm3, %v2427_v17  ;;  %v5926_v17 = vld [vmem:[%s7476_s3 + $0x3d8] sm:$0xff] }
0x1548   :  { %2755 = vmatpush.msra.mxu3 %v2696_v37  ;;  %v5925_v37 = vld [vmem:[%s7476_s3 + $0x3d0] sm:$0xff] }
0x154f   :  { %5178 = vmatmul.msk.f32.vlgmr.msrb.gmra.mxu3 %vm319_vm2, %v2534_v20  ;;  %v5923_v20 = vld [vmem:[%s7476_s3 + $0x3c0] sm:$0xff] }
0x1550   :  { %5180 = vmatpush.xpose.msk.msrb.mxu3 %vm319_vm2, %v2617_v42 }
0x15ca   :  { %v2448_v21 = vpop.f32.mrf.mxu3 }
0x15cb   :  { %v2451_v58 = vpack.c.bf16 %v2448_v21, %v7070_v2  ;;  %v2960_v2 = vpop.f32.mrf.mxu0 }
0x15cc   :  { %v2961_v8 = vadd.f32 %v7133_v1, %v2960_v2 }
0x15d2   :  { %v2723_v22 = vpop.f32.mrf.mxu3 }
0x15d3   :  { %v2726_v23 = vsel %vm346_vm3, %v2723_v22, -inf }
0x15d4   :  { %2727 = vmax.xlane.f32.xlu1 %v2726_v23 }
0x1647   :  { %v2728_v24 = vpop.xlane.xlu1 %2727 }
0x1648   :  { %v2729_v25 = vsub.f32 %v2723_v22, %v2728_v24 }
0x164a   :  { %v2730_v26 = vmul.f32 1.442695, %v2729_v25  ;;  %v6011_v25 = vld [vmem:[%s7477_s4 + $0x16] ss:$0 sm:$0xff] }
0x164c   :  { %6071 = vpow2.f32 %v2730_v26  ;;  %v3043_v26 = vpop.f32.mrf.mxu1 }
0x164d   :  { %v3044_v30 = vadd.f32 %v7105_v49, %v3043_v26  ;;  %v5921_v49 = vld [vmem:[%s7478_s5 + $0x60] sm:$0xff] }
0x164e   :  { %3275 = vmatpush.bf16.msrb.mxu1 %v5921_v49 }
0x1652   :  { %v6072_v27 = vpop.eup %6071 }
0x1653   :  { %v2732_v28 = vsel %vm346_vm3, %v6072_v27, 0.0 }
0x1654   :  { %2733 = vadd.xlane.f32.xlu2 %v2732_v28 }
0x16c7   :  { %v2734_v29 = vpop.xlane.xlu2 %2733 }
0x16c8   :  { %6073 = vrcp.f32 %v2734_v29 }
0x16ce   :  { %v6074_v31 = vpop.eup %6073 }
0x16cf   :  { %v2736_v32 = vmul.f32 %v6074_v31, %v6072_v27 }
0x16d1   :  { %5179 = vmatmul.msk.f32.vlgmr.msra.gmra.mxu3 %vm346_vm3, %v2736_v32 }
0x16d2   :  { %2815 = vmatpush.msra.mxu3 %v2698_v33 }
0x16d9   :  { %5181 = vmatmul.msk.f32.vlgmr.msrb.gmra.mxu3 %vm319_vm2, %v2536_v35 }
0x16da   :  { %2876 = vmatpush.bf16.msrb.mxu3 %v5870_v45  ;;  %v5933_v45 = vld [vmem:[%s7476_s3 + $0x4d0] sm:$0xff] }
0x16de   :  { %2877 = vmatpush.bf16.msrb.mxu3 %v5869_v46  ;;  %v5932_v46 = vld [vmem:[%s7476_s3 + $0x4c8] sm:$0xff] }
0x1754   :  { %v2757_v36 = vpop.f32.mrf.mxu3 }
0x175c   :  { %v2783_v38 = vpop.f32.mrf.mxu3 }
0x175d   :  { %v2786_v39 = vsel %vm346_vm3, %v2783_v38, -inf }
0x175e   :  { %2787 = vmax.xlane.f32.xlu0 %v2786_v39  ;;  %v5937_v39 = vld [vmem:[%s7476_s3 + $0x4f0] sm:$0xff] }
0x17d1   :  { %v2788_v40 = vpop.xlane.xlu0 %2787 }
0x17d2   :  { %v2789_v41 = vsub.f32 %v2783_v38, %v2788_v40  ;;  %v2962_v40 = vpop.f32.mrf.mxu0 }
0x17d4   :  { %v2790_v43 = vmul.f32 1.442695, %v2789_v41  ;;  %v5936_v41 = vld [vmem:[%s7476_s3 + $0x4e8] sm:$0xff] }
0x17d6   :  { %6075 = vpow2.f32 %v2790_v43  ;;  %v2963_v43 = vadd.f32 %v7133_v1, %v2962_v40 }
0x17dc   :  { %v6076_v60 = vpop.eup %6075 }
0x17dd   :  { %v2792_v44 = vsel %vm346_vm3, %v6076_v60, 0.0 }
0x17de   :  { %2793 = vadd.xlane.f32.xlu1 %v2792_v44  ;;  %v5934_v44 = vld [vmem:[%s7476_s3 + $0x4d8] sm:$0xff] }
0x1851   :  { %v2794_v61 = vpop.xlane.xlu1 %2793 }
0x1852   :  { %6077 = vrcp.f32 %v2794_v61  ;;  %v5931_v61 = vld [vmem:[%s7476_s3 + $0x4c0] sm:$0xff] }
0x1858   :  { %v6078_v52 = vpop.eup %6077 }
0x1859   :  { %v2796_v53 = vmul.f32 %v6078_v52, %v6076_v60  ;;  %v5935_v60 = vld [vmem:[%s7476_s3 + $0x4e0] sm:$0xff]  ;;  %v6013_v52 = vld [vmem:[%s7477_s4 + $0x13] ss:$0 sm:$0xff] }
0x185b   :  { %5182 = vmatmul.msk.f32.vlgmr.msra.gmra.mxu3 %vm346_vm3, %v2796_v53 }
0x185c   :  { %5349 = vmatpush.xpose.msk.msra.mxu3 %vm319_vm2, %v3042_v55 }
0x1863   :  { %5204 = vmatmul.msk.bf16.vlgmr.msrb.gmra.mxu3 %vm319_vm2, %v2451_v58  ;;  %v5944_v58 = vld [vmem:[%s7476_s3 + $0x5e8] sm:$0xff] }
0x1873   :  { %5350 = vmatmul.msk.f32.vlgmr.msra.gmra.mxu3 %vm319_vm2, %v2961_v8  ;;  %v5942_v8 = vld [vmem:[%s7476_s3 + $0x5d8] sm:$0xff] }
0x18de   :  { %v2817_v10 = vpop.f32.mrf.mxu3 }
0x18df   :  { %v2820_v12 = vpack.c.bf16 %v2817_v10, %v2757_v36  ;;  %v5938_v36 = vld [vmem:[%s7476_s3 + $0x4f8] sm:$0xff]  ;;  %v5940_v10 = vld [vmem:[%s7476_s3 + $0x5c8] sm:$0xff] }
0x18e1   :  { %5195 = vmatmul.msk.bf16.vlgmr.msrb.gmra.mxu2 %vm319_vm2, %v2820_v12 }
0x18e2   :  { %3351 = vmatpush.bf16.msrb.mxu2 %v5930_v11  ;;  %v5939_v11 = vld [vmem:[%s7476_s3 + $0x5c0] sm:$0xff] }
0x18e6   :  { %v7150_v62 = vpop.f32.mrf.mxu3  ;;  %3352 = vmatpush.bf16.msrb.mxu2 %v5929_v54 }
0x18ea   :  { %3353 = vmatpush.bf16.msrb.mxu2 %v5928_v16 }
0x18ee   :  { %v7158_v4 = vpop.f32.mrf.mxu3  ;;  %3354 = vmatpush.bf16.msrb.mxu2 %v5927_v3 }
0x18f1   :  { %3121 = vmatmul.bf16.vlgmr.msra.gmra.mxu2 %v6965_v15 }
0x18f2   :  { %3355 = vmatpush.bf16.msrb.mxu2 %v5926_v17 }
0x18f6   :  { %v3150_v6 = vpop.f32.mrf.mxu3  ;;  %3356 = vmatpush.bf16.msrb.mxu2 %v5925_v37  ;;  %v6014_v37 = vld [vmem:[%s7477_s4 + $0x17] ss:$0 sm:$0xff] }
0x18f7   :  { %v3153_v19 = vsel %vm346_vm3, %v3150_v6, -inf }
0x18f8   :  { %3154 = vmax.xlane.f32.xlu2 %v3153_v19  ;;  %v6012_v19 = vld [vmem:[%s7477_s4 + $0xf] ss:$0 sm:$0xff] }
0x18fa   :  { %3357 = vmatpush.bf16.msrb.mxu2 %v5924_v18 }
0x18fe   :  { %3358 = vmatpush.bf16.msrb.mxu2 %v5923_v20 }
0x1901   :  { %3359 = vmatmul.bf16.vlgmr.msrb.gmra.mxu2 %v6965_v15 }
0x1964   :  { %v7175_v42 = vpop.f32.mrf.mxu2 }
0x196b   :  { %v3155_v21 = vpop.xlane.xlu2 %3154 }
0x196c   :  { %v3156_v22 = vsub.f32 %v3150_v6, %v3155_v21  ;;  %v7177_v23 = vpop.f32.mrf.mxu2 }
0x196e   :  { %v3157_v24 = vmul.f32 1.442695, %v3156_v22 }
0x1970   :  { %6079 = vpow2.f32 %v3157_v24 }
0x1974   :  { %v3122_v27 = vpop.f32.mrf.mxu2 }
0x1975   :  { %v3123_v28 = vadd.f32 %v6011_v25, %v3122_v27  ;;  %v2882_v27 = vadd.f32 %v7158_v4, %v7177_v23 }
0x1976   :  { %v6080_v29 = vpop.eup %6079 }
0x1977   :  { %3182 = vmatpush.msrb.mxu3 %v3123_v28  ;;  %v3159_v31 = vsel %vm346_vm3, %v6080_v29, 0.0 }
0x1978   :  { %3160 = vadd.xlane.f32.xlu0 %v3159_v31 }
0x1979   :  { %5352 = vmatpush.xpose.msk.msra.mxu3 %vm319_vm2, %v3044_v30 }
0x197c   :  { %v3124_v32 = vpop.f32.mrf.mxu2 }
0x197d   :  { %v3125_v33 = vadd.f32 %v6011_v25, %v3124_v32 }
0x197f   :  { %3242 = vmatpush.msra.mxu0 %v3125_v33 }
0x1981   :  { %3513 = vmatpush.bf16.msrb.mxu0 %v5946_v56  ;;  %v6015_v56 = vld [vmem:[%s7479_s6 + $0x6] ss:$0 sm:$0xff] }
0x1984   :  { %v3360_v20 = vpop.f32.mrf.mxu2 }
0x1985   :  { %3514 = vmatpush.bf16.msrb.mxu0 %v5945_v57  ;;  %v3361_v22 = vadd.f32 %v6012_v19, %v3360_v20  ;;  %v5960_v20 = vld [vmem:[%s7480_s7 + $0xd4] sm:$0xf0] }
0x1989   :  { %3515 = vmatpush.bf16.msrb.mxu0 %v5944_v58 }
0x198c   :  { %v3362_v23 = vpop.f32.mrf.mxu2 }
0x198d   :  { %3516 = vmatpush.bf16.msrb.mxu0 %v5943_v59  ;;  %v3363_v40 = vadd.f32 %v6012_v19, %v3362_v23  ;;  %v5590_v19 = vld [vmem:[%s7480_s7 + $0xd0] sm:$0xf] }
0x1991   :  { %3517 = vmatpush.bf16.msrb.mxu0 %v5942_v8 }
0x1995   :  { %3518 = vmatpush.bf16.msrb.mxu0 %v5941_v9 }
0x1999   :  { %3519 = vmatpush.bf16.msrb.mxu0 %v5940_v10  ;;  %v5964_v10 = vld [vmem:[%s7480_s7 + $0xf4] sm:$0xf0] }
0x199d   :  { %3520 = vmatpush.bf16.msrb.mxu0 %v5939_v11  ;;  %v5963_v11 = vld [vmem:[%s7480_s7 + $0xf4] sm:$0xf] }
0x19eb   :  { %v3161_v34 = vpop.xlane.xlu0 %3160 }
0x19ec   :  { %6081 = vrcp.f32 %v3161_v34 }
0x19f2   :  { %v6082_v35 = vpop.eup %6081 }
0x19f3   :  { %v3163_v38 = vmul.f32 %v6082_v35, %v6080_v29 }
0x19f5   :  { %5351 = vmatmul.msk.f32.vlgmr.msrb.gmra.mxu3 %vm346_vm3, %v3163_v38 }
0x19f6   :  { %3432 = vmatpush.bf16.msrb.mxu3 %v5938_v36 }
0x19fa   :  { %3433 = vmatpush.bf16.msrb.mxu3 %v5937_v39 }
0x19fd   :  { %5353 = vmatmul.msk.f32.vlgmr.msra.gmra.mxu3 %vm319_vm2, %v2963_v43 }
0x19fe   :  { %3434 = vmatpush.bf16.msrb.mxu3 %v5936_v41 }
0x1a02   :  { %3435 = vmatpush.bf16.msrb.mxu3 %v5935_v60 }
0x1a06   :  { %3436 = vmatpush.bf16.msrb.mxu3 %v5934_v44 }
0x1a0a   :  { %3437 = vmatpush.bf16.msrb.mxu3 %v5933_v45 }
0x1a0e   :  { %3438 = vmatpush.bf16.msrb.mxu3 %v5932_v46 }
0x1a12   :  { %3439 = vmatpush.bf16.msrb.mxu3 %v5931_v61 }
0x1a15   :  { %3440 = vmatmul.bf16.vlgmr.msrb.gmra.mxu3 %v6965_v15 }
0x1a78   :  { %v3184_v48 = vpop.f32.mrf.mxu3 }
0x1a80   :  { %v3210_v50 = vpop.f32.mrf.mxu3 }
0x1a81   :  { %v3213_v51 = vsel %vm346_vm3, %v3210_v50, -inf }
0x1a82   :  { %3214 = vmax.xlane.f32.xlu1 %v3213_v51 }
0x1a98   :  { %v3441_v53 = vpop.f32.mrf.mxu3 }
0x1a99   :  { %v3442_v55 = vadd.f32 %v6013_v52, %v3441_v53 }
0x1a9b   :  { %5512 = vmatpush.xpose.msk.msra.mxu1 %vm319_vm2, %v3442_v55 }
0x1aa0   :  { %v3443_v21 = vpop.f32.mrf.mxu3 }
0x1aa1   :  { %v3444_v24 = vadd.f32 %v6013_v52, %v3443_v21  ;;  %v5947_v52 = vld [vmem:[%s7478_s5 + $0x70] sm:$0xff] }
0x1aa2   :  { %v5959_v21 = vld [vmem:[%s7480_s7 + $0xd4] sm:$0xf] }
0x1af5   :  { %v3215_v63 = vpop.xlane.xlu1 %3214 }
0x1af6   :  { %v3216_v0 = vsub.f32 %v3210_v50, %v3215_v63 }
0x1af8   :  { %v3217_v1 = vmul.f32 1.442695, %v3216_v0 }
0x1afa   :  { %6083 = vpow2.f32 %v3217_v1 }
0x1b00   :  { %v6084_v2 = vpop.eup %6083 }
0x1b01   :  { %v3219_v7 = vsel %vm346_vm3, %v6084_v2, 0.0 }
0x1b02   :  { %3220 = vadd.xlane.f32.xlu2 %v3219_v7 }
0x1b75   :  { %v3221_v12 = vpop.xlane.xlu2 %3220 }
0x1b76   :  { %6085 = vrcp.f32 %v3221_v12  ;;  %v5608_v12 = vld [vmem:[%s7480_s7 + $0xf8] sm:$0xf0] }
0x1b7c   :  { %v6086_v54 = vpop.eup %6085 }
0x1b7d   :  { %v3223_v16 = vmul.f32 %v6086_v54, %v6084_v2  ;;  %v5611_v54 = vor.u32 %v5963_v11, %v5608_v12  ;;  %v5979_v11 = vld [vmem:[%s7482_s9 + $0xf0] sm:$0xff] }
0x1b7f   :  { %5354 = vmatmul.msk.f32.vlgmr.msra.gmra.mxu0 %vm346_vm3, %v3223_v16  ;;  %v5598_v16 = vld [vmem:[%s7480_s7 + $0xe0] sm:$0xf] }
0x1b80   :  { %3861 = vmatpush.bf16.msra.mxu0 %v5611_v54 }
0x1b87   :  { %3521 = vmatmul.bf16.vlgmr.msrb.gmra.mxu0 %v6965_v15  ;;  %v2880_v15 = vadd.f32 %v7150_v62, %v7175_v42 }
0x1bfc   :  { %v3244_v3 = vpop.f32.mrf.mxu0 }
0x1bfd   :  { %v3247_v17 = vpack.c.bf16 %v3244_v3, %v3184_v48  ;;  %v5948_v48 = vld [vmem:[%s7478_s5 + $0x78] sm:$0xff]  ;;  %v5962_v3 = vld [vmem:[%s7480_s7 + $0xe4] sm:$0xf0]  ;;  %s6130_s5 = smov [#allocation2]  }
0x1bfe   :  { %3674 = vmatpush.bf16.msra.mxu2 %v5948_v48  ;;  %v5560_v48 = vld [vmem:[%s7480_s7 + $0x98] sm:$0xf0]  ;;  %s4100_s28 = sshll.u32 %s6130_s5, 4  ;;  %s4101_s28 = int_to_ptr.vmem [resolvable:$true] %s4100_s28 }
0x1bff   :  { %5367 = vmatmul.msk.bf16.vlgmr.msrb.gmra.mxu1 %vm319_vm2, %v3247_v17  ;;  %v5961_v17 = vld [vmem:[%s7480_s7 + $0xe4] sm:$0xf] }
0x1c02   :  { %3675 = vmatpush.bf16.msra.mxu2 %v5947_v52  ;;  %v5950_v52 = vld [vmem:[%s7480_s7 + $0x84] sm:$0xf0] }
0x1c04   :  { %v3522_v6 = vpop.f32.mrf.mxu0 }
0x1c05   :  { %v3523_v18 = vadd.f32 %v6014_v37, %v3522_v6  ;;  %v5600_v6 = vld [vmem:[%s7480_s7 + $0xe8] sm:$0xf0] }
0x1c07   :  { %3582 = vmatpush.msrb.mxu1 %v3523_v18  ;;  %v5603_v18 = vor.u32 %v5961_v17, %v5600_v6  ;;  %v5970_v17 = vld [vmem:[%s7482_s9 + $0xa8] sm:$0xff] }
0x1c09   :  { %3862 = vmatpush.bf16.msra.mxu0 %v5603_v18  ;;  %v5977_v18 = vld [vmem:[%s7482_s9 + $0xe0] sm:$0xff] }
0x1c0c   :  { %v3524_v42 = vpop.f32.mrf.mxu0 }
0x1c0d   :  { %v3525_v4 = vadd.f32 %v6014_v37, %v3524_v42  ;;  %v5599_v37 = vor.u32 %v5962_v3, %v5598_v16  ;;  %v5954_v42 = vld [vmem:[%s7480_s7 + $0xa4] sm:$0xf0] }
0x1c0e   :  { %v5978_v3 = vld [vmem:[%s7482_s9 + $0xe8] sm:$0xff] }
0x1c0f   :  { %5513 = vmatmul.msk.f32.vlgmr.msra.gmra.mxu1 %vm319_vm2, %v3361_v22  ;;  %v5591_v22 = vor.u32 %v5960_v20, %v5590_v19 }
0x1c10   :  { %5515 = vmatpush.xpose.msk.msra.mxu1 %vm319_vm2, %v3444_v24  ;;  %v5592_v24 = vld [vmem:[%s7480_s7 + $0xd8] sm:$0xf0] }
0x1c7c   :  { %v3277_v25 = vpop.f32.mrf.mxu1 }
0x1c7d   :  { %v3282_v26 = vadd.f32 %v3277_v25, %v2880_v15  ;;  %v5595_v15 = vor.u32 %v5959_v21, %v5592_v24  ;;  %v5582_v25 = vld [vmem:[%s7480_s7 + $0xc0] sm:$0xf] }
0x1c7f   :  { %3863 = vmatpush.bf16.msra.mxu0 %v5595_v15 }
0x1c84   :  { %v3279_v28 = vpop.f32.mrf.mxu1 }
0x1c85   :  { %v3283_v29 = vadd.f32 %v3279_v28, %v2882_v27  ;;  %v5957_v27 = vld [vmem:[%s7480_s7 + $0xc4] sm:$0xf] }
0x1c8c   :  { %v3550_v30 = vpop.f32.mrf.mxu1 }
0x1c8d   :  { %v3553_v31 = vsel %vm346_vm3, %v3550_v30, -inf }
0x1c8e   :  { %3554 = vmax.xlane.f32.xlu0 %v3553_v31  ;;  %v5574_v31 = vld [vmem:[%s7480_s7 + $0xb0] sm:$0xf] }
0x1d01   :  { %v3555_v32 = vpop.xlane.xlu0 %3554 }
0x1d02   :  { %v3556_v33 = vsub.f32 %v3550_v30, %v3555_v32  ;;  %v5956_v32 = vld [vmem:[%s7480_s7 + $0xb4] sm:$0xf0] }
0x1d04   :  { %v3557_v34 = vmul.f32 1.442695, %v3556_v33  ;;  %v5955_v33 = vld [vmem:[%s7480_s7 + $0xb4] sm:$0xf] }
0x1d06   :  { %6087 = vpow2.f32 %v3557_v34  ;;  %v5575_v34 = vor.u32 %v5956_v32, %v5574_v31 }
0x1d0c   :  { %v6088_v35 = vpop.eup %6087 }
0x1d0d   :  { %v3559_v36 = vsel %vm346_vm3, %v6088_v35, 0.0 }
0x1d0e   :  { %3560 = vadd.xlane.f32.xlu1 %v3559_v36 }
0x1d81   :  { %v3561_v62 = vpop.xlane.xlu1 %3560 }
0x1d82   :  { %6089 = vrcp.f32 %v3561_v62  ;;  %v5566_v62 = vld [vmem:[%s7480_s7 + $0xa0] sm:$0xf] }
0x1d88   :  { %v6090_v38 = vpop.eup %6089 }
0x1d89   :  { %v3563_v39 = vmul.f32 %v6090_v38, %v6088_v35  ;;  %v5576_v35 = vld [vmem:[%s7480_s7 + $0xb8] sm:$0xf0]  ;;  %v5953_v38 = vld [vmem:[%s7480_s7 + $0xa4] sm:$0xf] }
0x1d8a   :  { %v5579_v36 = vor.u32 %v5955_v33, %v5576_v35  ;;  %v6017_v35 = vld [vmem:[%s7479_s6 + $0x8] ss:$0 sm:$0xff] }
0x1d8b   :  { %5514 = vmatmul.msk.f32.vlgmr.msrb.gmra.mxu1 %vm346_vm3, %v3563_v39  ;;  %v5567_v39 = vor.u32 %v5954_v42, %v5566_v62 }
0x1d8c   :  { %3642 = vmatpush.msrb.mxu1 %v3525_v4  ;;  %v5568_v4 = vld [vmem:[%s7480_s7 + $0xa8] sm:$0xf0] }
0x1d93   :  { %5516 = vmatmul.msk.f32.vlgmr.msra.gmra.mxu1 %vm319_vm2, %v3363_v40  ;;  %v5571_v40 = vor.u32 %v5953_v38, %v5568_v4  ;;  %v5976_v38 = vld [vmem:[%s7482_s9 + $0xd8] sm:$0xff] }
0x1d94   :  { %v5968_v4 = vld [vmem:[%s7482_s9 + $0x98] sm:$0xff] }
0x1e08   :  { %v3584_v41 = vpop.f32.mrf.mxu1 }
0x1e10   :  { %v3610_v43 = vpop.f32.mrf.mxu1 }
0x1e11   :  { %v3613_v60 = vsel %vm346_vm3, %v3610_v43, -inf }
0x1e12   :  { %3614 = vmax.xlane.f32.xlu2 %v3613_v60  ;;  %v5558_v60 = vld [vmem:[%s7480_s7 + $0x90] sm:$0xf] }
0x1e85   :  { %v3615_v44 = vpop.xlane.xlu2 %3614 }
0x1e86   :  { %v3616_v45 = vsub.f32 %v3610_v43, %v3615_v44  ;;  %v5952_v44 = vld [vmem:[%s7480_s7 + $0x94] sm:$0xf0] }
0x1e88   :  { %v3617_v46 = vmul.f32 1.442695, %v3616_v45  ;;  %v5951_v45 = vld [vmem:[%s7480_s7 + $0x94] sm:$0xf] }
0x1e8a   :  { %6091 = vpow2.f32 %v3617_v46 }
0x1e90   :  { %v6092_v61 = vpop.eup %6091 }
0x1e91   :  { %v3619_v47 = vsel %vm346_vm3, %v6092_v61, 0.0 }
0x1e92   :  { %3620 = vadd.xlane.f32.xlu0 %v3619_v47  ;;  %v5559_v47 = vor.u32 %v5952_v44, %v5558_v60  ;;  %v5965_v60 = vld [vmem:[%s7482_s9 + $0x80] sm:$0xff] }
0x1e93   :  { %v5547_v44 = vld [vmem:[%s7481_s8 + $0x1] ss:$2 sm:$0x3] }
0x1f05   :  { %v3621_v49 = vpop.xlane.xlu0 %3620 }
0x1f06   :  { %6093 = vrcp.f32 %v3621_v49  ;;  %v5563_v49 = vor.u32 %v5951_v45, %v5560_v48 }
0x1f0c   :  { %v6094_v50 = vpop.eup %6093 }
0x1f0d   :  { %v3623_v51 = vmul.f32 %v6094_v50, %v6092_v61 }
0x1f0f   :  { %5517 = vmatmul.msk.f32.vlgmr.msrb.gmra.mxu1 %vm346_vm3, %v3623_v51  ;;  %v5550_v51 = vld [vmem:[%s7480_s7 + $0x80] sm:$0xf] }
0x1f8c   :  { %v3644_v53 = vpop.f32.mrf.mxu1 }
0x1f8d   :  { %v3647_v55 = vpack.c.bf16 %v3644_v53, %v3584_v41  ;;  %v5949_v53 = vld [vmem:[%s7480_s7 + $0x84] sm:$0xf] }
0x1f8f   :  { %5530 = vmatmul.msk.bf16.vlgmr.msra.gmra.mxu2 %vm319_vm2, %v3647_v55  ;;  %v5551_v55 = vor.u32 %v5950_v52, %v5550_v51 }
0x2012   :  { %v3677_v57 = vpop.f32.mrf.mxu2 }
0x2013   :  { %v3682_v58 = vadd.f32 %v3677_v57, %v3282_v26  ;;  %v5958_v26 = vld [vmem:[%s7480_s7 + $0xc4] sm:$0xf0] }
0x2014   :  { %v5583_v28 = vor.u32 %v5958_v26, %v5582_v25 }
0x2015   :  { %v3686_v59 = vadd.f32 %v6015_v56, %v3682_v58 }
0x2017   :  { %v7282_v63 = vadd.f32 %v3686_v59, %v6959_v13  ;;  %v5606_v13 = vld [vmem:[%s7480_s7 + $0xf0] sm:$0xf] }
0x2019   :  { %3692 = vadd.xlane.f32.xlu1 %v7282_v63  ;;  %v3698_v0 = vmul.f32 %v7282_v63, %v7282_v63 }
0x201a   :  { %v3679_v1 = vpop.f32.mrf.mxu2 }
0x201b   :  { %v3683_v2 = vadd.f32 %v3679_v1, %v3283_v29  ;;  %3700 = vadd.xlane.f32.xlu0 %v3698_v0  ;;  %v5584_v29 = vld [vmem:[%s7480_s7 + $0xc8] sm:$0xf0] }
0x201c   :  { %v5587_v30 = vor.u32 %v5957_v27, %v5584_v29 }
0x201d   :  { %v3687_v7 = vadd.f32 %v6015_v56, %v3683_v2  ;;  %v5552_v56 = vld [vmem:[%s7480_s7 + $0x88] sm:$0xf0] }
0x201e   :  { %3864 = vmatpush.bf16.msra.mxu0 %v5587_v30  ;;  %v5555_v58 = vor.u32 %v5949_v53, %v5552_v56 }
0x201f   :  { %v7288_v8 = vadd.f32 %v3687_v7, %v6961_v14  ;;  %v5607_v14 = vor.u32 %v5964_v10, %v5606_v13  ;;  %v5972_v13 = vld [vmem:[%s7482_s9 + $0xb8] sm:$0xff] }
0x2020   :  { %4012 = vmatpush.bf16.msra.mxu1 %v5972_v13 }
0x2021   :  { %3694 = vadd.xlane.f32.xlu2 %v7288_v8  ;;  %v3699_v9 = vmul.f32 %v7288_v8, %v7288_v8  ;;  %3847 = vmatpush.bf16.msra.mxu3 %v5607_v14  ;;  %v5971_v14 = vld [vmem:[%s7482_s9 + $0xb0] sm:$0xff] }
0x2022   :  { %3865 = vmatpush.bf16.msra.mxu0 %v5579_v36 }
0x2023   :  { %3702 = vadd.xlane.f32.xlu1 %v3699_v9  ;;  %v5980_v9 = vld [vmem:[%s7482_s9 + $0xf8] sm:$0xff] }
0x2024   :  { %4026 = vmatpush.bf16.msrb.mxu2 %v5980_v9  ;;  %4013 = vmatpush.bf16.msra.mxu1 %v5971_v14 }
0x2025   :  { %3848 = vmatpush.bf16.msra.mxu3 %v5599_v37 }
0x2026   :  { %3866 = vmatpush.bf16.msra.mxu0 %v5571_v40  ;;  %v5967_v40 = vld [vmem:[%s7482_s9 + $0x90] sm:$0xff] }
0x2028   :  { %4027 = vmatpush.bf16.msrb.mxu2 %v5979_v11  ;;  %4014 = vmatpush.bf16.msra.mxu1 %v5970_v17 }
0x2029   :  { %3849 = vmatpush.bf16.msra.mxu3 %v5591_v22 }
0x202a   :  { %3867 = vmatpush.bf16.msra.mxu0 %v5563_v49  ;;  %v3763_v49 = vperm.slane %v5547_v44, 0 }
0x202c   :  { %4028 = vmatpush.bf16.msrb.mxu2 %v5978_v3 }
0x202d   :  { %3850 = vmatpush.bf16.msra.mxu3 %v5583_v28  ;;  %v6016_v28 = vld [vmem:[%s7479_s6 + $0x7] ss:$0 sm:$0xff] }
0x202e   :  { %3868 = vmatpush.bf16.msra.mxu0 %v5555_v58 }
0x2030   :  { %4029 = vmatpush.bf16.msrb.mxu2 %v5977_v18 }
0x2031   :  { %3851 = vmatpush.bf16.msra.mxu3 %v5575_v34 }
0x2034   :  { %4030 = vmatpush.bf16.msrb.mxu2 %v5976_v38 }
0x2035   :  { %3852 = vmatpush.bf16.msra.mxu3 %v5567_v39  ;;  %v5975_v39 = vld [vmem:[%s7482_s9 + $0xd0] sm:$0xff] }
0x2038   :  { %4031 = vmatpush.bf16.msrb.mxu2 %v5975_v39  ;;  %v6020_v39 = vld [vmem:[%s7479_s6 + $0xa] ss:$0 sm:$0xff] }
0x2039   :  { %3853 = vmatpush.bf16.msra.mxu3 %v5559_v47 }
0x203d   :  { %3854 = vmatpush.bf16.msra.mxu3 %v5551_v55 }
0x208c   :  { %v3693_v23 = vpop.xlane.xlu1 %3692 }
0x208d   :  { %v7366_v41 = vmul.f32 %v3693_v23, %v6708_v5  ;;  %v5974_v23 = vld [vmem:[%s7482_s9 + $0xc8] sm:$0xff] }
0x208e   :  { %v3701_v43 = vpop.xlane.xlu0 %3700  ;;  %4032 = vmatpush.bf16.msrb.mxu2 %v5974_v23 }
0x208f   :  { %v3706_v46 = vmul.f32 %v7366_v41, %v7366_v41  ;;  %v3704_v61 = vmul.f32 %v3701_v43, %v6708_v5  ;;  %v3710_v26 = vsub.f32 %v7282_v63, %v7366_v41  ;;  %v5973_v41 = vld [vmem:[%s7482_s9 + $0xc0] sm:$0xff]  ;;  %v5966_v43 = vld [vmem:[%s7482_s9 + $0x88] sm:$0xff] }
0x2091   :  { %v3708_v50 = vsub.f32 %v3704_v61, %v3706_v46  ;;  %v3764_v46 = vperm.slane %v5547_v44, 1 }
0x2092   :  { %4033 = vmatpush.bf16.msrb.mxu2 %v5973_v41 }
0x2093   :  { %v3712_v57 = vadd.f32 1e-05, %v3708_v50 }
0x2094   :  { %v3695_v59 = vpop.xlane.xlu2 %3694 }
0x2095   :  { %6095 = vrsqrt.f32 %v3712_v57  ;;  %v3697_v0 = vmul.f32 %v3695_v59, %v6708_v5  ;;  %vm3720_vm2 = vweird.f32 %v3712_v57 }
0x2096   :  { %v3703_v1 = vpop.xlane.xlu1 %3702 }
0x2097   :  { %v3707_v2 = vmul.f32 %v3697_v0, %v3697_v0  ;;  %v3705_v7 = vmul.f32 %v3703_v1, %v6708_v5  ;;  %v3711_v31 = vsub.f32 %v7288_v8, %v3697_v0  ;;  %v5969_v8 = vld [vmem:[%s7482_s9 + $0xa0] sm:$0xff]  ;;  %v6018_v1 = vld [vmem:[%s7479_s6 + $0xb] ss:$0 sm:$0xff] }
0x2098   :  { %4015 = vmatpush.bf16.msra.mxu1 %v5969_v8 }
0x2099   :  { %v3709_v10 = vsub.f32 %v3705_v7, %v3707_v2 }
0x209b   :  { %v6096_v12 = vpop.eup %6095  ;;  %v3713_v54 = vadd.f32 1e-05, %v3709_v10 }
0x209c   :  { %v3715_v16 = vmul.f32 %v6096_v12, %v3712_v57  ;;  %vm3721_vm1 = vweird.f32 %v6096_v12  ;;  %4016 = vmatpush.bf16.msra.mxu1 %v5968_v4 }
0x209d   :  { %6097 = vrsqrt.f32 %v3713_v54  ;;  %vm3722_vm3 = vmor %vm3720_vm2, %vm3721_vm1  ;;  %vm3730_vm5 = vweird.f32 %v3713_v54 }
0x209e   :  { %v3716_v37 = vmul.f32 %v6096_v12, %v3715_v16 }
0x20a0   :  { %v3717_v6 = vmul.f32 0.5, %v3716_v37  ;;  %4017 = vmatpush.bf16.msra.mxu1 %v5967_v40 }
0x20a2   :  { %v3718_v19 = vsub.f32 1.5, %v3717_v6 }
0x20a3   :  { %v6098_v20 = vpop.eup %6097 }
0x20a4   :  { %v3719_v21 = vmul.f32 %v6096_v12, %v3718_v19  ;;  %v3725_v22 = vmul.f32 %v6098_v20, %v3713_v54  ;;  %vm3731_vm4 = vweird.f32 %v6098_v20  ;;  %4018 = vmatpush.bf16.msra.mxu1 %v5966_v43 }
0x20a5   :  { %vm3732_vm6 = vmor %vm3730_vm5, %vm3731_vm4 }
0x20a6   :  { %v3726_v24 = vmul.f32 %v6098_v20, %v3725_v22  ;;  %v3723_v15 = vsel %vm3722_vm3, %v6096_v12, %v3719_v21 }
0x20a7   :  { %v3734_v29 = vmul.f32 %v3723_v15, %v3710_v26 }
0x20a8   :  { %v3727_v25 = vmul.f32 0.5, %v3726_v24  ;;  %4019 = vmatpush.bf16.msra.mxu1 %v5965_v60 }
0x20a9   :  { %v3737_v33 = vmul.f32 %v6016_v28, %v3734_v29 }
0x20aa   :  { %v3728_v27 = vsub.f32 1.5, %v3727_v25 }
0x20ab   :  { %v3740_v36 = vadd.f32 %v6017_v35, %v3737_v33 }
0x20ac   :  { %v3729_v30 = vmul.f32 %v6098_v20, %v3728_v27 }
0x20ae   :  { %v3733_v32 = vsel %vm3732_vm6, %v6098_v20, %v3729_v30 }
0x20af   :  { %v3735_v34 = vmul.f32 %v3733_v32, %v3711_v31 }
0x20b1   :  { %v3738_v63 = vmul.f32 %v6016_v28, %v3735_v34 }
0x20b3   :  { %v3741_v62 = vadd.f32 %v6017_v35, %v3738_v63 }
0x20b5   :  { %v3742_v42 = vpack.c.bf16 %v3741_v62, %v3740_v36 }
0x20b7   :  { %3855 = vmatmul.bf16.vlgmr.msra.gmra.mxu3 %v3742_v42  ;;  %3869 = vmatmul.bf16.vlgmr.msra.gmra.mxu0 %v3742_v42  ;;  %v6019_v42 = vld [vmem:[%s7479_s6 + $0x9] ss:$0 sm:$0xff]  ;;  %s6131_s6 = smov 128  }
0x2134   :  { %v3870_v45 = vpop.f32.mrf.mxu0 }
0x2135   :  { %v3871_v47 = vadd.f32 %v3870_v45, %v3764_v46 }
0x2137   :  { %v3876_v51 = vmax.f32 %v3871_v47, 0.0 }
0x213a   :  { %v3856_v61 = vpop.f32.mrf.mxu3 }
0x213b   :  { %v3857_v53 = vadd.f32 %v3856_v61, %v3763_v49 }
0x213c   :  { %v3872_v48 = vpop.f32.mrf.mxu0 }
0x213d   :  { %v3873_v50 = vadd.f32 %v3872_v48, %v3764_v46  ;;  %v3875_v58 = vmax.f32 %v3857_v53, 0.0 }
0x213f   :  { %v3878_v52 = vmax.f32 %v3873_v50, 0.0 }
0x2141   :  { %v3880_v55 = vpack.c.bf16 %v3878_v52, %v3876_v51 }
0x2142   :  { %v3858_v56 = vpop.f32.mrf.mxu3 }
0x2143   :  { %v3859_v57 = vadd.f32 %v3858_v56, %v3763_v49  ;;  %4034 = vmatmul.bf16.vlgmr.msrb.gmra.mxu2 %v3880_v55 }
0x2145   :  { %v3877_v59 = vmax.f32 %v3859_v57, 0.0 }
0x2147   :  { %v3879_v0 = vpack.c.bf16 %v3877_v59, %v3875_v58 }
0x2149   :  { %4020 = vmatmul.bf16.vlgmr.msra.gmra.mxu1 %v3879_v0 }
0x21c6   :  { %v4021_v2 = vpop.f32.mrf.mxu1  ;;  %v4035_v7 = vpop.f32.mrf.mxu2 }
0x21c7   :  { %v4022_v9 = vadd.f32 %v6018_v1, %v4021_v2 }
0x21c9   :  { %v4036_v13 = vadd.f32 %v4035_v7, %v4022_v9 }
0x21cb   :  { %v4040_v10 = vadd.f32 %v4036_v13, %v3740_v36 }
0x21cd   :  { %4044 = vadd.xlane.f32.xlu2 %v4040_v10  ;;  %v4050_v11 = vmul.f32 %v4040_v10, %v4040_v10 }
0x21ce   :  { %v4023_v14 = vpop.f32.mrf.mxu1  ;;  %v4037_v54 = vpop.f32.mrf.mxu2 }
0x21cf   :  { %v4024_v12 = vadd.f32 %v6018_v1, %v4023_v14  ;;  %4052 = vadd.xlane.f32.xlu1 %v4050_v11 }
0x21d1   :  { %v4038_v16 = vadd.f32 %v4037_v54, %v4024_v12 }
0x21d3   :  { %v4041_v3 = vadd.f32 %v4038_v16, %v3741_v62 }
0x21d5   :  { %4046 = vadd.xlane.f32.xlu0 %v4041_v3  ;;  %v4051_v17 = vmul.f32 %v4041_v3, %v4041_v3 }
0x21d7   :  { %4054 = vadd.xlane.f32.xlu2 %v4051_v17 }
0x2240   :  { %v4045_v37 = vpop.xlane.xlu2 %4044 }
0x2241   :  { %v4048_v6 = vmul.f32 %v4045_v37, %v6708_v5 }
0x2242   :  { %v4053_v18 = vpop.xlane.xlu1 %4052 }
0x2243   :  { %v4058_v19 = vmul.f32 %v4048_v6, %v4048_v6  ;;  %v4056_v20 = vmul.f32 %v4053_v18, %v6708_v5  ;;  %v4062_v62 = vsub.f32 %v4040_v10, %v4048_v6 }
0x2245   :  { %v4060_v21 = vsub.f32 %v4056_v20, %v4058_v19 }
0x2247   :  { %v4064_v22 = vadd.f32 1e-05, %v4060_v21 }
0x2248   :  { %v4047_v24 = vpop.xlane.xlu0 %4046 }
0x2249   :  { %6099 = vrsqrt.f32 %v4064_v22  ;;  %v4049_v15 = vmul.f32 %v4047_v24, %v6708_v5  ;;  %vm4072_vm8 = vweird.f32 %v4064_v22 }
0x224a   :  { %v4055_v25 = vpop.xlane.xlu2 %4054 }
0x224b   :  { %v4059_v26 = vmul.f32 %v4049_v15, %v4049_v15  ;;  %v4057_v27 = vmul.f32 %v4055_v25, %v6708_v5  ;;  %v4063_v60 = vsub.f32 %v4041_v3, %v4049_v15 }
0x224d   :  { %v4061_v28 = vsub.f32 %v4057_v27, %v4059_v26 }
0x224f   :  { %v6100_v29 = vpop.eup %6099  ;;  %v4065_v30 = vadd.f32 1e-05, %v4061_v28 }
0x2250   :  { %v4067_v31 = vmul.f32 %v6100_v29, %v4064_v22  ;;  %vm4073_vm7 = vweird.f32 %v6100_v29 }
0x2251   :  { %6101 = vrsqrt.f32 %v4065_v30  ;;  %vm4074_vm9 = vmor %vm4072_vm8, %vm4073_vm7  ;;  %vm4082_vm11 = vweird.f32 %v4065_v30 }
0x2252   :  { %v4068_v32 = vmul.f32 %v6100_v29, %v4067_v31 }
0x2254   :  { %v4069_v33 = vmul.f32 0.5, %v4068_v32 }
0x2256   :  { %v4070_v34 = vsub.f32 1.5, %v4069_v33 }
0x2257   :  { %v6102_v35 = vpop.eup %6101 }
0x2258   :  { %v4071_v63 = vmul.f32 %v6100_v29, %v4070_v34  ;;  %v4077_v36 = vmul.f32 %v6102_v35, %v4065_v30  ;;  %vm4083_vm10 = vweird.f32 %v6102_v35 }
0x2259   :  { %vm4084_vm12 = vmor %vm4082_vm11, %vm4083_vm10 }
0x225a   :  { %v4075_v5 = vsel %vm4074_vm9, %v6100_v29, %v4071_v63  ;;  %v4078_v38 = vmul.f32 %v6102_v35, %v4077_v36 }
0x225b   :  { %v4086_v8 = vmul.f32 %v4075_v5, %v4062_v62 }
0x225c   :  { %v4079_v4 = vmul.f32 0.5, %v4078_v38 }
0x225d   :  { %v4089_v23 = vmul.f32 %v6019_v42, %v4086_v8 }
0x225e   :  { %v4080_v40 = vsub.f32 1.5, %v4079_v4 }
0x225f   :  { %v4092_v41 = vadd.f32 %v6020_v39, %v4089_v23 }
0x2260   :  { %v4081_v43 = vmul.f32 %v6102_v35, %v4080_v40 }
0x2261   :  { %4094 = vst [vmem:[#allocation2] sm:$0xff] %v4092_v41 }
0x2262   :  { %v4085_v44 = vsel %vm4084_vm12, %v6102_v35, %v4081_v43 }
0x2263   :  { %v4087_v45 = vmul.f32 %v4085_v44, %v4063_v60 }
0x2265   :  { %v4090_v46 = vmul.f32 %v6019_v42, %v4087_v45 }
0x2267   :  { %v4093_v61 = vadd.f32 %v6020_v39, %v4090_v46 }
0x2269   :  { %4095 = vst [vmem:[#allocation2 + $0x8] sm:$0xff] %v4093_v61 }
0x226a   :  { %4108 = dma.vmem_to_hbm [thread:$0]  %s4101_s28, 256, %s4103_s11, [#allocation3], %s6131_s6, %s6131_s6, %s6132_s12  }
0x226b   :  { %6127 = dma.done.wait [#allocation3], 256  }
0x226c   :  { %6128 = vsyncadd [#allocation3], 4294967040 }
0x226d   :  { %4113 = vsyncpa [#allocation3], 1 }

</bundles_post_ra>
